<compile_context>
chip_gen: v5e
topology: v5e:2x2
jax: 0.10.0
libtpu: 0.0.40
codegen_flags: <defaults>
</compile_context>

<pallas_src>
import functools

import jax
import jax.numpy as jnp
from jax import lax
from jax.experimental import pallas as pl
from jax.experimental.pallas import tpu as pltpu

EXPANSION = 4
BN_EPS = 1e-5


# --------------------------------------------------------------------------
# Pallas kernel: one batch element per grid step, everything fused in VMEM.
# --------------------------------------------------------------------------
def _bottleneck_kernel(*refs, H, W, stride, planes, shortcut_mode):
    if shortcut_mode == "proj":
        (x_ref, w1_ref, b1_ref, w2_ref, b2_ref, w3_ref, b3_ref,
         ws_ref, bs_ref, o_ref, pad_ref) = refs
    else:
        (x_ref, w1_ref, b1_ref, w2_ref, b2_ref, w3_ref, b3_ref,
         o_ref, pad_ref) = refs
        ws_ref = bs_ref = None

    P = planes
    Cout = EXPANSION * P
    Ho, Wo = H // stride, W // stride
    Cin = x_ref.shape[3]
    bf16 = jnp.bfloat16

    x = x_ref[0]                                       # (H, W, Cin) bf16

    # ---- conv1 (1x1, scale-folded) + bn1-shift + relu ----------------------
    h1 = jnp.dot(x.reshape(H * W, Cin), w1_ref[...],
                 preferred_element_type=jnp.float32)   # (H*W, P) f32
    h1 = jnp.maximum(h1 + b1_ref[...], 0.0).astype(bf16)

    # ---- build bf16 zero-padded activation for the 3x3 conv ----------------
    # Border is re-zeroed every step (cheap; scratch is per-core, so a
    # first-iteration-only guard would be unsafe under megacore partitioning).
    zrow = jnp.zeros((1, W + 2, P), bf16)
    zcol = jnp.zeros((H + 2, 1, P), bf16)
    pad_ref[0:1, :, :] = zrow
    pad_ref[H + 1:H + 2, :, :] = zrow
    pad_ref[:, 0:1, :] = zcol
    pad_ref[:, W + 1:W + 2, :] = zcol
    pad_ref[1:H + 1, 1:W + 1, :] = h1.reshape(H, W, P)

    # ---- conv2 (3x3, pad=1, stride) + bn2-shift + relu ---------------------
    # 9 accumulated bf16 matmuls (K = P); strided slices read only the Ho*Wo
    # output positions, so no full-res compute for stride > 1.
    h2 = None
    for kh in range(3):
        for kw in range(3):
            if stride == 1:
                win = pad_ref[kh:kh + H, kw:kw + W, :]            # (H, W, P)
            else:
                win = pad_ref[pl.ds(kh, Ho, stride),
                              pl.ds(kw, Wo, stride), :]           # (Ho, Wo, P)
            part = jnp.dot(win.reshape(Ho * Wo, P), w2_ref[kh * 3 + kw],
                           preferred_element_type=jnp.float32)
            h2 = part if h2 is None else h2 + part
    h2 = jnp.maximum(h2 + b2_ref[...], 0.0)                       # (Ho*Wo, P)

    # ---- conv3 (1x1, scale-folded) + bn3-shift -----------------------------
    h3 = jnp.dot(h2.astype(bf16), w3_ref[...],
                 preferred_element_type=jnp.float32) + b3_ref[...]  # (Ho*Wo, Cout)

    # ---- shortcut -----------------------------------------------------------
    if shortcut_mode == "proj":
        if stride == 1:
            xs = x.reshape(H * W, Cin)
        else:
            # All-slice indexer (no int mixed with strided slices).
            xs = x_ref[:, pl.ds(0, Ho, stride),
                       pl.ds(0, Wo, stride), :].reshape(Ho * Wo, Cin)
        h3 = h3 + jnp.dot(xs, ws_ref[...],
                          preferred_element_type=jnp.float32) + bs_ref[...]
    elif shortcut_mode == "identity":
        h3 = h3 + x.reshape(H * W, Cin).astype(jnp.float32)

    o_ref[0] = jnp.maximum(h3, 0.0).reshape(Ho, Wo, Cout).astype(o_ref.dtype)


# --------------------------------------------------------------------------
# Wrapper: weight prep (BN-scale folding, bf16), BlockSpecs / grid setup.
# --------------------------------------------------------------------------
def _vmem_limit_bytes():
    # Generation-aware: ~75% of physical VMEM, capped (v5e/v6e: 96 MiB,
    # v7x: 48 MiB).  Falls back to a safe default if no TPU is queryable.
    try:
        cap = int(pltpu.get_tpu_info().vmem_capacity_bytes)
    except Exception:
        cap = 64 * 1024 * 1024
    return max(32 * 1024 * 1024, min(cap * 3 // 4, 100 * 1024 * 1024))


def bottleneck_forward(x_nhwc, params, *, stride, shortcut_mode):
    N, H, W, Cin = x_nhwc.shape
    planes = params["w1"].shape[1]
    Cout = EXPANSION * planes
    assert H % stride == 0 and W % stride == 0, \
        "this kernel assumes spatial dims divisible by stride"
    if shortcut_mode == "identity":
        assert stride == 1 and Cin == Cout, \
            "identity shortcut requires stride==1 and Cin==Cout"
    Ho, Wo = H // stride, W // stride
    bf16 = jnp.bfloat16

    # bf16 HBM input halves the per-step input DMA (matmuls are bf16 anyway).
    x_bf16 = x_nhwc.astype(bf16)

    # Fold the BN scale into the conv weights (one-time, tiny tensors).
    w1 = (params["w1"] * params["s1"]).astype(bf16)                   # (Cin, P)
    w2 = (params["w2"] * params["s2"].reshape(1, 1, 1, planes)
          ).reshape(9, planes, planes).astype(bf16)                   # (9, P, P)
    w3 = (params["w3"] * params["s3"]).astype(bf16)                   # (P, Cout)

    kernel = functools.partial(_bottleneck_kernel, H=H, W=W, stride=stride,
                               planes=planes, shortcut_mode=shortcut_mode)

    def vec(c):
        return pl.BlockSpec((1, c), lambda n: (0, 0))

    in_specs = [
        pl.BlockSpec((1, H, W, Cin), lambda n: (n, 0, 0, 0)),         # x
        pl.BlockSpec((Cin, planes), lambda n: (0, 0)),                # w1
        vec(planes),                                                  # b1
        pl.BlockSpec((9, planes, planes), lambda n: (0, 0, 0)),       # w2
        vec(planes),                                                  # b2
        pl.BlockSpec((planes, Cout), lambda n: (0, 0)),               # w3
        vec(Cout),                                                    # b3
    ]
    args = [x_bf16, w1, params["b1"], w2, params["b2"], w3, params["b3"]]

    if shortcut_mode == "proj":
        ws = (params["ws"] * params["ss"]).astype(bf16)               # (Cin, Cout)
        in_specs += [pl.BlockSpec((Cin, Cout), lambda n: (0, 0)),     # ws
                     vec(Cout)]                                       # bs
        args += [ws, params["bs"]]
    # identity / none: no dummy shortcut weights are created or DMA'd.

    flops = 2 * N * (H * W * Cin * planes
                     + Ho * Wo * 9 * planes * planes
                     + Ho * Wo * planes * Cout
                     + (Ho * Wo * Cin * Cout if shortcut_mode == "proj" else 0))
    bytes_accessed = int(
        sum(int(a.size) * a.dtype.itemsize for a in args)
        + N * Ho * Wo * Cout * 4)

    return pl.pallas_call(
        kernel,
        out_shape=jax.ShapeDtypeStruct((N, Ho, Wo, Cout), jnp.float32),
        grid_spec=pltpu.PrefetchScalarGridSpec(
            num_scalar_prefetch=0,
            grid=(N,),
            in_specs=in_specs,
            out_specs=pl.BlockSpec((1, Ho, Wo, Cout), lambda n: (n, 0, 0, 0)),
            scratch_shapes=[pltpu.VMEM((H + 2, W + 2, planes), jnp.bfloat16)],
        ),
        compiler_params=pltpu.CompilerParams(
            dimension_semantics=("parallel",),
            vmem_limit_bytes=_vmem_limit_bytes()),
        cost_estimate=pl.CostEstimate(flops=flops, transcendentals=0,
                                      bytes_accessed=bytes_accessed),
    )(*args)


# --------------------------------------------------------------------------
# Deterministic synthetic parameters (shapes follow Bottleneck.__init__).
# --------------------------------------------------------------------------
def init_params(key, in_planes, planes, stride, use_residual):
    Cout = EXPANSION * planes
    ks = jax.random.split(key, 20)

    def bn_fold(kg, kb, km, kv, c):
        gamma = jax.random.uniform(kg, (c,), minval=0.5, maxval=1.5)
        beta = 0.1 * jax.random.normal(kb, (c,))
        mean = 0.1 * jax.random.normal(km, (c,))
        var = jax.random.uniform(kv, (c,), minval=0.5, maxval=1.5)
        scale = gamma / jnp.sqrt(var + BN_EPS)
        shift = beta - mean * scale
        return (scale.reshape(1, c).astype(jnp.float32),
                shift.reshape(1, c).astype(jnp.float32))

    p = {}
    p["w1"] = (0.3 * jax.random.normal(ks[0], (in_planes, planes))).astype(jnp.float32)
    p["s1"], p["b1"] = bn_fold(ks[1], ks[2], ks[3], ks[4], planes)
    p["w2"] = (0.2 * jax.random.normal(ks[5], (3, 3, planes, planes))).astype(jnp.float32)
    p["s2"], p["b2"] = bn_fold(ks[6], ks[7], ks[8], ks[9], planes)
    p["w3"] = (0.3 * jax.random.normal(ks[10], (planes, Cout))).astype(jnp.float32)
    p["s3"], p["b3"] = bn_fold(ks[11], ks[12], ks[13], ks[14], Cout)

    if not use_residual:
        mode = "none"
    elif stride != 1 or in_planes != Cout:
        mode = "proj"
    else:
        mode = "identity"

    if mode == "proj":
        p["ws"] = (0.3 * jax.random.normal(ks[15], (in_planes, Cout))).astype(jnp.float32)
        p["ss"], p["bs"] = bn_fold(ks[16], ks[17], ks[18], ks[19], Cout)
    return p, mode


# --------------------------------------------------------------------------
# Pure-JAX f32 reference (for correctness check of the Pallas kernel).
# --------------------------------------------------------------------------
def bottleneck_reference(x_nhwc, p, *, stride, shortcut_mode):
    Cin = x_nhwc.shape[-1]
    planes = p["w1"].shape[1]
    Cout = EXPANSION * planes
    dn = ("NHWC", "HWIO", "NHWC")

    def conv(x, w, s, pad):
        return lax.conv_general_dilated(x, w, window_strides=(s, s),
                                        padding=pad, dimension_numbers=dn)

    def bn(x, scale, shift):
        return x * scale.reshape(1, 1, 1, -1) + shift.reshape(1, 1, 1, -1)

    h = conv(x_nhwc, p["w1"].reshape(1, 1, Cin, planes), 1, "VALID")
    h = jnp.maximum(bn(h, p["s1"], p["b1"]), 0.0)
    h = conv(h, p["w2"], stride, ((1, 1), (1, 1)))
    h = jnp.maximum(bn(h, p["s2"], p["b2"]), 0.0)
    h = bn(conv(h, p["w3"].reshape(1, 1, planes, Cout), 1, "VALID"),
           p["s3"], p["b3"])
    if shortcut_mode == "proj":
        sc = bn(conv(x_nhwc, p["ws"].reshape(1, 1, Cin, Cout), stride, "VALID"),
                p["ss"], p["bs"])
        h = h + sc
    elif shortcut_mode == "identity":
        h = h + x_nhwc
    return jnp.maximum(h, 0.0)


# --------------------------------------------------------------------------
if __name__ == "__main__":
    key = jax.random.PRNGKey(0)

    # (N, in_planes, planes, H, W, stride, use_residual)
    # NOTE: these channel counts (<128 lanes) are correctness-only shapes;
    # real ResNet configs should use channel dims that are multiples of 128.
    configs = [
        (2, 16, 4, 16, 16, 1, True),    # identity shortcut
        (2, 4, 4, 16, 16, 2, True),     # projection shortcut, stride 2
        (2, 4, 4, 16, 16, 1, False),    # no residual
    ]
    for idx, (N, in_planes, planes, H, W, stride, use_res) in enumerate(configs):
        kx, kp, key = jax.random.split(key, 3)
        x_nchw = jax.random.normal(kx, (N, in_planes, H, W), jnp.float32)  # PyTorch NCHW
        x_nhwc = jnp.transpose(x_nchw, (0, 2, 3, 1))                       # kernel NHWC

        params, mode = init_params(kp, in_planes, planes, stride, use_res)

        out = bottleneck_forward(x_nhwc, params, stride=stride, shortcut_mode=mode)
        out = jax.block_until_ready(out)
        assert out.shape == (N, H // stride, W // stride, planes * EXPANSION)

        ref = bottleneck_reference(x_nhwc, params, stride=stride, shortcut_mode=mode)
        err = float(jnp.max(jnp.abs(out - ref) / (jnp.abs(ref) + 1.0)))
        assert err < 5e-2, (
            f"config {idx} (mode={mode}, stride={stride}) mismatch: err={err}")

    print("KERNEL_OK")
</pallas_src>

<mosaic_0001>
module attributes {stable_mosaic.version = 11 : i64} {
  func.func @_bottleneck_kernel(%arg0: i32, %arg1: memref<1x16x16x16xbf16, #tpu.memory_space<vmem>>, %arg2: memref<16x4xbf16, #tpu.memory_space<vmem>>, %arg3: memref<1x4xf32, #tpu.memory_space<vmem>>, %arg4: memref<9x4x4xbf16, #tpu.memory_space<vmem>>, %arg5: memref<1x4xf32, #tpu.memory_space<vmem>>, %arg6: memref<4x16xbf16, #tpu.memory_space<vmem>>, %arg7: memref<1x16xf32, #tpu.memory_space<vmem>>, %arg8: memref<1x16x16x16xf32, #tpu.memory_space<vmem>>, %arg9: memref<18x18x4xbf16, #tpu.memory_space<vmem>>) attributes {dimension_semantics = [#tpu.dimension_semantics<parallel>], iteration_bounds = array<i64: 2>, scalar_prefetch = 0 : i64, scratch_operands = 1 : i64, tpu.core_type = #tpu.core_type<tc>, window_params = [{transform_indices = @transform_0, window_bounds = array<i64: 1, 16, 16, 16>}, {pipeline_mode = #tpu.pipeline_mode<synchronous>, transform_indices = @transform_1, window_bounds = array<i64: 16, 4>}, {pipeline_mode = #tpu.pipeline_mode<synchronous>, transform_indices = @transform_2, window_bounds = array<i64: 1, 4>}, {pipeline_mode = #tpu.pipeline_mode<synchronous>, transform_indices = @transform_3, window_bounds = array<i64: 9, 4, 4>}, {pipeline_mode = #tpu.pipeline_mode<synchronous>, transform_indices = @transform_4, window_bounds = array<i64: 1, 4>}, {pipeline_mode = #tpu.pipeline_mode<synchronous>, transform_indices = @transform_5, window_bounds = array<i64: 4, 16>}, {pipeline_mode = #tpu.pipeline_mode<synchronous>, transform_indices = @transform_6, window_bounds = array<i64: 1, 16>}, {transform_indices = @transform_7, window_bounds = array<i64: 1, 16, 16, 16>}]} {
    %c0 = arith.constant 0 : index
    %c0_0 = arith.constant 0 : index
    %c0_1 = arith.constant 0 : index
    %c0_2 = arith.constant 0 : index
    %0 = vector.load %arg1[%c0, %c0_0, %c0_1, %c0_2] : memref<1x16x16x16xbf16, #tpu.memory_space<vmem>>, vector<1x16x16x16xbf16>
    %1 = vector.shape_cast %0 : vector<1x16x16x16xbf16> to vector<16x16x16xbf16>
    %2 = vector.shape_cast %1 : vector<16x16x16xbf16> to vector<256x16xbf16>
    %c0_3 = arith.constant 0 : index
    %c0_4 = arith.constant 0 : index
    %3 = vector.load %arg2[%c0_3, %c0_4] : memref<16x4xbf16, #tpu.memory_space<vmem>>, vector<16x4xbf16>
    %cst = arith.constant dense<0.000000e+00> : vector<256x4xf32>
    %4 = tpu.matmul %2, %3, %cst {dimension_numbers = #tpu.dot_dimension_numbers<[1], [0], [0], [1], [0, 0, 1, 1], [], []>} : vector<256x16xbf16>, vector<16x4xbf16>, vector<256x4xf32> -> vector<256x4xf32>
    %c0_5 = arith.constant 0 : index
    %c0_6 = arith.constant 0 : index
    %5 = vector.load %arg3[%c0_5, %c0_6] : memref<1x4xf32, #tpu.memory_space<vmem>>, vector<1x4xf32>
    %6 = vector.broadcast %5 : vector<1x4xf32> to vector<256x4xf32>
    %7 = arith.addf %4, %6 : vector<256x4xf32>
    %cst_7 = arith.constant 0.000000e+00 : f32
    %8 = vector.broadcast %cst_7 : f32 to vector<256x4xf32>
    %9 = arith.maximumf %7, %8 : vector<256x4xf32>
    %10 = arith.truncf %9 : vector<256x4xf32> to vector<256x4xbf16>
    %cst_8 = arith.constant 0.000000e+00 : bf16
    %11 = vector.broadcast %cst_8 : bf16 to vector<1x18x4xbf16>
    %cst_9 = arith.constant 0.000000e+00 : bf16
    %12 = vector.broadcast %cst_9 : bf16 to vector<18x1x4xbf16>
    %c0_10 = arith.constant 0 : index
    %c0_11 = arith.constant 0 : index
    %c0_12 = arith.constant 0 : index
    %13 = vector.load %arg9[%c0_10, %c0_11, %c0_12] : memref<18x18x4xbf16, #tpu.memory_space<vmem>>, vector<1x18x4xbf16>
    tpu.vector_store %arg9[%c0_10, %c0_11, %c0_12], %11 {strides = array<i32>} : memref<18x18x4xbf16, #tpu.memory_space<vmem>>, vector<1x18x4xbf16>,
    %c17 = arith.constant 17 : index
    %c0_13 = arith.constant 0 : index
    %c0_14 = arith.constant 0 : index
    %14 = vector.load %arg9[%c17, %c0_13, %c0_14] : memref<18x18x4xbf16, #tpu.memory_space<vmem>>, vector<1x18x4xbf16>
    tpu.vector_store %arg9[%c17, %c0_13, %c0_14], %11 {strides = array<i32>} : memref<18x18x4xbf16, #tpu.memory_space<vmem>>, vector<1x18x4xbf16>,
    %c0_15 = arith.constant 0 : index
    %c0_16 = arith.constant 0 : index
    %c0_17 = arith.constant 0 : index
    %15 = vector.load %arg9[%c0_15, %c0_16, %c0_17] : memref<18x18x4xbf16, #tpu.memory_space<vmem>>, vector<18x1x4xbf16>
    tpu.vector_store %arg9[%c0_15, %c0_16, %c0_17], %12 {strides = array<i32>} : memref<18x18x4xbf16, #tpu.memory_space<vmem>>, vector<18x1x4xbf16>,
    %c0_18 = arith.constant 0 : index
    %c17_19 = arith.constant 17 : index
    %c0_20 = arith.constant 0 : index
    %16 = vector.load %arg9[%c0_18, %c17_19, %c0_20] : memref<18x18x4xbf16, #tpu.memory_space<vmem>>, vector<18x1x4xbf16>
    tpu.vector_store %arg9[%c0_18, %c17_19, %c0_20], %12 {strides = array<i32>} : memref<18x18x4xbf16, #tpu.memory_space<vmem>>, vector<18x1x4xbf16>,
    %17 = vector.shape_cast %10 : vector<256x4xbf16> to vector<16x16x4xbf16>
    %c1 = arith.constant 1 : index
    %c1_21 = arith.constant 1 : index
    %c0_22 = arith.constant 0 : index
    %18 = vector.load %arg9[%c1, %c1_21, %c0_22] : memref<18x18x4xbf16, #tpu.memory_space<vmem>>, vector<16x16x4xbf16>
    tpu.vector_store %arg9[%c1, %c1_21, %c0_22], %17 {strides = array<i32>} : memref<18x18x4xbf16, #tpu.memory_space<vmem>>, vector<16x16x4xbf16>,
    %c0_23 = arith.constant 0 : index
    %c0_24 = arith.constant 0 : index
    %c0_25 = arith.constant 0 : index
    %19 = vector.load %arg9[%c0_23, %c0_24, %c0_25] : memref<18x18x4xbf16, #tpu.memory_space<vmem>>, vector<16x16x4xbf16>
    %20 = vector.shape_cast %19 : vector<16x16x4xbf16> to vector<256x4xbf16>
    %c0_26 = arith.constant 0 : index
    %c0_27 = arith.constant 0 : index
    %c0_28 = arith.constant 0 : index
    %21 = vector.load %arg4[%c0_26, %c0_27, %c0_28] : memref<9x4x4xbf16, #tpu.memory_space<vmem>>, vector<1x4x4xbf16>
    %22 = vector.shape_cast %21 : vector<1x4x4xbf16> to vector<4x4xbf16>
    %cst_29 = arith.constant dense<0.000000e+00> : vector<256x4xf32>
    %23 = tpu.matmul %20, %22, %cst_29 {dimension_numbers = #tpu.dot_dimension_numbers<[1], [0], [0], [1], [0, 0, 1, 1], [], []>} : vector<256x4xbf16>, vector<4x4xbf16>, vector<256x4xf32> -> vector<256x4xf32>
    %c0_30 = arith.constant 0 : index
    %c1_31 = arith.constant 1 : index
    %c0_32 = arith.constant 0 : index
    %24 = vector.load %arg9[%c0_30, %c1_31, %c0_32] : memref<18x18x4xbf16, #tpu.memory_space<vmem>>, vector<16x16x4xbf16>
    %25 = vector.shape_cast %24 : vector<16x16x4xbf16> to vector<256x4xbf16>
    %c1_33 = arith.constant 1 : index
    %c0_34 = arith.constant 0 : index
    %c0_35 = arith.constant 0 : index
    %26 = vector.load %arg4[%c1_33, %c0_34, %c0_35] : memref<9x4x4xbf16, #tpu.memory_space<vmem>>, vector<1x4x4xbf16>
    %27 = vector.shape_cast %26 : vector<1x4x4xbf16> to vector<4x4xbf16>
    %cst_36 = arith.constant dense<0.000000e+00> : vector<256x4xf32>
    %28 = tpu.matmul %25, %27, %cst_36 {dimension_numbers = #tpu.dot_dimension_numbers<[1], [0], [0], [1], [0, 0, 1, 1], [], []>} : vector<256x4xbf16>, vector<4x4xbf16>, vector<256x4xf32> -> vector<256x4xf32>
    %29 = arith.addf %23, %28 : vector<256x4xf32>
    %c0_37 = arith.constant 0 : index
    %c2 = arith.constant 2 : index
    %c0_38 = arith.constant 0 : index
    %30 = vector.load %arg9[%c0_37, %c2, %c0_38] : memref<18x18x4xbf16, #tpu.memory_space<vmem>>, vector<16x16x4xbf16>
    %31 = vector.shape_cast %30 : vector<16x16x4xbf16> to vector<256x4xbf16>
    %c2_39 = arith.constant 2 : index
    %c0_40 = arith.constant 0 : index
    %c0_41 = arith.constant 0 : index
    %32 = vector.load %arg4[%c2_39, %c0_40, %c0_41] : memref<9x4x4xbf16, #tpu.memory_space<vmem>>, vector<1x4x4xbf16>
    %33 = vector.shape_cast %32 : vector<1x4x4xbf16> to vector<4x4xbf16>
    %cst_42 = arith.constant dense<0.000000e+00> : vector<256x4xf32>
    %34 = tpu.matmul %31, %33, %cst_42 {dimension_numbers = #tpu.dot_dimension_numbers<[1], [0], [0], [1], [0, 0, 1, 1], [], []>} : vector<256x4xbf16>, vector<4x4xbf16>, vector<256x4xf32> -> vector<256x4xf32>
    %35 = arith.addf %29, %34 : vector<256x4xf32>
    %c1_43 = arith.constant 1 : index
    %c0_44 = arith.constant 0 : index
    %c0_45 = arith.constant 0 : index
    %36 = vector.load %arg9[%c1_43, %c0_44, %c0_45] : memref<18x18x4xbf16, #tpu.memory_space<vmem>>, vector<16x16x4xbf16>
    %37 = vector.shape_cast %36 : vector<16x16x4xbf16> to vector<256x4xbf16>
    %c3 = arith.constant 3 : index
    %c0_46 = arith.constant 0 : index
    %c0_47 = arith.constant 0 : index
    %38 = vector.load %arg4[%c3, %c0_46, %c0_47] : memref<9x4x4xbf16, #tpu.memory_space<vmem>>, vector<1x4x4xbf16>
    %39 = vector.shape_cast %38 : vector<1x4x4xbf16> to vector<4x4xbf16>
    %cst_48 = arith.constant dense<0.000000e+00> : vector<256x4xf32>
    %40 = tpu.matmul %37, %39, %cst_48 {dimension_numbers = #tpu.dot_dimension_numbers<[1], [0], [0], [1], [0, 0, 1, 1], [], []>} : vector<256x4xbf16>, vector<4x4xbf16>, vector<256x4xf32> -> vector<256x4xf32>
    %41 = arith.addf %35, %40 : vector<256x4xf32>
    %c1_49 = arith.constant 1 : index
    %c1_50 = arith.constant 1 : index
    %c0_51 = arith.constant 0 : index
    %42 = vector.load %arg9[%c1_49, %c1_50, %c0_51] : memref<18x18x4xbf16, #tpu.memory_space<vmem>>, vector<16x16x4xbf16>
    %43 = vector.shape_cast %42 : vector<16x16x4xbf16> to vector<256x4xbf16>
    %c4 = arith.constant 4 : index
    %c0_52 = arith.constant 0 : index
    %c0_53 = arith.constant 0 : index
    %44 = vector.load %arg4[%c4, %c0_52, %c0_53] : memref<9x4x4xbf16, #tpu.memory_space<vmem>>, vector<1x4x4xbf16>
    %45 = vector.shape_cast %44 : vector<1x4x4xbf16> to vector<4x4xbf16>
    %cst_54 = arith.constant dense<0.000000e+00> : vector<256x4xf32>
    %46 = tpu.matmul %43, %45, %cst_54 {dimension_numbers = #tpu.dot_dimension_numbers<[1], [0], [0], [1], [0, 0, 1, 1], [], []>} : vector<256x4xbf16>, vector<4x4xbf16>, vector<256x4xf32> -> vector<256x4xf32>
    %47 = arith.addf %41, %46 : vector<256x4xf32>
    %c1_55 = arith.constant 1 : index
    %c2_56 = arith.constant 2 : index
    %c0_57 = arith.constant 0 : index
    %48 = vector.load %arg9[%c1_55, %c2_56, %c0_57] : memref<18x18x4xbf16, #tpu.memory_space<vmem>>, vector<16x16x4xbf16>
    %49 = vector.shape_cast %48 : vector<16x16x4xbf16> to vector<256x4xbf16>
    %c5 = arith.constant 5 : index
    %c0_58 = arith.constant 0 : index
    %c0_59 = arith.constant 0 : index
    %50 = vector.load %arg4[%c5, %c0_58, %c0_59] : memref<9x4x4xbf16, #tpu.memory_space<vmem>>, vector<1x4x4xbf16>
    %51 = vector.shape_cast %50 : vector<1x4x4xbf16> to vector<4x4xbf16>
    %cst_60 = arith.constant dense<0.000000e+00> : vector<256x4xf32>
    %52 = tpu.matmul %49, %51, %cst_60 {dimension_numbers = #tpu.dot_dimension_numbers<[1], [0], [0], [1], [0, 0, 1, 1], [], []>} : vector<256x4xbf16>, vector<4x4xbf16>, vector<256x4xf32> -> vector<256x4xf32>
    %53 = arith.addf %47, %52 : vector<256x4xf32>
    %c2_61 = arith.constant 2 : index
    %c0_62 = arith.constant 0 : index
    %c0_63 = arith.constant 0 : index
    %54 = vector.load %arg9[%c2_61, %c0_62, %c0_63] : memref<18x18x4xbf16, #tpu.memory_space<vmem>>, vector<16x16x4xbf16>
    %55 = vector.shape_cast %54 : vector<16x16x4xbf16> to vector<256x4xbf16>
    %c6 = arith.constant 6 : index
    %c0_64 = arith.constant 0 : index
    %c0_65 = arith.constant 0 : index
    %56 = vector.load %arg4[%c6, %c0_64, %c0_65] : memref<9x4x4xbf16, #tpu.memory_space<vmem>>, vector<1x4x4xbf16>
    %57 = vector.shape_cast %56 : vector<1x4x4xbf16> to vector<4x4xbf16>
    %cst_66 = arith.constant dense<0.000000e+00> : vector<256x4xf32>
    %58 = tpu.matmul %55, %57, %cst_66 {dimension_numbers = #tpu.dot_dimension_numbers<[1], [0], [0], [1], [0, 0, 1, 1], [], []>} : vector<256x4xbf16>, vector<4x4xbf16>, vector<256x4xf32> -> vector<256x4xf32>
    %59 = arith.addf %53, %58 : vector<256x4xf32>
    %c2_67 = arith.constant 2 : index
    %c1_68 = arith.constant 1 : index
    %c0_69 = arith.constant 0 : index
    %60 = vector.load %arg9[%c2_67, %c1_68, %c0_69] : memref<18x18x4xbf16, #tpu.memory_space<vmem>>, vector<16x16x4xbf16>
    %61 = vector.shape_cast %60 : vector<16x16x4xbf16> to vector<256x4xbf16>
    %c7 = arith.constant 7 : index
    %c0_70 = arith.constant 0 : index
    %c0_71 = arith.constant 0 : index
    %62 = vector.load %arg4[%c7, %c0_70, %c0_71] : memref<9x4x4xbf16, #tpu.memory_space<vmem>>, vector<1x4x4xbf16>
    %63 = vector.shape_cast %62 : vector<1x4x4xbf16> to vector<4x4xbf16>
    %cst_72 = arith.constant dense<0.000000e+00> : vector<256x4xf32>
    %64 = tpu.matmul %61, %63, %cst_72 {dimension_numbers = #tpu.dot_dimension_numbers<[1], [0], [0], [1], [0, 0, 1, 1], [], []>} : vector<256x4xbf16>, vector<4x4xbf16>, vector<256x4xf32> -> vector<256x4xf32>
    %65 = arith.addf %59, %64 : vector<256x4xf32>
    %c2_73 = arith.constant 2 : index
    %c2_74 = arith.constant 2 : index
    %c0_75 = arith.constant 0 : index
    %66 = vector.load %arg9[%c2_73, %c2_74, %c0_75] : memref<18x18x4xbf16, #tpu.memory_space<vmem>>, vector<16x16x4xbf16>
    %67 = vector.shape_cast %66 : vector<16x16x4xbf16> to vector<256x4xbf16>
    %c8 = arith.constant 8 : index
    %c0_76 = arith.constant 0 : index
    %c0_77 = arith.constant 0 : index
    %68 = vector.load %arg4[%c8, %c0_76, %c0_77] : memref<9x4x4xbf16, #tpu.memory_space<vmem>>, vector<1x4x4xbf16>
    %69 = vector.shape_cast %68 : vector<1x4x4xbf16> to vector<4x4xbf16>
    %cst_78 = arith.constant dense<0.000000e+00> : vector<256x4xf32>
    %70 = tpu.matmul %67, %69, %cst_78 {dimension_numbers = #tpu.dot_dimension_numbers<[1], [0], [0], [1], [0, 0, 1, 1], [], []>} : vector<256x4xbf16>, vector<4x4xbf16>, vector<256x4xf32> -> vector<256x4xf32>
    %71 = arith.addf %65, %70 : vector<256x4xf32>
    %c0_79 = arith.constant 0 : index
    %c0_80 = arith.constant 0 : index
    %72 = vector.load %arg5[%c0_79, %c0_80] : memref<1x4xf32, #tpu.memory_space<vmem>>, vector<1x4xf32>
    %73 = vector.broadcast %72 : vector<1x4xf32> to vector<256x4xf32>
    %74 = arith.addf %71, %73 : vector<256x4xf32>
    %cst_81 = arith.constant 0.000000e+00 : f32
    %75 = vector.broadcast %cst_81 : f32 to vector<256x4xf32>
    %76 = arith.maximumf %74, %75 : vector<256x4xf32>
    %77 = arith.truncf %76 : vector<256x4xf32> to vector<256x4xbf16>
    %c0_82 = arith.constant 0 : index
    %c0_83 = arith.constant 0 : index
    %78 = vector.load %arg6[%c0_82, %c0_83] : memref<4x16xbf16, #tpu.memory_space<vmem>>, vector<4x16xbf16>
    %cst_84 = arith.constant dense<0.000000e+00> : vector<256x16xf32>
    %79 = tpu.matmul %77, %78, %cst_84 {dimension_numbers = #tpu.dot_dimension_numbers<[1], [0], [0], [1], [0, 0, 1, 1], [], []>} : vector<256x4xbf16>, vector<4x16xbf16>, vector<256x16xf32> -> vector<256x16xf32>
    %c0_85 = arith.constant 0 : index
    %c0_86 = arith.constant 0 : index
    %80 = vector.load %arg7[%c0_85, %c0_86] : memref<1x16xf32, #tpu.memory_space<vmem>>, vector<1x16xf32>
    %81 = vector.broadcast %80 : vector<1x16xf32> to vector<256x16xf32>
    %82 = arith.addf %79, %81 : vector<256x16xf32>
    %83 = vector.shape_cast %1 : vector<16x16x16xbf16> to vector<256x16xbf16>
    %84 = arith.extf %83 : vector<256x16xbf16> to vector<256x16xf32>
    %85 = arith.addf %82, %84 : vector<256x16xf32>
    %cst_87 = arith.constant 0.000000e+00 : f32
    %86 = vector.broadcast %cst_87 : f32 to vector<256x16xf32>
    %87 = arith.maximumf %85, %86 : vector<256x16xf32>
    %88 = vector.shape_cast %87 : vector<256x16xf32> to vector<16x16x16xf32>
    %c0_88 = arith.constant 0 : index
    %c0_89 = arith.constant 0 : index
    %c0_90 = arith.constant 0 : index
    %c0_91 = arith.constant 0 : index
    %89 = vector.load %arg8[%c0_88, %c0_89, %c0_90, %c0_91] : memref<1x16x16x16xf32, #tpu.memory_space<vmem>>, vector<1x16x16x16xf32>
    %90 = vector.shape_cast %89 : vector<1x16x16x16xf32> to vector<16x16x16xf32>
    %91 = vector.shape_cast %88 : vector<16x16x16xf32> to vector<1x16x16x16xf32>
    tpu.vector_store %arg8[%c0_88, %c0_89, %c0_90, %c0_91], %91 {strides = array<i32>} : memref<1x16x16x16xf32, #tpu.memory_space<vmem>>, vector<1x16x16x16xf32>,
    return
  }
  func.func @transform_0(%arg0: i32) -> (i32, i32, i32, i32) {
    %c0_i32 = arith.constant 0 : i32
    %c0_i32_0 = arith.constant 0 : i32
    %c0_i32_1 = arith.constant 0 : i32
    %c0_i32_2 = arith.constant 0 : i32
    return %arg0, %c0_i32, %c0_i32_0, %c0_i32_1 : i32, i32, i32, i32
  }
  func.func @transform_1(%arg0: i32) -> (i32, i32) {
    %c0_i32 = arith.constant 0 : i32
    %c0_i32_0 = arith.constant 0 : i32
    %c0_i32_1 = arith.constant 0 : i32
    return %c0_i32, %c0_i32_0 : i32, i32
  }
  func.func @transform_2(%arg0: i32) -> (i32, i32) {
    %c0_i32 = arith.constant 0 : i32
    %c0_i32_0 = arith.constant 0 : i32
    %c0_i32_1 = arith.constant 0 : i32
    return %c0_i32, %c0_i32_0 : i32, i32
  }
  func.func @transform_3(%arg0: i32) -> (i32, i32, i32) {
    %c0_i32 = arith.constant 0 : i32
    %c0_i32_0 = arith.constant 0 : i32
    %c0_i32_1 = arith.constant 0 : i32
    %c0_i32_2 = arith.constant 0 : i32
    return %c0_i32, %c0_i32_0, %c0_i32_1 : i32, i32, i32
  }
  func.func @transform_4(%arg0: i32) -> (i32, i32) {
    %c0_i32 = arith.constant 0 : i32
    %c0_i32_0 = arith.constant 0 : i32
    %c0_i32_1 = arith.constant 0 : i32
    return %c0_i32, %c0_i32_0 : i32, i32
  }
  func.func @transform_5(%arg0: i32) -> (i32, i32) {
    %c0_i32 = arith.constant 0 : i32
    %c0_i32_0 = arith.constant 0 : i32
    %c0_i32_1 = arith.constant 0 : i32
    return %c0_i32, %c0_i32_0 : i32, i32
  }
  func.func @transform_6(%arg0: i32) -> (i32, i32) {
    %c0_i32 = arith.constant 0 : i32
    %c0_i32_0 = arith.constant 0 : i32
    %c0_i32_1 = arith.constant 0 : i32
    return %c0_i32, %c0_i32_0 : i32, i32
  }
  func.func @transform_7(%arg0: i32) -> (i32, i32, i32, i32) {
    %c0_i32 = arith.constant 0 : i32
    %c0_i32_0 = arith.constant 0 : i32
    %c0_i32_1 = arith.constant 0 : i32
    %c0_i32_2 = arith.constant 0 : i32
    return %arg0, %c0_i32, %c0_i32_0, %c0_i32_1 : i32, i32, i32, i32
  }
}

</mosaic_0001>

<bundles_post_ra>
// kernel: tpu_custom_call.1
= control target key start
LH: loop header
LB: loop body
LE: loop exit
PB: predicated region body
PF: predicated region fallthrough
CT: control target
= control target key end

     0   :  { %12 = vsyncpa [#allocation4], 0  ;;  %s8742_s0 = inlined_call_operand.hbm [shape: bf16[2,16,16,16], index: 0, kind: input, shape index: {}]   ;;  %s8743_s1 = inlined_call_operand.vmem [shape: bf16[16,4], index: 1, kind: input, shape index: {}]   ;;  %s8744_s2 = inlined_call_operand.vmem [shape: f32[1,4], index: 2, kind: input, shape index: {}]   ;;  %s8745_s3 = inlined_call_operand.vmem [shape: bf16[9,4,4], index: 3, kind: input, shape index: {}]   ;;  %s8746_s4 = inlined_call_operand.vmem [shape: f32[1,4], index: 4, kind: input, shape index: {}]   ;;  %s8747_s5 = inlined_call_operand.vmem [shape: bf16[4,16], index: 5, kind: input, shape index: {}]   ;;  %s8748_s6 = inlined_call_operand.vmem [shape: f32[1,16], index: 6, kind: input, shape index: {}]   ;;  %s8749_s7 = inlined_call_operand.hbm [shape: f32[2,16,16,16], index: 7, kind: output, shape index: {}]  }
   0x1   :  { %14 = vsyncpa [#allocation4 + $0x1], 0 }
   0x2   :  { %15 = vsyncpa [#allocation5], 0 }
   0x3   :  { %17 = vsyncpa [#allocation5 + $0x1], 0  ;;  %s6346_s24 = smov 0   ;;  %s6348_s25 = smov 0  }
   0x4   :  { %s6350_s26 = smov 0   ;;  %s6352_s27 = smov 0  }
   0x5 LB: > { %s6367_s28 = sadd.s32 4294967295, %s6299_s27   ;;  %s5541_s29 = sadd.s32 4294967294, %s6299_s27   ;;  %s6299_s27 = sphi %s6352_s27, %s9014_s27   ;;  %s6295_s26 = sphi %s6350_s26, %s9013_s26   ;;  %s6291_s25 = sphi %s6348_s25, %s9012_s25   ;;  %s6287_s24 = sphi %s6346_s24, %s9011_s24  }
   0x6   : > { %s6371_s30 = sadd.s32 1, %s6299_s27   ;;  %s30_s8 = sadd.s32 1, %s6295_s26 }
   0x7   : > { %s27_s9 = ssub.s32 %s6299_s27, %s6371_s30  ;;  %p37_p0 = scmp.ne.s32.totalorder %s6295_s26, %s6291_s25 }
   0x8   : > { %p28_p1 = scmp.eq.s32.totalorder %s27_s9, 0  ;;  %p38_p2 = scmp.eq.s32.totalorder %s6299_s27, 0 }
   0x9   : > { %p43_p3 = scmp.ne.s32.totalorder %s6291_s25, %s6287_s24  ;;  %p44_p4 = scmp.eq.s32.totalorder %s6367_s28, 0 }
   0xa   : > { %s6383_s10 = scalar_select %p28_p1, %s6295_s26, %s30_s8  }
   0xb   : > { %p6385_p5 = por %p38_p2, %p37_p0  ;;  %p6389_p6 = por %p44_p4, %p43_p3 }
   0xc   : > { %8757 = sst [smem:[#allocation9_spill]] %s6383_s10  ;;  %p193_p7 = scmp.eq.s32.totalorder %s6367_s28, 1 }
   0xd   : > { %p199_p8 = scmp.eq.s32.totalorder %s5541_s29, 1  ;;  %p6129_p10 = scmp.lt.s32.totalorder %s6299_s27, 2 }
   0xe   : > { %p6396_p11 = por %p193_p7, %p37_p0  ;;  %s237_s15 = sand.u32 1, %s6295_s26  }
   0xf   : > { %p6400_p12 = por %p199_p8, %p43_p3  ;;  %s6047_s16 = sshll.u32 %s6299_s27, 7 }
  0x10   : > { %s5544_s17 = sshll.u32 %s237_s15, 7  ;;  %s246_s20 = scalar_lea.hbm %s8742_s0, %s6047_s16 }
  0x11   : > { %s247_s21 = sshll.u32 %s246_s20, 4  ;;  %s241_s22 = scalar_lea.vmem [#allocation3], %s5544_s17  ;;  %s248_s21 = int_to_ptr.hbm [resolvable:$true] %s247_s21 }
  0x12   : > { %s249_s23 = sshll.u32 %s241_s22, 4  ;;  %p6411_p13 = pnand %p6129_p10, %p6385_p5  ;;  %s250_s23 = int_to_ptr.vmem [resolvable:$true] %s249_s23 }
  0x13   : > { %p5547_p0 = scmp.ge.s32.totalorder %s6299_s27, 1  ;;  %p257_p1 = scmp.lt.s32.totalorder %s6299_s27, 3 }
  0x14   : > { %s238_s8 = scalar_lea.sflag [#allocation4], %s237_s15  ;;  %s6203_s9 = sshra.s32 %s248_s21, 4  ;;  %s6204_s9 = int_to_ptr.hbm [resolvable:$true] %s6203_s9 }
  0x15   : > { %s6205_s10 = scalar_lea.hbm %s6204_s9, 128  ;;  %p6207_p3 = pneg %p6411_p13 }
  0x16   : > { %p6206_p2 = scmp.ne.s32.totalorder %s6204_s9, %s6205_s10  ;;  %s6210_s11 = scalar_lea.hbm %s8742_s0, 256 }
  0x17   : > { %p6211_p5 = scmp.lt.s32.totalorder %s6204_s9, %s8742_s0  ;;  %p6212_p8 = scmp.lt.s32.totalorder %s6210_s11, %s6205_s10 }
  0x18   : > { %p6208_p4 = pnand %p6207_p3, %p6206_p2 }
  0x19   : > { %p6213_p10 = por %p6212_p8, %p6211_p5 }
  0x1a   : > { %p6209_p7 = pneg %p6208_p4 }
  0x1c   : > { %p6214_p9 = pnand %p6213_p10, %p6209_p7 }
  0x1e   : > { %6217 = shalt.err (!%p6214_p9)
}
  0x1f   : > { %s6301_s15 = smov 64   ;;  %s6302_s20 = smov 4  }
  0x20   : > { %6124 = dma.hbm_to_vmem [thread:$0]  (!%p6411_p13), %s248_s21, 2048, %s250_s23, %s238_s8, %s6301_s15, %s6301_s15, %s6302_s20  }
  0x21   : > { %p258_p2 = pnand %p5547_p0, %p257_p1 }
  0x23   : > { %261 = sbr.rel (%p258_p2) target bundleno = 1318 (0x526), region = 48 }
  0x28   : > { %s6432_s22 = sand.u32 1, %s6291_s25  }
  0x29   : > { %s5548_s10 = sshll.u32 %s6432_s22, 7  ;;  %s264_s9 = scalar_lea.sflag [#allocation4], %s6432_s22 }
  0x2a   : > { %s6436_s16 = scalar_lea.vmem [#allocation3], %s5548_s10 }
  0x2b   : > { %6278 = dma.done.wait (%p6389_p6), %s264_s9, 2048  }
  0x2c   : > { %6280 = vsyncadd (%p6389_p6), %s264_s9, 4294965248  ;;  %v6064_v0 = vld [vmem:[%s8743_s1] sm:$0xff]  ;;  %v6048_v1 = vld [vmem:[%s6436_s16] sm:$0xff]  ;;  %vm424_vm0 = vcmask 130048   ;;  %vm626_vm1 = vcmask 27648   ;;  %v6303_v7 = vmov 0  }
  0x2d   : > { %480 = vmatpush.bf16.msra.mxu0 %v6064_v0  ;;  %6114 = vmatpush.bf16.msra.mxu3 %v6064_v0  ;;  %v6049_v2 = vld [vmem:[%s6436_s16 + $0x8] sm:$0xff]  ;;  %v6050_v3 = vld [vmem:[%s6436_s16 + $0x10] sm:$0xff]  ;;  %v6051_v4 = vld [vmem:[%s6436_s16 + $0x18] sm:$0xff]  ;;  %627 = vst.msk [vmem:[#allocation2] sm:$0xf] %vm626_vm1, %v6303_v7  ;;  %vm629_vm2 = vcmask 24576  }
  0x2e   : > { %v6052_v5 = vld [vmem:[%s6436_s16 + $0x20] sm:$0xff]  ;;  %v6053_v6 = vld [vmem:[%s6436_s16 + $0x28] sm:$0xff]  ;;  %v6054_v8 = vld [vmem:[%s6436_s16 + $0x30] sm:$0xff]  ;;  %628 = vst.msk [vmem:[#allocation2 + $0x4] sm:$0xf] %vm626_vm1, %v6303_v7  ;;  %v8763_v9 = vmov 0 }
  0x2f   : > { %632 = vst.msk [vmem:[#allocation2 + $0xcc] sm:$0xf] %vm626_vm1, %v6303_v7  ;;  %vm636_vm3 = vsmask.f32 256  ;;  %v641_v10 = vld [vmem:[#allocation2 + $0xc] sm:$0x1] }
  0x30   : > { %5618 = vmatmul.msk.bf16.vlgmr.msra.gmra.mxu0 %vm424_vm0, %v6048_v1  ;;  %630 = vst.msk [vmem:[#allocation2 + $0x8] sm:$0x1] %vm629_vm2, %v6303_v7  ;;  %vm6464_vm4 = vmand %vm629_vm2, %vm636_vm3  ;;  %vm692_vm5 = vsmask.f32 7938  ;;  %v8766_v14 = vmov 0  ;;  %vm1720_vm7 = vcmask 1041408  }
  0x31   : > { %633 = vst.msk [vmem:[#allocation2 + $0xd0] sm:$0xf] %vm626_vm1, %v6303_v7  ;;  %v8764_v9 = vsel %vm6464_vm4, 4294967295, %v8763_v9  ;;  %v642_v11 = vsel %vm6464_vm4, 0, %v641_v10  ;;  %vm6473_vm6 = vmand %vm629_vm2, %vm692_vm5  ;;  %v697_v17 = vld [vmem:[#allocation2 + $0x14] sm:$0x1] }
  0x32   : > { %8765 = vst [vmem:[#allocation10_spill] sm:$0xff] %v8764_v9  ;;  %v8767_v14 = vsel %vm6473_vm6, 4294967295, %v8766_v14  ;;  %v1217_v18 = vld [vmem:[%s8745_s3] sm:$0x3]  ;;  %v698_v19 = vsel %vm6473_vm6, 0, %v697_v17  ;;  %v6055_v23 = vld [vmem:[%s6436_s16 + $0x38] sm:$0xff]  ;;  %vm6525_vm14 = vmand %vm626_vm1, %vm692_vm5 }
  0x33   : > { %634 = vst.msk [vmem:[#allocation2 + $0xd4] sm:$0x1] %vm629_vm2, %v6303_v7  ;;  %v6485_v20 = vsel %vm1720_vm7, %v1217_v18, 0  ;;  %vm1671_vm8 = vcmask 31744   ;;  %v644_v35 = vld [vmem:[#allocation2 + $0x18] sm:$0x1] }
  0x34   : > { %643 = vst [vmem:[#allocation2 + $0xc] sm:$0x1] %v642_v11  ;;  %v638_v12 = vld [vmem:[#allocation2] sm:$0x1]  ;;  %1951 = vmatpush.bf16.msra.mxu2 %v6485_v20  ;;  %v645_v38 = vsel %vm6464_vm4, 0, %v644_v35  ;;  %v6056_v53 = vld [vmem:[%s6436_s16 + $0x40] sm:$0xff] }
  0x35   : > { %v639_v13 = vsel %vm6464_vm4, 0, %v638_v12  ;;  %8768 = vst [vmem:[#allocation11_spill] sm:$0xff] %v8767_v14  ;;  %v6489_v24 = vld [vmem:[#allocation2 + $0x4] sm:$0xf]  ;;  %vm1234_vm9 = vsmask.f32 3328 }
  0x36   : > { %640 = vst [vmem:[#allocation2] sm:$0x1] %v639_v13  ;;  %v1247_v27 = vshll.u32 %v6489_v24, 16  ;;  %v1251_v28 = vshrl.u32 %v6489_v24, 16  ;;  %vm1235_vm10 = vsmask.f32 7440 }
  0x37   : > { %v694_v15 = vld [vmem:[#allocation2 + $0x8] sm:$0x1]  ;;  %699 = vst [vmem:[#allocation2 + $0x14] sm:$0x1] %v698_v19  ;;  %vm6497_vm11 = vmor %vm1234_vm9, %vm1235_vm10  ;;  %v5634_v43 = vld [vmem:[%s8745_s3 + $0x2] sm:$0x3] }
  0x38   : > { %v695_v16 = vsel %vm6473_vm6, 0, %v694_v15  ;;  %v1249_v31 = vrot.slane %v1247_v27, 5  ;;  %v1253_v32 = vrot.slane %v1251_v28, 4  ;;  %646 = vst [vmem:[#allocation2 + $0x18] sm:$0x1] %v645_v38  ;;  %v1722_v45 = vsel %vm1720_vm7, %v5634_v43, 0 }
  0x39   : > { %696 = vst [vmem:[#allocation2 + $0x8] sm:$0x1] %v695_v16  ;;  %1731 = vmatpush.bf16.msra.mxu1 %v1722_v45  ;;  %6115 = vmatpush.bf16.msrb.mxu3 %v1722_v45  ;;  %v700_v50 = vld [vmem:[#allocation2 + $0x20] sm:$0x1]  ;;  %v647_v57 = vld [vmem:[#allocation2 + $0x24] sm:$0x1] }
  0x3a   : > { %v1254_v36 = vor.u32 %v1253_v32, %v1249_v31  ;;  %v6512_v51 = vld [vmem:[%s8744_s2] ss:$0 sm:$0xff]  ;;  %v701_v52 = vsel %vm6473_vm6, 0, %v700_v50  ;;  %v648_v59 = vsel %vm6464_vm4, 0, %v647_v57  ;;  %vm2081_vm12 = vcmask 1042432   ;;  %v6060_v16 = vld [vmem:[%s6436_s16 + $0x60] sm:$0xff] }
  0x3b   : > { %702 = vst [vmem:[#allocation2 + $0x20] sm:$0x1] %v701_v52  ;;  %vm2082_vm13 = vcmask 1046532   ;;  %v8750_v61 = vrot.slane %v6489_v24, 5  ;;  %v703_v11 = vld [vmem:[#allocation2 + $0x2c] sm:$0x1]  ;;  %5630 = vmatmul.msk.bf16.vlgmr.msra.gmra.mxu3 %vm424_vm0, %v6060_v16 }
  0x3c   : > { %v1255_v41 = vrot.slane %v1254_v36, 4  ;;  %649 = vst [vmem:[#allocation2 + $0x24] sm:$0x1] %v648_v59  ;;  %vm6532_vm15 = vmor %vm2081_vm12, %vm2082_vm13  ;;  %v704_v15 = vsel %vm6473_vm6, 0, %v703_v11  ;;  %vm748_vm2 = vsmask.f32 4368 }
  0x3d   : > { %v6065_v21 = vld [vmem:[#allocation2] sm:$0xff]  ;;  %705 = vst [vmem:[#allocation2 + $0x2c] sm:$0x1] %v704_v15  ;;  %6116 = vmatpush.bf16.msra.mxu3 %v6485_v20  ;;  %vm6550_vm5 = vmor %vm636_vm3, %vm748_vm2  ;;  %s5549_s11 = sshll.u32 %s6432_s22, 8  ;;  %s6113_s19 = sshll.u32 %s6367_s28, 8 }
  0x3e   : > { %v1185_v22 = vld [vmem:[#allocation2] sm:$0xf]  ;;  %5715 = vmatmul.msk.bf16.vlgmr.msra.gmra.mxu2 %vm1671_vm8, %v6065_v21  ;;  %v5764_v11 = vld [vmem:[%s8745_s3 + $0x6] sm:$0x3]  ;;  %s8531_s18 = scalar_lea.vmem [#allocation6], %s5549_s11  ;;  %s5464_s10 = scalar_lea.hbm %s8749_s7, %s6113_s19 }
  0x3f   : > { %v1238_v25 = vshrl.u32 %v1185_v22, 16  ;;  %v1241_v26 = vshll.u32 %v1185_v22, 16  ;;  %v6057_v18 = vld [vmem:[%s6436_s16 + $0x48] sm:$0xff]  ;;  %v2581_v16 = vsel %vm1720_vm7, %v5764_v11, 0  ;;  %s5467_s9 = sshll.u32 %s5464_s10, 4  ;;  %s5453_s28 = scalar_lea.sflag [#allocation5], %s6432_s22  ;;  %s5468_s9 = int_to_ptr.hbm [resolvable:$true] %s5467_s9 }
  0x40   : > { %5619 = vmatmul.msk.bf16.gmra.mxu0 %vm424_vm0, %v6049_v2  ;;  %v1218_v33 = vld [vmem:[#allocation2 + $0x8] sm:$0x1]  ;;  %s6247_s21 = sshra.s32 %s5468_s9, 4  ;;  %s6253_s8 = scalar_lea.hbm %s8749_s7, 512  ;;  %s6248_s21 = int_to_ptr.hbm [resolvable:$true] %s6247_s21 }
  0x41   : > { %v1240_v29 = vrot.slane %v1238_v25, 4  ;;  %v1243_v30 = vrot.slane %v1241_v26, 5  ;;  %v1257_v37 = vshll.u32 %v1218_v33, 16  ;;  %v2089_v62 = vrot.slane %v1218_v33, 5  ;;  %v1077_v26 = vld [vmem:[#allocation2 + $0x14] sm:$0x1]  ;;  %2590 = vmatpush.bf16.msrb.mxu0 %v2581_v16  ;;  %p6254_p0 = scmp.lt.s32.totalorder %s6248_s21, %s8749_s7 }
  0x42   : > { %s6249_s23 = scalar_lea.hbm %s6248_s21, 256 }
  0x43   : > { %v1244_v34 = vor.u32 %v1243_v30, %v1240_v29  ;;  %v1259_v42 = vrot.slane %v1257_v37, 5  ;;  %p6250_p6 = scmp.ne.s32.totalorder %s6248_s21, %s6249_s23  ;;  %p6255_p1 = scmp.lt.s32.totalorder %s6253_s8, %s6249_s23 }
  0x44   : > { %v1091_v11 = vld [vmem:[#allocation2 + $0x2c] sm:$0x1] }
  0x45   : > { %v1245_v39 = vrot.slane %v1244_v34, 4  ;;  %v1260_v46 = vsel %vm6497_vm11, %v1255_v41, %v1259_v42  ;;  %p6251_p9 = pnand %p6250_p6, %p6396_p11  ;;  %p6256_p3 = por %p6255_p1, %p6254_p0 }
  0x46   : > { %v1624_v48 = vunpack.c.l.b16 %v1260_v46 }
  0x47   : > { %v1250_v44 = vsel %vm6497_vm11, %v1245_v39, %v1249_v31  ;;  %v650_v31 = vld [vmem:[#allocation2 + $0x30] sm:$0x1]  ;;  %p6252_p13 = pneg %p6251_p9 }
  0x48   : > { %v1623_v47 = vunpack.c.l.b16 %v1250_v44  ;;  %v651_v35 = vsel %vm6464_vm4, 0, %v650_v31  ;;  %v1080_v44 = vld [vmem:[#allocation2 + $0x18] sm:$0xf] }
  0x49   : > { %652 = vst [vmem:[#allocation2 + $0x30] sm:$0x1] %v651_v35  ;;  %p6257_p4 = pnand %p6256_p3, %p6252_p13 }
  0x4a   : > { %v1655_v49 = vpack.c.b16 %v1624_v48, %v1623_v47 }
  0x4c   : > { %5635 = vmatmul.msk.bf16.vlgmr.msra.gmra.mxu1 %vm1671_vm8, %v1655_v49  ;;  %v706_v49 = vld [vmem:[#allocation2 + $0x38] sm:$0x1] }
  0x50   : > { %5620 = vmatmul.msk.bf16.gmra.mxu0 %vm424_vm0, %v6050_v3 }
  0x60   : > { %5621 = vmatmul.msk.bf16.gmra.mxu0 %vm424_vm0, %v6051_v4  ;;  %v2088_v4 = vrot.slane %v8750_v61, 4 }
  0x62   : > { %v6538_v10 = vsel %vm6532_vm15, %v2088_v4, %v2089_v62  ;;  %v6058_v62 = vld [vmem:[%s6436_s16 + $0x50] sm:$0xff]  ;;  %v6061_v4 = vld [vmem:[%s6436_s16 + $0x68] sm:$0xff] }
  0x63   : > { %5631 = vmatmul.msk.bf16.gmra.mxu3 %vm424_vm0, %v6061_v4  ;;  %v6062_v4 = vld [vmem:[%s6436_s16 + $0x70] sm:$0xff] }
  0x70   : > { %5622 = vmatmul.msk.bf16.gmra.mxu0 %vm424_vm0, %v6052_v5  ;;  %v1073_v5 = vld [vmem:[#allocation2 + $0xc] sm:$0xf] }
  0x73   : > { %5632 = vmatmul.msk.bf16.gmra.mxu3 %vm424_vm0, %v6062_v4 }
  0x80   : > { %5623 = vmatmul.msk.bf16.gmra.mxu0 %vm424_vm0, %v6053_v6 }
  0x90   : > { %5624 = vmatmul.msk.bf16.gmra.mxu0 %vm424_vm0, %v6054_v8 }
  0xa0   : > { %5625 = vmatmul.msk.bf16.gmra.mxu0 %vm424_vm0, %v6055_v23 }
  0xad   : > { %v482_v54 = vpop.f32.mrf.mxu0 }
  0xae   : > { %v483_v55 = vadd.f32 %v6512_v51, %v482_v54 }
  0xb0   : > { %v562_v56 = vmax.f32 %v483_v55, 0.0  ;;  %5626 = vmatmul.msk.bf16.gmra.mxu0 %vm424_vm0, %v6056_v53  ;;  %v707_v55 = vsel %vm6473_vm6, 0, %v706_v49  ;;  %v709_v49 = vld [vmem:[#allocation2 + $0x44] sm:$0x1] }
  0xb1   : > { %708 = vst [vmem:[#allocation2 + $0x38] sm:$0x1] %v707_v55  ;;  %v710_v55 = vsel %vm6473_vm6, 0, %v709_v49 }
  0xb2   : > { %v594_v58 = vpack.c.bf16 %v562_v56, %v562_v56  ;;  %711 = vst [vmem:[#allocation2 + $0x44] sm:$0x1] %v710_v55 }
  0xb4   : > { %v751_v60 = vshrl.u32 %v594_v58, 16  ;;  %v754_v1 = vshll.u32 %v594_v58, 16 }
  0xb5   : > { %v484_v63 = vpop.f32.mrf.mxu0 }
  0xb6   : > { %v753_v0 = vrot.slane %v751_v60, 7  ;;  %v485_v3 = vadd.f32 %v6512_v51, %v484_v63 }
  0xb8   : > { %v756_v7 = vor.u32 %v754_v1, %v753_v0  ;;  %v563_v8 = vmax.f32 %v485_v3, 0.0  ;;  %v757_v27 = vrot.slane %v753_v0, 4 }
  0xba   : > { %v1074_v12 = vsel %vm6525_vm14, %v756_v7, %v1073_v5  ;;  %v595_v13 = vpack.c.bf16 %v563_v8, %v563_v8 }
  0xbb   : > { %1075 = vst [vmem:[#allocation2 + $0xc] sm:$0xf] %v1074_v12  ;;  %v1084_v12 = vld [vmem:[#allocation2 + $0x20] sm:$0x1] }
  0xbc   : > { %v759_v17 = vshrl.u32 %v595_v13, 16  ;;  %v762_v22 = vshll.u32 %v595_v13, 16 }
  0xbd   : > { %v487_v19 = vpop.f32.mrf.mxu0 }
  0xbe   : > { %v761_v21 = vrot.slane %v759_v17, 7  ;;  %v488_v23 = vadd.f32 %v6512_v51, %v487_v19 }
  0xc0   : > { %v764_v28 = vor.u32 %v762_v22, %v761_v21  ;;  %v766_v29 = vrot.slane %v761_v21, 4  ;;  %v564_v30 = vmax.f32 %v488_v23, 0.0  ;;  %5627 = vmatmul.msk.bf16.gmra.mxu0 %vm424_vm0, %v6057_v18 }
  0xc2   : > { %v765_v32 = vsel %vm6550_vm5, %v757_v27, %v764_v28  ;;  %v1078_v33 = vsel %vm6464_vm4, %v766_v29, %v1077_v26  ;;  %v596_v20 = vpack.c.bf16 %v564_v30, %v564_v30  ;;  %v1187_v34 = vld [vmem:[#allocation2 + $0xc] sm:$0xf]  ;;  %v653_v27 = vld [vmem:[#allocation2 + $0x3c] sm:$0x1] }
  0xc3   : > { %1076 = vst.msk [vmem:[#allocation2 + $0x10] sm:$0xf] %vm626_vm1, %v765_v32  ;;  %v1262_v36 = vshrl.u32 %v1187_v34, 16  ;;  %v1265_v37 = vshll.u32 %v1187_v34, 16  ;;  %v654_v32 = vsel %vm6464_vm4, 0, %v653_v27 }
  0xc4   : > { %1079 = vst [vmem:[#allocation2 + $0x14] sm:$0x1] %v1078_v33  ;;  %v768_v38 = vshrl.u32 %v596_v20, 16  ;;  %v771_v42 = vshll.u32 %v596_v20, 16 }
  0xc5   : > { %v489_v39 = vpop.f32.mrf.mxu0  ;;  %v1264_v45 = vrot.slane %v1262_v36, 4  ;;  %v1267_v46 = vrot.slane %v1265_v37, 5  ;;  %655 = vst [vmem:[#allocation2 + $0x3c] sm:$0x1] %v654_v32 }
  0xc6   : > { %v770_v41 = vrot.slane %v768_v38, 7  ;;  %v490_v43 = vadd.f32 %v6512_v51, %v489_v39 }
  0xc7   : > { %v1268_v57 = vor.u32 %v1267_v46, %v1264_v45 }
  0xc8   : > { %v773_v47 = vor.u32 %v771_v42, %v770_v41  ;;  %v565_v48 = vmax.f32 %v490_v43, 0.0  ;;  %v774_v17 = vrot.slane %v770_v41, 4 }
  0xc9   : > { %v1269_v13 = vrot.slane %v1268_v57, 4 }
  0xca   : > { %v1081_v50 = vsel %vm6525_vm14, %v773_v47, %v1080_v44  ;;  %v597_v52 = vpack.c.bf16 %v565_v48, %v565_v48  ;;  %v6066_v53 = vld [vmem:[#allocation2 + $0xc] sm:$0xff]  ;;  %v1087_v44 = vld [vmem:[#allocation2 + $0x24] sm:$0xf] }
  0xcb   : > { %v1188_v54 = vld [vmem:[#allocation2 + $0x10] sm:$0xf]  ;;  %1082 = vst [vmem:[#allocation2 + $0x18] sm:$0xf] %v1081_v50  ;;  %v1219_v56 = vld [vmem:[#allocation2 + $0x14] sm:$0x1]  ;;  %5716 = vmatmul.msk.bf16.gmra.mxu2 %vm1671_vm8, %v6066_v53 }
  0xcc   : > { %v1271_v58 = vshll.u32 %v1188_v54, 16  ;;  %v1275_v59 = vshrl.u32 %v1188_v54, 16  ;;  %v776_v60 = vshrl.u32 %v597_v52, 16  ;;  %v1281_v3 = vshll.u32 %v1219_v56, 16  ;;  %v6081_v4 = vld [vmem:[#allocation2 + $0xc] sm:$0xff] }
  0xcd   : > { %v492_v63 = vpop.f32.mrf.mxu0  ;;  %v779_v7 = vshll.u32 %v597_v52, 16 }
  0xce   : > { %v1273_v0 = vrot.slane %v1271_v58, 5  ;;  %v1277_v1 = vrot.slane %v1275_v59, 4  ;;  %v778_v5 = vrot.slane %v776_v60, 7  ;;  %v493_v8 = vadd.f32 %v6512_v51, %v492_v63 }
  0xcf   : > { %v1283_v26 = vrot.slane %v1281_v3, 5 }
  0xd0   : > { %v1278_v15 = vor.u32 %v1277_v1, %v1273_v0  ;;  %v781_v18 = vor.u32 %v779_v7, %v778_v5  ;;  %v783_v19 = vrot.slane %v778_v5, 4  ;;  %v566_v21 = vmax.f32 %v493_v8, 0.0  ;;  %5628 = vmatmul.msk.bf16.gmra.mxu0 %vm424_vm0, %v6058_v62  ;;  %v6059_v62 = vld [vmem:[%s6436_s16 + $0x58] sm:$0xff] }
  0xd1   : > { %v1274_v22 = vsel %vm6497_vm11, %v1269_v13, %v1273_v0 }
  0xd2   : > { %v1279_v23 = vrot.slane %v1278_v15, 4  ;;  %v782_v28 = vsel %vm6550_vm5, %v774_v17, %v781_v18  ;;  %v1085_v29 = vsel %vm6464_vm4, %v783_v19, %v1084_v12  ;;  %v598_v30 = vpack.c.bf16 %v566_v21, %v566_v21  ;;  %v1189_v31 = vld [vmem:[#allocation2 + $0x18] sm:$0xf] }
  0xd3   : > { %1083 = vst.msk [vmem:[#allocation2 + $0x1c] sm:$0xf] %vm626_vm1, %v782_v28  ;;  %v1286_v20 = vshrl.u32 %v1189_v31, 16  ;;  %v1289_v34 = vshll.u32 %v1189_v31, 16  ;;  %v1625_v36 = vunpack.c.l.b16 %v1274_v22 }
  0xd4   : > { %v1284_v33 = vsel %vm6497_vm11, %v1279_v23, %v1283_v26  ;;  %1086 = vst [vmem:[#allocation2 + $0x20] sm:$0x1] %v1085_v29  ;;  %v785_v35 = vshrl.u32 %v598_v30, 16  ;;  %v788_v41 = vshll.u32 %v598_v30, 16  ;;  %v656_v23 = vld [vmem:[#allocation2 + $0x48] sm:$0x1] }
  0xd5   : > { %v1626_v37 = vunpack.c.l.b16 %v1284_v33  ;;  %v494_v38 = vpop.f32.mrf.mxu0  ;;  %v1288_v45 = vrot.slane %v1286_v20, 4  ;;  %v1291_v46 = vrot.slane %v1289_v34, 5  ;;  %v657_v30 = vsel %vm6464_vm4, 0, %v656_v23 }
  0xd6   : > { %v787_v39 = vrot.slane %v785_v35, 7  ;;  %v495_v42 = vadd.f32 %v6512_v51, %v494_v38  ;;  %658 = vst [vmem:[#allocation2 + $0x48] sm:$0x1] %v657_v30 }
  0xd7   : > { %v1656_v43 = vpack.c.b16 %v1626_v37, %v1625_v36  ;;  %v1292_v57 = vor.u32 %v1291_v46, %v1288_v45 }
  0xd8   : > { %v790_v47 = vor.u32 %v788_v41, %v787_v39  ;;  %v567_v48 = vmax.f32 %v495_v42, 0.0  ;;  %v791_v15 = vrot.slane %v787_v39, 4  ;;  %v1094_v42 = vld [vmem:[#allocation2 + $0x30] sm:$0xf] }
  0xd9   : > { %5636 = vmatmul.msk.bf16.gmra.mxu1 %vm1671_vm8, %v1656_v43  ;;  %v1293_v12 = vrot.slane %v1292_v57, 4 }
  0xda   : > { %v1088_v50 = vsel %vm6525_vm14, %v790_v47, %v1087_v44  ;;  %v599_v52 = vpack.c.bf16 %v567_v48, %v567_v48  ;;  %v6067_v53 = vld [vmem:[#allocation2 + $0x18] sm:$0xff]  ;;  %v712_v47 = vld [vmem:[#allocation2 + $0x50] sm:$0x1] }
  0xdb   : > { %v1190_v54 = vld [vmem:[#allocation2 + $0x1c] sm:$0xf]  ;;  %1089 = vst [vmem:[#allocation2 + $0x24] sm:$0xf] %v1088_v50  ;;  %v1220_v56 = vld [vmem:[#allocation2 + $0x20] sm:$0x1]  ;;  %5717 = vmatmul.msk.bf16.gmra.mxu2 %vm1671_vm8, %v6067_v53 }
  0xdc   : > { %v1295_v58 = vshll.u32 %v1190_v54, 16  ;;  %v1299_v59 = vshrl.u32 %v1190_v54, 16  ;;  %v793_v60 = vshrl.u32 %v599_v52, 16  ;;  %v1305_v3 = vshll.u32 %v1220_v56, 16 }
  0xdd   : > { %v497_v63 = vpop.f32.mrf.mxu0  ;;  %v796_v7 = vshll.u32 %v599_v52, 16  ;;  %v713_v53 = vsel %vm6473_vm6, 0, %v712_v47 }
  0xde   : > { %v1297_v0 = vrot.slane %v1295_v58, 5  ;;  %v1301_v1 = vrot.slane %v1299_v59, 4  ;;  %v795_v5 = vrot.slane %v793_v60, 7  ;;  %v498_v8 = vadd.f32 %v6512_v51, %v497_v63  ;;  %714 = vst [vmem:[#allocation2 + $0x50] sm:$0x1] %v713_v53 }
  0xdf   : > { %v1307_v22 = vrot.slane %v1305_v3, 5 }
  0xe0   : > { %v1302_v13 = vor.u32 %v1301_v1, %v1297_v0  ;;  %v798_v16 = vor.u32 %v796_v7, %v795_v5  ;;  %v800_v17 = vrot.slane %v795_v5, 4  ;;  %v568_v18 = vmax.f32 %v498_v8, 0.0  ;;  %5629 = vmatmul.msk.bf16.gmra.mxu0 %vm424_vm0, %v6059_v62  ;;  %v1098_v5 = vld [vmem:[#allocation2 + $0x38] sm:$0x1] }
  0xe1   : > { %v1298_v19 = vsel %vm6497_vm11, %v1293_v12, %v1297_v0 }
  0xe2   : > { %v1303_v21 = vrot.slane %v1302_v13, 4  ;;  %v799_v26 = vsel %vm6550_vm5, %v791_v15, %v798_v16  ;;  %v1092_v27 = vsel %vm6464_vm4, %v800_v17, %v1091_v11  ;;  %v600_v28 = vpack.c.bf16 %v568_v18, %v568_v18  ;;  %v1191_v29 = vld [vmem:[#allocation2 + $0x24] sm:$0xf] }
  0xe3   : > { %1090 = vst.msk [vmem:[#allocation2 + $0x28] sm:$0xf] %vm626_vm1, %v799_v26  ;;  %v1310_v32 = vshrl.u32 %v1191_v29, 16  ;;  %v1313_v33 = vshll.u32 %v1191_v29, 16  ;;  %v1627_v34 = vunpack.c.l.b16 %v1298_v19  ;;  %v659_v19 = vld [vmem:[#allocation2 + $0x54] sm:$0x1] }
  0xe4   : > { %v1308_v31 = vsel %vm6497_vm11, %v1303_v21, %v1307_v22  ;;  %1093 = vst [vmem:[#allocation2 + $0x2c] sm:$0x1] %v1092_v27  ;;  %v802_v20 = vshrl.u32 %v600_v28, 16  ;;  %v805_v38 = vshll.u32 %v600_v28, 16  ;;  %v660_v27 = vsel %vm6464_vm4, 0, %v659_v19 }
  0xe5   : > { %v1628_v35 = vunpack.c.l.b16 %v1308_v31  ;;  %v499_v36 = vpop.f32.mrf.mxu0  ;;  %v1312_v43 = vrot.slane %v1310_v32, 4  ;;  %v1315_v44 = vrot.slane %v1313_v33, 5  ;;  %661 = vst [vmem:[#allocation2 + $0x54] sm:$0x1] %v660_v27 }
  0xe6   : > { %v804_v37 = vrot.slane %v802_v20, 7  ;;  %v500_v39 = vadd.f32 %v6512_v51, %v499_v36 }
  0xe7   : > { %v1657_v41 = vpack.c.b16 %v1628_v35, %v1627_v34  ;;  %v1316_v55 = vor.u32 %v1315_v44, %v1312_v43  ;;  %v715_v44 = vld [vmem:[#allocation2 + $0x5c] sm:$0x1] }
  0xe8   : > { %v807_v45 = vor.u32 %v805_v38, %v804_v37  ;;  %v569_v46 = vmax.f32 %v500_v39, 0.0  ;;  %v808_v11 = vrot.slane %v804_v37, 4  ;;  %v1101_v38 = vld [vmem:[#allocation2 + $0x3c] sm:$0xf] }
  0xe9   : > { %5637 = vmatmul.msk.bf16.gmra.mxu1 %vm1671_vm8, %v1657_v41  ;;  %v1317_v7 = vrot.slane %v1316_v55, 4 }
  0xea   : > { %v1095_v48 = vsel %vm6525_vm14, %v807_v45, %v1094_v42  ;;  %v601_v49 = vpack.c.bf16 %v569_v46, %v569_v46  ;;  %v6068_v50 = vld [vmem:[#allocation2 + $0x24] sm:$0xff] }
  0xeb   : > { %v1192_v52 = vld [vmem:[#allocation2 + $0x28] sm:$0xf]  ;;  %1096 = vst [vmem:[#allocation2 + $0x30] sm:$0xf] %v1095_v48  ;;  %v1221_v54 = vld [vmem:[#allocation2 + $0x2c] sm:$0x1]  ;;  %5718 = vmatmul.msk.bf16.gmra.mxu2 %vm1671_vm8, %v6068_v50 }
  0xec   : > { %v1319_v56 = vshll.u32 %v1192_v52, 16  ;;  %v1323_v57 = vshrl.u32 %v1192_v52, 16  ;;  %v810_v58 = vshrl.u32 %v601_v49, 16  ;;  %v1329_v63 = vshll.u32 %v1221_v54, 16 }
  0xed   : > { %v502_v59 = vpop.f32.mrf.mxu0  ;;  %v813_v1 = vshll.u32 %v601_v49, 16  ;;  %v716_v49 = vsel %vm6473_vm6, 0, %v715_v44 }
  0xee   : > { %v1321_v60 = vrot.slane %v1319_v56, 5  ;;  %v1325_v62 = vrot.slane %v1323_v57, 4  ;;  %v812_v0 = vrot.slane %v810_v58, 7  ;;  %v503_v3 = vadd.f32 %v6512_v51, %v502_v59  ;;  %717 = vst [vmem:[#allocation2 + $0x5c] sm:$0x1] %v716_v49 }
  0xef   : > { %v1331_v18 = vrot.slane %v1329_v63, 5 }
  0xf0   : > { %v1326_v8 = vor.u32 %v1325_v62, %v1321_v60  ;;  %v815_v12 = vor.u32 %v813_v1, %v812_v0  ;;  %v817_v13 = vrot.slane %v812_v0, 4  ;;  %v570_v15 = vmax.f32 %v503_v3, 0.0  ;;  %5829 = vmatmul.msk.bf16.vlgmr.msrb.gmra.mxu0 %vm1671_vm8, %v6081_v4  ;;  %v6082_v0 = vld [vmem:[#allocation2 + $0x18] sm:$0xff]  ;;  %v1105_v1 = vld [vmem:[#allocation2 + $0x44] sm:$0x1] }
  0xf1   : > { %v1322_v16 = vsel %vm6497_vm11, %v1317_v7, %v1321_v60 }
  0xf2   : > { %v1327_v17 = vrot.slane %v1326_v8, 4  ;;  %v816_v21 = vsel %vm6550_vm5, %v808_v11, %v815_v12  ;;  %v1099_v22 = vsel %vm6464_vm4, %v817_v13, %v1098_v5  ;;  %v602_v23 = vpack.c.bf16 %v570_v15, %v570_v15  ;;  %v1193_v26 = vld [vmem:[#allocation2 + $0x30] sm:$0xf] }
  0xf3   : > { %1097 = vst.msk [vmem:[#allocation2 + $0x34] sm:$0xf] %vm626_vm1, %v816_v21  ;;  %v1334_v29 = vshrl.u32 %v1193_v26, 16  ;;  %v1337_v30 = vshll.u32 %v1193_v26, 16  ;;  %v1629_v32 = vunpack.c.l.b16 %v1322_v16  ;;  %v662_v16 = vld [vmem:[#allocation2 + $0x60] sm:$0x1] }
  0xf4   : > { %v1332_v28 = vsel %vm6497_vm11, %v1327_v17, %v1331_v18  ;;  %1100 = vst [vmem:[#allocation2 + $0x38] sm:$0x1] %v1099_v22  ;;  %v819_v31 = vshrl.u32 %v602_v23, 16  ;;  %v822_v35 = vshll.u32 %v602_v23, 16  ;;  %v663_v22 = vsel %vm6464_vm4, 0, %v662_v16 }
  0xf5   : > { %v1630_v33 = vunpack.c.l.b16 %v1332_v28  ;;  %v504_v20 = vpop.f32.mrf.mxu0  ;;  %v1336_v39 = vrot.slane %v1334_v29, 4  ;;  %v1339_v41 = vrot.slane %v1337_v30, 5  ;;  %664 = vst [vmem:[#allocation2 + $0x60] sm:$0x1] %v663_v22 }
  0xf6   : > { %v821_v34 = vrot.slane %v819_v31, 7  ;;  %v505_v36 = vadd.f32 %v6512_v51, %v504_v20 }
  0xf7   : > { %v1658_v37 = vpack.c.b16 %v1630_v33, %v1629_v32  ;;  %v1340_v52 = vor.u32 %v1339_v41, %v1336_v39  ;;  %v718_v41 = vld [vmem:[#allocation2 + $0x68] sm:$0x1] }
  0xf8   : > { %v824_v42 = vor.u32 %v822_v35, %v821_v34  ;;  %v571_v43 = vmax.f32 %v505_v36, 0.0  ;;  %v825_v5 = vrot.slane %v821_v34, 4  ;;  %v1108_v35 = vld [vmem:[#allocation2 + $0x48] sm:$0xf] }
  0xf9   : > { %5638 = vmatmul.msk.bf16.gmra.mxu1 %vm1671_vm8, %v1658_v37  ;;  %v1341_v3 = vrot.slane %v1340_v52, 4 }
  0xfa   : > { %v1102_v45 = vsel %vm6525_vm14, %v824_v42, %v1101_v38  ;;  %v603_v46 = vpack.c.bf16 %v571_v43, %v571_v43  ;;  %v6069_v47 = vld [vmem:[#allocation2 + $0x30] sm:$0xff] }
  0xfb   : > { %v1194_v48 = vld [vmem:[#allocation2 + $0x34] sm:$0xf]  ;;  %1103 = vst [vmem:[#allocation2 + $0x3c] sm:$0xf] %v1102_v45  ;;  %v1222_v50 = vld [vmem:[#allocation2 + $0x38] sm:$0x1]  ;;  %5719 = vmatmul.msk.bf16.gmra.mxu2 %vm1671_vm8, %v6069_v47 }
  0xfc   : > { %v1343_v53 = vshll.u32 %v1194_v48, 16  ;;  %v1347_v54 = vshrl.u32 %v1194_v48, 16  ;;  %v827_v55 = vshrl.u32 %v603_v46, 16  ;;  %v1353_v59 = vshll.u32 %v1222_v50, 16 }
  0xfd   : > { %v507_v56 = vpop.f32.mrf.mxu0  ;;  %v830_v62 = vshll.u32 %v603_v46, 16  ;;  %v719_v46 = vsel %vm6473_vm6, 0, %v718_v41 }
  0xfe   : > { %v1345_v57 = vrot.slane %v1343_v53, 5  ;;  %v1349_v58 = vrot.slane %v1347_v54, 4  ;;  %v829_v60 = vrot.slane %v827_v55, 7  ;;  %v508_v63 = vadd.f32 %v6512_v51, %v507_v56  ;;  %720 = vst [vmem:[#allocation2 + $0x68] sm:$0x1] %v719_v46 }
  0xff   : > { %v1355_v15 = vrot.slane %v1353_v59, 5 }
 0x100   : > { %v1350_v4 = vor.u32 %v1349_v58, %v1345_v57  ;;  %v832_v7 = vor.u32 %v830_v62, %v829_v60  ;;  %v834_v8 = vrot.slane %v829_v60, 4  ;;  %v572_v11 = vmax.f32 %v508_v63, 0.0  ;;  %5830 = vmatmul.msk.bf16.gmra.mxu0 %vm1671_vm8, %v6082_v0  ;;  %v6083_v60 = vld [vmem:[#allocation2 + $0x24] sm:$0xff]  ;;  %v1112_v62 = vld [vmem:[#allocation2 + $0x50] sm:$0x1] }
 0x101   : > { %v1346_v12 = vsel %vm6497_vm11, %v1341_v3, %v1345_v57 }
 0x102   : > { %v1351_v13 = vrot.slane %v1350_v4, 4  ;;  %v833_v17 = vsel %vm6550_vm5, %v825_v5, %v832_v7  ;;  %v1106_v18 = vsel %vm6464_vm4, %v834_v8, %v1105_v1  ;;  %v604_v19 = vpack.c.bf16 %v572_v11, %v572_v11  ;;  %v1195_v21 = vld [vmem:[#allocation2 + $0x3c] sm:$0xf] }
 0x103   : > { %1104 = vst.msk [vmem:[#allocation2 + $0x40] sm:$0xf] %vm626_vm1, %v833_v17  ;;  %v1358_v26 = vshrl.u32 %v1195_v21, 16  ;;  %v1361_v27 = vshll.u32 %v1195_v21, 16  ;;  %v1631_v29 = vunpack.c.l.b16 %v1346_v12  ;;  %v665_v12 = vld [vmem:[#allocation2 + $0x6c] sm:$0x1] }
 0x104   : > { %v1356_v23 = vsel %vm6497_vm11, %v1351_v13, %v1355_v15  ;;  %1107 = vst [vmem:[#allocation2 + $0x44] sm:$0x1] %v1106_v18  ;;  %v836_v28 = vshrl.u32 %v604_v19, 16  ;;  %v839_v33 = vshll.u32 %v604_v19, 16  ;;  %v666_v18 = vsel %vm6464_vm4, 0, %v665_v12 }
 0x105   : > { %v1632_v30 = vunpack.c.l.b16 %v1356_v23  ;;  %v509_v31 = vpop.f32.mrf.mxu0  ;;  %v1360_v36 = vrot.slane %v1358_v26, 4  ;;  %v1363_v37 = vrot.slane %v1361_v27, 5  ;;  %667 = vst [vmem:[#allocation2 + $0x6c] sm:$0x1] %v666_v18 }
 0x106   : > { %v838_v32 = vrot.slane %v836_v28, 7  ;;  %v510_v20 = vadd.f32 %v6512_v51, %v509_v31 }
 0x107   : > { %v1659_v34 = vpack.c.b16 %v1632_v30, %v1631_v29  ;;  %v1364_v48 = vor.u32 %v1363_v37, %v1360_v36  ;;  %v721_v37 = vld [vmem:[#allocation2 + $0x74] sm:$0x1] }
 0x108   : > { %v841_v38 = vor.u32 %v839_v33, %v838_v32  ;;  %v573_v39 = vmax.f32 %v510_v20, 0.0  ;;  %v842_v1 = vrot.slane %v838_v32, 4  ;;  %v1115_v33 = vld [vmem:[#allocation2 + $0x54] sm:$0xf] }
 0x109   : > { %5639 = vmatmul.msk.bf16.gmra.mxu1 %vm1671_vm8, %v1659_v34  ;;  %v1365_v63 = vrot.slane %v1364_v48, 4 }
 0x10a   : > { %v1109_v42 = vsel %vm6525_vm14, %v841_v38, %v1108_v35  ;;  %v605_v43 = vpack.c.bf16 %v573_v39, %v573_v39  ;;  %v6070_v44 = vld [vmem:[#allocation2 + $0x3c] sm:$0xff] }
 0x10b   : > { %v1196_v45 = vld [vmem:[#allocation2 + $0x40] sm:$0xf]  ;;  %1110 = vst [vmem:[#allocation2 + $0x48] sm:$0xf] %v1109_v42  ;;  %v1223_v47 = vld [vmem:[#allocation2 + $0x44] sm:$0x1]  ;;  %5720 = vmatmul.msk.bf16.gmra.mxu2 %vm1671_vm8, %v6070_v44 }
 0x10c   : > { %v1367_v49 = vshll.u32 %v1196_v45, 16  ;;  %v1371_v50 = vshrl.u32 %v1196_v45, 16  ;;  %v844_v52 = vshrl.u32 %v605_v43, 16  ;;  %v1377_v56 = vshll.u32 %v1223_v47, 16 }
 0x10d   : > { %v512_v53 = vpop.f32.mrf.mxu0  ;;  %v847_v58 = vshll.u32 %v605_v43, 16  ;;  %v722_v43 = vsel %vm6473_vm6, 0, %v721_v37 }
 0x10e   : > { %v1369_v54 = vrot.slane %v1367_v49, 5  ;;  %v1373_v55 = vrot.slane %v1371_v50, 4  ;;  %v846_v57 = vrot.slane %v844_v52, 7  ;;  %v513_v59 = vadd.f32 %v6512_v51, %v512_v53  ;;  %723 = vst [vmem:[#allocation2 + $0x74] sm:$0x1] %v722_v43 }
 0x10f   : > { %v1379_v11 = vrot.slane %v1377_v56, 5 }
 0x110   : > { %v1374_v0 = vor.u32 %v1373_v55, %v1369_v54  ;;  %v849_v3 = vor.u32 %v847_v58, %v846_v57  ;;  %v851_v4 = vrot.slane %v846_v57, 4  ;;  %v574_v5 = vmax.f32 %v513_v59, 0.0  ;;  %5831 = vmatmul.msk.bf16.gmra.mxu0 %vm1671_vm8, %v6083_v60  ;;  %v6084_v58 = vld [vmem:[#allocation2 + $0x30] sm:$0xff]  ;;  %v1119_v59 = vld [vmem:[#allocation2 + $0x5c] sm:$0x1] }
 0x111   : > { %v1370_v7 = vsel %vm6497_vm11, %v1365_v63, %v1369_v54  ;;  %v6063_v54 = vld [vmem:[%s6436_s16 + $0x78] sm:$0xff] }
 0x112   : > { %v1375_v8 = vrot.slane %v1374_v0, 4  ;;  %v850_v13 = vsel %vm6550_vm5, %v842_v1, %v849_v3  ;;  %v1113_v15 = vsel %vm6464_vm4, %v851_v4, %v1112_v62  ;;  %v606_v16 = vpack.c.bf16 %v574_v5, %v574_v5  ;;  %v1197_v17 = vld [vmem:[#allocation2 + $0x48] sm:$0xf]  ;;  %5633 = vmatmul.msk.bf16.gmra.mxu3 %vm424_vm0, %v6063_v54 }
 0x113   : > { %1111 = vst.msk [vmem:[#allocation2 + $0x4c] sm:$0xf] %vm626_vm1, %v850_v13  ;;  %v1382_v21 = vshrl.u32 %v1197_v17, 16  ;;  %v1385_v22 = vshll.u32 %v1197_v17, 16  ;;  %v1633_v26 = vunpack.c.l.b16 %v1370_v7 }
 0x114   : > { %v1380_v19 = vsel %vm6497_vm11, %v1375_v8, %v1379_v11  ;;  %1114 = vst [vmem:[#allocation2 + $0x50] sm:$0x1] %v1113_v15  ;;  %v853_v23 = vshrl.u32 %v606_v16, 16  ;;  %v856_v30 = vshll.u32 %v606_v16, 16  ;;  %v668_v8 = vld [vmem:[#allocation2 + $0x78] sm:$0x1] }
 0x115   : > { %v1634_v27 = vunpack.c.l.b16 %v1380_v19  ;;  %v514_v28 = vpop.f32.mrf.mxu0  ;;  %v1384_v20 = vrot.slane %v1382_v21, 4  ;;  %v1387_v34 = vrot.slane %v1385_v22, 5  ;;  %v669_v16 = vsel %vm6464_vm4, 0, %v668_v8 }
 0x116   : > { %v855_v29 = vrot.slane %v853_v23, 7  ;;  %v515_v31 = vadd.f32 %v6512_v51, %v514_v28  ;;  %670 = vst [vmem:[#allocation2 + $0x78] sm:$0x1] %v669_v16  ;;  %v1733_v16 = vpop.f32.mrf.mxu1 }
 0x117   : > { %v1660_v32 = vpack.c.b16 %v1634_v27, %v1633_v26  ;;  %v1388_v45 = vor.u32 %v1387_v34, %v1384_v20 }
 0x118   : > { %v858_v35 = vor.u32 %v856_v30, %v855_v29  ;;  %v575_v36 = vmax.f32 %v515_v31, 0.0  ;;  %v859_v63 = vrot.slane %v855_v29, 4  ;;  %v1122_v31 = vld [vmem:[#allocation2 + $0x60] sm:$0xf] }
 0x119   : > { %5640 = vmatmul.msk.bf16.gmra.mxu1 %vm1671_vm8, %v1660_v32  ;;  %v1389_v60 = vrot.slane %v1388_v45, 4 }
 0x11a   : > { %v1116_v38 = vsel %vm6525_vm14, %v858_v35, %v1115_v33  ;;  %v607_v39 = vpack.c.bf16 %v575_v36, %v575_v36  ;;  %v6071_v41 = vld [vmem:[#allocation2 + $0x48] sm:$0xff]  ;;  %v724_v35 = vld [vmem:[#allocation2 + $0x80] sm:$0x1] }
 0x11b   : > { %v1198_v42 = vld [vmem:[#allocation2 + $0x4c] sm:$0xf]  ;;  %1117 = vst [vmem:[#allocation2 + $0x54] sm:$0xf] %v1116_v38  ;;  %v1224_v44 = vld [vmem:[#allocation2 + $0x50] sm:$0x1]  ;;  %5721 = vmatmul.msk.bf16.gmra.mxu2 %vm1671_vm8, %v6071_v41 }
 0x11c   : > { %v1391_v46 = vshll.u32 %v1198_v42, 16  ;;  %v1395_v47 = vshrl.u32 %v1198_v42, 16  ;;  %v861_v48 = vshrl.u32 %v607_v39, 16  ;;  %v1401_v53 = vshll.u32 %v1224_v44, 16 }
 0x11d   : > { %v517_v49 = vpop.f32.mrf.mxu0  ;;  %v864_v56 = vshll.u32 %v607_v39, 16  ;;  %v725_v41 = vsel %vm6473_vm6, 0, %v724_v35  ;;  %v727_v35 = vld [vmem:[#allocation2 + $0x8c] sm:$0x1] }
 0x11e   : > { %v1393_v50 = vrot.slane %v1391_v46, 5  ;;  %v1397_v52 = vrot.slane %v1395_v47, 4  ;;  %v863_v55 = vrot.slane %v861_v48, 7  ;;  %v518_v57 = vadd.f32 %v6512_v51, %v517_v49  ;;  %726 = vst [vmem:[#allocation2 + $0x80] sm:$0x1] %v725_v41 }
 0x11f   : > { %v1403_v7 = vrot.slane %v1401_v53, 5  ;;  %v728_v41 = vsel %vm6473_vm6, 0, %v727_v35 }
 0x120   : > { %v1398_v62 = vor.u32 %v1397_v52, %v1393_v50  ;;  %v866_v0 = vor.u32 %v864_v56, %v863_v55  ;;  %v868_v1 = vrot.slane %v863_v55, 4  ;;  %v576_v3 = vmax.f32 %v518_v57, 0.0  ;;  %5832 = vmatmul.msk.bf16.gmra.mxu0 %vm1671_vm8, %v6084_v58  ;;  %v6085_v55 = vld [vmem:[#allocation2 + $0x3c] sm:$0xff]  ;;  %v1126_v56 = vld [vmem:[#allocation2 + $0x68] sm:$0x1] }
 0x121   : > { %v1394_v4 = vsel %vm6497_vm11, %v1389_v60, %v1393_v50  ;;  %729 = vst [vmem:[#allocation2 + $0x8c] sm:$0x1] %v728_v41  ;;  %v1136_v41 = vld [vmem:[#allocation2 + $0x78] sm:$0xf] }
 0x122   : > { %v1399_v5 = vrot.slane %v1398_v62, 4  ;;  %v867_v11 = vsel %vm6550_vm5, %v859_v63, %v866_v0  ;;  %v1120_v12 = vsel %vm6464_vm4, %v868_v1, %v1119_v59  ;;  %v608_v13 = vpack.c.bf16 %v576_v3, %v576_v3  ;;  %v1199_v15 = vld [vmem:[#allocation2 + $0x54] sm:$0xf] }
 0x123   : > { %1118 = vst.msk [vmem:[#allocation2 + $0x58] sm:$0xf] %vm626_vm1, %v867_v11  ;;  %v1406_v18 = vshrl.u32 %v1199_v15, 16  ;;  %v1409_v19 = vshll.u32 %v1199_v15, 16  ;;  %v1635_v22 = vunpack.c.l.b16 %v1394_v4  ;;  %v671_v4 = vld [vmem:[#allocation2 + $0x84] sm:$0x1]  ;;  %v1953_v15 = vpop.f32.mrf.mxu2 }
 0x124   : > { %v1404_v17 = vsel %vm6497_vm11, %v1399_v5, %v1403_v7  ;;  %1121 = vst [vmem:[#allocation2 + $0x5c] sm:$0x1] %v1120_v12  ;;  %v870_v21 = vshrl.u32 %v608_v13, 16  ;;  %v873_v28 = vshll.u32 %v608_v13, 16  ;;  %v672_v12 = vsel %vm6464_vm4, 0, %v671_v4 }
 0x125   : > { %v1636_v23 = vunpack.c.l.b16 %v1404_v17  ;;  %v519_v26 = vpop.f32.mrf.mxu0  ;;  %v1408_v32 = vrot.slane %v1406_v18, 4  ;;  %v1411_v33 = vrot.slane %v1409_v19, 5  ;;  %673 = vst [vmem:[#allocation2 + $0x84] sm:$0x1] %v672_v12 }
 0x126   : > { %v872_v27 = vrot.slane %v870_v21, 7  ;;  %v520_v29 = vadd.f32 %v6512_v51, %v519_v26 }
 0x127   : > { %v1661_v30 = vpack.c.b16 %v1636_v23, %v1635_v22  ;;  %v1412_v43 = vor.u32 %v1411_v33, %v1408_v32  ;;  %v6713_v23 = vadd.f32 %v1953_v15, %v1733_v16 }
 0x128   : > { %v875_v20 = vor.u32 %v873_v28, %v872_v27  ;;  %v577_v34 = vmax.f32 %v520_v29, 0.0  ;;  %v876_v59 = vrot.slane %v872_v27, 4 }
 0x129   : > { %5641 = vmatmul.msk.bf16.gmra.mxu1 %vm1671_vm8, %v1661_v30  ;;  %v1413_v57 = vrot.slane %v1412_v43, 4 }
 0x12a   : > { %v1123_v36 = vsel %vm6525_vm14, %v875_v20, %v1122_v31  ;;  %v609_v37 = vpack.c.bf16 %v577_v34, %v577_v34  ;;  %v6072_v38 = vld [vmem:[#allocation2 + $0x54] sm:$0xff]  ;;  %v1129_v31 = vld [vmem:[#allocation2 + $0x6c] sm:$0xf] }
 0x12b   : > { %v1200_v39 = vld [vmem:[#allocation2 + $0x58] sm:$0xf]  ;;  %1124 = vst [vmem:[#allocation2 + $0x60] sm:$0xf] %v1123_v36  ;;  %v1225_v42 = vld [vmem:[#allocation2 + $0x5c] sm:$0x1]  ;;  %5722 = vmatmul.msk.bf16.gmra.mxu2 %vm1671_vm8, %v6072_v38 }
 0x12c   : > { %v1415_v44 = vshll.u32 %v1200_v39, 16  ;;  %v1419_v45 = vshrl.u32 %v1200_v39, 16  ;;  %v878_v46 = vshrl.u32 %v609_v37, 16  ;;  %v1425_v50 = vshll.u32 %v1225_v42, 16 }
 0x12d   : > { %v522_v47 = vpop.f32.mrf.mxu0  ;;  %v881_v53 = vshll.u32 %v609_v37, 16 }
 0x12e   : > { %v1417_v48 = vrot.slane %v1415_v44, 5  ;;  %v1421_v49 = vrot.slane %v1419_v45, 4  ;;  %v880_v52 = vrot.slane %v878_v46, 7  ;;  %v523_v54 = vadd.f32 %v6512_v51, %v522_v47 }
 0x12f   : > { %v1427_v3 = vrot.slane %v1425_v50, 5  ;;  %v5845_v50 = vld [vmem:[%s8745_s3 + $0x8] sm:$0x3] }
 0x130   : > { %v1422_v58 = vor.u32 %v1421_v49, %v1417_v48  ;;  %v883_v60 = vor.u32 %v881_v53, %v880_v52  ;;  %v885_v62 = vrot.slane %v880_v52, 4  ;;  %v578_v63 = vmax.f32 %v523_v54, 0.0  ;;  %5833 = vmatmul.msk.bf16.gmra.mxu0 %vm1671_vm8, %v6085_v55  ;;  %v6728_v54 = vld [vmem:[%s8744_s2] ss:$0 sm:$0xff] }
 0x131   : > { %v1418_v0 = vsel %vm6497_vm11, %v1413_v57, %v1417_v48  ;;  %v3235_v57 = vsel %vm1720_vm7, %v5845_v50, 0 }
 0x132   : > { %v1423_v1 = vrot.slane %v1422_v58, 4  ;;  %v884_v5 = vsel %vm6550_vm5, %v876_v59, %v883_v60  ;;  %v1127_v7 = vsel %vm6464_vm4, %v885_v62, %v1126_v56  ;;  %v610_v8 = vpack.c.bf16 %v578_v63, %v578_v63  ;;  %v1201_v11 = vld [vmem:[#allocation2 + $0x60] sm:$0xf]  ;;  %v6086_v56 = vld [vmem:[#allocation2 + $0x48] sm:$0xff]  ;;  %v1133_v58 = vld [vmem:[#allocation2 + $0x74] sm:$0x1]  ;;  %3244 = vmatpush.bf16.msrb.mxu1 %v3235_v57 }
 0x133   : > { %1125 = vst.msk [vmem:[#allocation2 + $0x64] sm:$0xf] %vm626_vm1, %v884_v5  ;;  %v1430_v17 = vshrl.u32 %v1201_v11, 16  ;;  %v1433_v18 = vshll.u32 %v1201_v11, 16  ;;  %v1637_v21 = vunpack.c.l.b16 %v1418_v0  ;;  %v2704_v11 = vld [vmem:[#allocation2 + $0xc] sm:$0xf] }
 0x134   : > { %v1428_v13 = vsel %vm6497_vm11, %v1423_v1, %v1427_v3  ;;  %1128 = vst [vmem:[#allocation2 + $0x68] sm:$0x1] %v1127_v7  ;;  %v887_v19 = vshrl.u32 %v610_v8, 16  ;;  %v890_v28 = vshll.u32 %v610_v8, 16  ;;  %v542_v3 = vpop.f32.mrf.mxu3  ;;  %v674_v8 = vld [vmem:[#allocation2 + $0x90] sm:$0x1] }
 0x135   : > { %v1638_v22 = vunpack.c.l.b16 %v1428_v13  ;;  %v524_v26 = vpop.f32.mrf.mxu0  ;;  %v1432_v32 = vrot.slane %v1430_v17, 4  ;;  %v1435_v33 = vrot.slane %v1433_v18, 5  ;;  %v675_v17 = vsel %vm6464_vm4, 0, %v674_v8  ;;  %v6741_v18 = vld [vmem:[#allocation2 + $0x10] sm:$0xf] }
 0x136   : > { %v889_v27 = vrot.slane %v887_v19, 7  ;;  %v525_v29 = vadd.f32 %v6512_v51, %v524_v26  ;;  %676 = vst [vmem:[#allocation2 + $0x90] sm:$0x1] %v675_v17  ;;  %v2756_v35 = vshll.u32 %v2704_v11, 16 }
 0x137   : > { %v1662_v30 = vpack.c.b16 %v1638_v22, %v1637_v21  ;;  %v1436_v42 = vor.u32 %v1435_v33, %v1432_v32  ;;  %v6748_v32 = vpop.f32.mrf.mxu2 }
 0x138   : > { %v892_v20 = vor.u32 %v890_v28, %v889_v27  ;;  %v579_v34 = vmax.f32 %v525_v29, 0.0  ;;  %v893_v62 = vrot.slane %v889_v27, 4  ;;  %v6746_v29 = vld [vmem:[#allocation2 + $0xc] sm:$0xe]  ;;  %8777 = vst [vmem:[#allocation12_spill] sm:$0xff] %v6748_v32 }
 0x139   : > { %5642 = vmatmul.msk.bf16.gmra.mxu1 %vm1671_vm8, %v1662_v30  ;;  %v1437_v59 = vrot.slane %v1436_v42, 4  ;;  %v2753_v30 = vshrl.u32 %v2704_v11, 16 }
 0x13a   : > { %v1130_v36 = vsel %vm6525_vm14, %v892_v20, %v1129_v31  ;;  %v611_v37 = vpack.c.bf16 %v579_v34, %v579_v34  ;;  %v6073_v38 = vld [vmem:[#allocation2 + $0x60] sm:$0xff]  ;;  %v3424_v34 = vrot.slane %v6741_v18, 5 }
 0x13b   : > { %v1202_v39 = vld [vmem:[#allocation2 + $0x64] sm:$0xf]  ;;  %1131 = vst [vmem:[#allocation2 + $0x6c] sm:$0xf] %v1130_v36  ;;  %v1226_v51 = vld [vmem:[#allocation2 + $0x68] sm:$0x1]  ;;  %5723 = vmatmul.msk.bf16.gmra.mxu2 %vm1671_vm8, %v6073_v38 }
 0x13c   : > { %v1439_v43 = vshll.u32 %v1202_v39, 16  ;;  %v1443_v44 = vshrl.u32 %v1202_v39, 16  ;;  %v895_v45 = vshrl.u32 %v611_v37, 16  ;;  %v1449_v46 = vshll.u32 %v1226_v51, 16 }
 0x13d   : > { %v527_v47 = vpop.f32.mrf.mxu0  ;;  %v898_v53 = vshll.u32 %v611_v37, 16  ;;  %v5862_v51 = vrot.slane %v6746_v29, 9  ;;  %v6763_v50 = vrot.slane %v3424_v34, 4 }
 0x13e   : > { %v1441_v48 = vrot.slane %v1439_v43, 5  ;;  %v1445_v49 = vrot.slane %v1443_v44, 4  ;;  %v897_v52 = vrot.slane %v895_v45, 7  ;;  %v528_v55 = vadd.f32 %v6728_v54, %v527_v47  ;;  %v544_v45 = vpop.f32.mrf.mxu3 }
 0x13f   : > { %v1451_v7 = vrot.slane %v1449_v46, 5  ;;  %v6757_v46 = vrot.slane %v2753_v30, 4  ;;  %v543_v47 = vadd.f32 %v6728_v54, %v542_v3 }
 0x140   : > { %v1446_v60 = vor.u32 %v1445_v49, %v1441_v48  ;;  %v900_v63 = vor.u32 %v898_v53, %v897_v52  ;;  %v902_v0 = vrot.slane %v897_v52, 4  ;;  %v580_v1 = vmax.f32 %v528_v55, 0.0  ;;  %5834 = vmatmul.msk.bf16.gmra.mxu0 %vm1671_vm8, %v6086_v56 }
 0x141   : > { %v1442_v4 = vsel %vm6497_vm11, %v1437_v59, %v1441_v48  ;;  %v730_v48 = vld [vmem:[#allocation2 + $0x98] sm:$0x1]  ;;  %v545_v49 = vadd.f32 %v6728_v54, %v544_v45  ;;  %v6765_v52 = vrot.slane %v2756_v35, 5 }
 0x142   : > { %v1447_v5 = vrot.slane %v1446_v60, 4  ;;  %v901_v12 = vsel %vm6550_vm5, %v893_v62, %v900_v63  ;;  %v1134_v13 = vsel %vm6464_vm4, %v902_v0, %v1133_v58  ;;  %v612_v15 = vpack.c.bf16 %v580_v1, %v580_v1  ;;  %v1203_v16 = vld [vmem:[#allocation2 + $0x6c] sm:$0xf]  ;;  %v6772_v60 = vpop.f32.mrf.mxu1 }
 0x143   : > { %1132 = vst.msk [vmem:[#allocation2 + $0x70] sm:$0xf] %vm626_vm1, %v901_v12  ;;  %v1454_v21 = vshrl.u32 %v1203_v16, 16  ;;  %v1457_v22 = vshll.u32 %v1203_v16, 16  ;;  %v1639_v27 = vunpack.c.l.b16 %v1442_v4  ;;  %v731_v59 = vsel %vm6473_vm6, 0, %v730_v48 }
 0x144   : > { %v1452_v19 = vsel %vm6497_vm11, %v1447_v5, %v1451_v7  ;;  %1135 = vst [vmem:[#allocation2 + $0x74] sm:$0x1] %v1134_v13  ;;  %v904_v26 = vshrl.u32 %v612_v15, 16  ;;  %v907_v37 = vshll.u32 %v612_v15, 16  ;;  %v586_v12 = vmax.f32 %v543_v47, 0.0 }
 0x145   : > { %v1640_v28 = vunpack.c.l.b16 %v1452_v19  ;;  %v529_v31 = vpop.f32.mrf.mxu0  ;;  %v1456_v33 = vrot.slane %v1454_v21, 4  ;;  %v1459_v20 = vrot.slane %v1457_v22, 5  ;;  %8778 = vst [vmem:[#allocation13_spill] sm:$0xff] %v6772_v60  ;;  %v677_v13 = vld [vmem:[#allocation2 + $0x9c] sm:$0x1]  ;;  %v587_v15 = vmax.f32 %v545_v49, 0.0 }
 0x146   : > { %v6751_v36 = vrot.slane %v904_v26, 7  ;;  %v530_v38 = vadd.f32 %v6728_v54, %v529_v31  ;;  %v6087_v19 = vld [vmem:[#allocation2 + $0x54] sm:$0xff]  ;;  %v678_v22 = vsel %vm6464_vm4, 0, %v677_v13  ;;  %732 = vst [vmem:[#allocation2 + $0x98] sm:$0x1] %v731_v59  ;;  %v618_v31 = vpack.c.bf16 %v586_v12, %v586_v12 }
 0x147   : > { %v1663_v39 = vpack.c.b16 %v1640_v28, %v1639_v27  ;;  %v1460_v44 = vor.u32 %v1459_v20, %v1456_v33  ;;  %v1140_v26 = vld [vmem:[#allocation2 + $0x80] sm:$0x1]  ;;  %679 = vst [vmem:[#allocation2 + $0x9c] sm:$0x1] %v678_v22  ;;  %v619_v33 = vpack.c.bf16 %v587_v15, %v587_v15  ;;  %v733_v20 = vld [vmem:[#allocation2 + $0xa4] sm:$0x1] }
 0x148   : > { %v909_v42 = vor.u32 %v907_v37, %v6751_v36  ;;  %v581_v43 = vmax.f32 %v530_v38, 0.0  ;;  %v910_v53 = vrot.slane %v6751_v36, 4 }
 0x149   : > { %5643 = vmatmul.msk.bf16.gmra.mxu1 %vm1671_vm8, %v1663_v39  ;;  %v1461_v4 = vrot.slane %v1460_v44, 4  ;;  %v963_v48 = vshrl.u32 %v619_v33, 16 }
 0x14a   : > { %v1137_v55 = vsel %vm6525_vm14, %v909_v42, %v1136_v41  ;;  %v613_v56 = vpack.c.bf16 %v581_v43, %v581_v43  ;;  %v6074_v57 = vld [vmem:[#allocation2 + $0x6c] sm:$0xff]  ;;  %v955_v41 = vshrl.u32 %v618_v31, 16  ;;  %v958_v42 = vshll.u32 %v618_v31, 16 }
 0x14b   : > { %v1204_v58 = vld [vmem:[#allocation2 + $0x70] sm:$0xf]  ;;  %1138 = vst [vmem:[#allocation2 + $0x78] sm:$0xf] %v1137_v55  ;;  %v1227_v62 = vld [vmem:[#allocation2 + $0x74] sm:$0x1]  ;;  %5724 = vmatmul.msk.bf16.gmra.mxu2 %vm1671_vm8, %v6074_v57  ;;  %v547_v55 = vpop.f32.mrf.mxu3 }
 0x14c   : > { %v1463_v63 = vshll.u32 %v1204_v58, 16  ;;  %v1467_v0 = vshrl.u32 %v1204_v58, 16  ;;  %v912_v1 = vshrl.u32 %v613_v56, 16  ;;  %v915_v3 = vshll.u32 %v613_v56, 16 }
 0x14d   : > { %v1473_v5 = vshll.u32 %v1227_v62, 16  ;;  %v532_v7 = vpop.f32.mrf.mxu0  ;;  %v734_v43 = vsel %vm6473_vm6, 0, %v733_v20  ;;  %v957_v57 = vrot.slane %v955_v41, 7  ;;  %v966_v58 = vshll.u32 %v619_v33, 16  ;;  %v736_v20 = vld [vmem:[#allocation2 + $0xb0] sm:$0x1] }
 0x14e   : > { %v1465_v8 = vrot.slane %v1463_v63, 5  ;;  %v1469_v11 = vrot.slane %v1467_v0, 4  ;;  %v914_v16 = vrot.slane %v912_v1, 7  ;;  %v533_v17 = vadd.f32 %v6728_v54, %v532_v7  ;;  %v1958_v27 = vpop.f32.mrf.mxu2  ;;  %735 = vst [vmem:[#allocation2 + $0xa4] sm:$0x1] %v734_v43 }
 0x14f   : > { %v1475_v21 = vrot.slane %v1473_v5, 5  ;;  %v965_v0 = vrot.slane %v963_v48, 7  ;;  %v961_v5 = vrot.slane %v957_v57, 4 }
 0x150   : > { %v1466_v28 = vsel %vm6497_vm11, %v1461_v4, %v1465_v8  ;;  %v1470_v30 = vor.u32 %v1469_v11, %v1465_v8  ;;  %v917_v35 = vor.u32 %v915_v3, %v914_v16  ;;  %v919_v36 = vrot.slane %v914_v16, 4  ;;  %5835 = vmatmul.msk.bf16.gmra.mxu0 %vm1671_vm8, %v6087_v19  ;;  %v1157_v16 = vld [vmem:[#allocation2 + $0x9c] sm:$0xf]  ;;  %v1143_v19 = vld [vmem:[#allocation2 + $0x84] sm:$0xf] }
 0x151   : > { %v582_v37 = vmax.f32 %v533_v17, 0.0  ;;  %v1641_v38 = vunpack.c.l.b16 %v1466_v28  ;;  %v960_v4 = vor.u32 %v958_v42, %v957_v57  ;;  %v680_v17 = vld [vmem:[#allocation2 + $0xa8] sm:$0x1]  ;;  %v970_v28 = vrot.slane %v965_v0, 4 }
 0x152   : > { %v1471_v39 = vrot.slane %v1470_v30, 4  ;;  %v918_v44 = vsel %vm6550_vm5, %v910_v53, %v917_v35  ;;  %v1141_v45 = vsel %vm6464_vm4, %v919_v36, %v1140_v26  ;;  %v1205_v49 = vld [vmem:[#allocation2 + $0x78] sm:$0xf]  ;;  %v968_v26 = vor.u32 %v966_v58, %v965_v0 }
 0x153   : > { %v614_v47 = vpack.c.bf16 %v582_v37, %v582_v37  ;;  %1139 = vst.msk [vmem:[#allocation2 + $0x7c] sm:$0xf] %vm626_vm1, %v918_v44  ;;  %v1478_v59 = vshrl.u32 %v1205_v49, 16  ;;  %v1481_v8 = vshll.u32 %v1205_v49, 16  ;;  %v1158_v22 = vsel %vm6525_vm14, %v960_v4, %v1157_v16  ;;  %v549_v49 = vpop.f32.mrf.mxu3 }
 0x154   : > { %v1476_v56 = vsel %vm6497_vm11, %v1471_v39, %v1475_v21  ;;  %1142 = vst [vmem:[#allocation2 + $0x80] sm:$0x1] %v1141_v45  ;;  %v2762_v35 = vshll.u32 %v6741_v18, 16  ;;  %v969_v37 = vsel %vm6550_vm5, %v961_v5, %v968_v26  ;;  %v681_v41 = vsel %vm6464_vm4, 0, %v680_v17  ;;  %v6088_v5 = vld [vmem:[#allocation2 + $0x60] sm:$0xff] }
 0x155   : > { %v921_v62 = vshrl.u32 %v614_v47, 16  ;;  %v924_v63 = vshll.u32 %v614_v47, 16  ;;  %v1642_v53 = vunpack.c.l.b16 %v1476_v56  ;;  %v534_v1 = vpop.f32.mrf.mxu0  ;;  %v1480_v7 = vrot.slane %v1478_v59, 4  ;;  %1159 = vst [vmem:[#allocation2 + $0x9c] sm:$0xf] %v1158_v22 }
 0x156   : > { %v1738_v3 = vpop.f32.mrf.mxu1  ;;  %v535_v12 = vadd.f32 %v6728_v54, %v534_v1  ;;  %v1960_v21 = vpop.f32.mrf.mxu2  ;;  %v1483_v30 = vrot.slane %v1481_v8, 5  ;;  %1160 = vst.msk [vmem:[#allocation2 + $0xa0] sm:$0xf] %vm626_vm1, %v969_v37  ;;  %v550_v57 = vadd.f32 %v6728_v54, %v549_v49  ;;  %v737_v58 = vsel %vm6473_vm6, 0, %v736_v20  ;;  %v1147_v22 = vld [vmem:[#allocation2 + $0x8c] sm:$0x1] }
 0x157   : > { %v6790_v11 = vrot.slane %v921_v62, 7  ;;  %v6793_v13 = vadd.f32 %v1958_v27, %v1738_v3  ;;  %v1664_v15 = vpack.c.b16 %v1642_v53, %v1641_v38  ;;  %v548_v27 = vadd.f32 %v6728_v54, %v547_v55  ;;  %v1161_v38 = vld [vmem:[#allocation2 + $0xa4] sm:$0x1]  ;;  %682 = vst [vmem:[#allocation2 + $0xa8] sm:$0x1] %v681_v41 }
 0x158   : > { %v583_v33 = vmax.f32 %v535_v12, 0.0  ;;  %v1484_v39 = vor.u32 %v1483_v30, %v1480_v7  ;;  %v1162_v45 = vsel %vm6464_vm4, %v970_v28, %v1161_v38  ;;  %v2759_v59 = vor.u32 %v6765_v52, %v6757_v46  ;;  %738 = vst [vmem:[#allocation2 + $0xb0] sm:$0x1] %v737_v58 }
 0x159   : > { %v926_v31 = vor.u32 %v924_v63, %v6790_v11  ;;  %5644 = vmatmul.msk.bf16.gmra.mxu1 %vm1671_vm8, %v1664_v15  ;;  %v927_v36 = vrot.slane %v6790_v11, 4  ;;  %v588_v48 = vmax.f32 %v548_v27, 0.0  ;;  %1163 = vst [vmem:[#allocation2 + $0xa4] sm:$0x1] %v1162_v45  ;;  %v589_v11 = vmax.f32 %v550_v57, 0.0 }
 0x15a   : > { %v615_v43 = vpack.c.bf16 %v583_v33, %v583_v33  ;;  %v6075_v44 = vld [vmem:[#allocation2 + $0x78] sm:$0xff]  ;;  %v1485_v63 = vrot.slane %v1484_v39, 4 }
 0x15b   : > { %v1144_v42 = vsel %vm6525_vm14, %v926_v31, %v1143_v19  ;;  %v1206_v47 = vld [vmem:[#allocation2 + $0x7c] sm:$0xf]  ;;  %v1228_v55 = vld [vmem:[#allocation2 + $0x80] sm:$0x1]  ;;  %5725 = vmatmul.msk.bf16.gmra.mxu2 %vm1671_vm8, %v6075_v44  ;;  %v620_v8 = vpack.c.bf16 %v588_v48, %v588_v48  ;;  %v5878_v19 = vld [vmem:[%s8745_s3 + $0xa] sm:$0x3]  ;;  %v621_v41 = vpack.c.bf16 %v589_v11, %v589_v11  ;;  %v552_v49 = vpop.f32.mrf.mxu3 }
 0x15c   : > { %1145 = vst [vmem:[#allocation2 + $0x84] sm:$0xf] %v1144_v42  ;;  %v1487_v56 = vshll.u32 %v1206_v47, 16  ;;  %v929_v62 = vshrl.u32 %v615_v43, 16  ;;  %v1491_v53 = vshrl.u32 %v1206_v47, 16  ;;  %v1497_v0 = vshll.u32 %v1228_v55, 16 }
 0x15d   : > { %v932_v1 = vshll.u32 %v615_v43, 16  ;;  %v537_v3 = vpop.f32.mrf.mxu0  ;;  %v972_v31 = vshrl.u32 %v620_v8, 16  ;;  %v975_v33 = vshll.u32 %v620_v8, 16  ;;  %v3633_v42 = vsel %vm1720_vm7, %v5878_v19, 0  ;;  %v683_v11 = vld [vmem:[#allocation2 + $0xb4] sm:$0x1] }
 0x15e   : > { %v1740_v4 = vpop.f32.mrf.mxu1  ;;  %v1489_v7 = vrot.slane %v1487_v56, 5  ;;  %v931_v12 = vrot.slane %v929_v62, 7  ;;  %v538_v15 = vadd.f32 %v6728_v54, %v537_v3  ;;  %v1493_v17 = vrot.slane %v1491_v53, 4  ;;  %v1963_v26 = vpop.f32.mrf.mxu2  ;;  %3642 = vmatpush.bf16.msrb.mxu2 %v3633_v42  ;;  %v1164_v53 = vld [vmem:[#allocation2 + $0xa8] sm:$0xf] }
 0x15f   : > { %v6818_v16 = vadd.f32 %v1960_v21, %v1740_v4  ;;  %v1499_v30 = vrot.slane %v1497_v0, 5  ;;  %v974_v39 = vrot.slane %v972_v31, 7  ;;  %v980_v57 = vshrl.u32 %v621_v41, 16  ;;  %v1168_v19 = vld [vmem:[#allocation2 + $0xb0] sm:$0x1] }
 0x160   : > { %v1490_v28 = vsel %vm6497_vm11, %v1485_v63, %v1489_v7  ;;  %v934_v27 = vor.u32 %v932_v1, %v931_v12  ;;  %v936_v20 = vrot.slane %v931_v12, 4  ;;  %v584_v37 = vmax.f32 %v538_v15, 0.0  ;;  %5836 = vmatmul.msk.bf16.gmra.mxu0 %vm1671_vm8, %v6088_v5  ;;  %v1212_v52 = vld [vmem:[#allocation2 + $0xa0] sm:$0xf] }
 0x161   : > { %v1494_v21 = vor.u32 %v1493_v17, %v1489_v7  ;;  %v1643_v38 = vunpack.c.l.b16 %v1490_v28  ;;  %v977_v55 = vor.u32 %v975_v33, %v974_v39  ;;  %v978_v56 = vrot.slane %v974_v39, 4  ;;  %v1150_v28 = vld [vmem:[#allocation2 + $0x90] sm:$0xf] }
 0x162   : > { %v935_v43 = vsel %vm6550_vm5, %v927_v36, %v934_v27  ;;  %v1148_v44 = vsel %vm6464_vm4, %v936_v20, %v1147_v22  ;;  %v616_v45 = vpack.c.bf16 %v584_v37, %v584_v37  ;;  %v983_v58 = vshll.u32 %v621_v41, 16  ;;  %v739_v37 = vld [vmem:[#allocation2 + $0xbc] sm:$0x1] }
 0x163   : > { %v1495_v47 = vrot.slane %v1494_v21, 4  ;;  %v1207_v48 = vld [vmem:[#allocation2 + $0x84] sm:$0xf]  ;;  %1146 = vst.msk [vmem:[#allocation2 + $0x88] sm:$0xf] %vm626_vm1, %v935_v43  ;;  %v553_v0 = vadd.f32 %v6728_v54, %v552_v49  ;;  %v1165_v5 = vsel %vm6525_vm14, %v977_v55, %v1164_v53  ;;  %v982_v7 = vrot.slane %v980_v57, 7 }
 0x164   : > { %1149 = vst [vmem:[#allocation2 + $0x8c] sm:$0x1] %v1148_v44  ;;  %v938_v62 = vshrl.u32 %v616_v45, 16  ;;  %v941_v63 = vshll.u32 %v616_v45, 16  ;;  %v1502_v8 = vshrl.u32 %v1207_v48, 16  ;;  %v1505_v22 = vshll.u32 %v1207_v48, 16 }
 0x165   : > { %v1500_v36 = vsel %vm6497_vm11, %v1495_v47, %v1499_v30  ;;  %v539_v1 = vpop.f32.mrf.mxu0  ;;  %1166 = vst [vmem:[#allocation2 + $0xa8] sm:$0xf] %v1165_v5  ;;  %v985_v33 = vor.u32 %v983_v58, %v982_v7  ;;  %v987_v27 = vrot.slane %v982_v7, 4  ;;  %v2766_v42 = vshrl.u32 %v6741_v18, 16  ;;  %v554_v58 = vpop.f32.mrf.mxu3 }
 0x166   : > { %v1743_v3 = vpop.f32.mrf.mxu1  ;;  %v1644_v4 = vunpack.c.l.b16 %v1500_v36  ;;  %v6837_v12 = vrot.slane %v938_v62, 7  ;;  %v540_v15 = vadd.f32 %v6728_v54, %v539_v1  ;;  %v1965_v31 = vpop.f32.mrf.mxu2  ;;  %v1504_v20 = vrot.slane %v1502_v8, 4 }
 0x167   : > { %v6840_v17 = vadd.f32 %v1963_v26, %v1743_v3  ;;  %v1507_v41 = vrot.slane %v1505_v22, 5  ;;  %v986_v26 = vsel %vm6550_vm5, %v978_v56, %v985_v33  ;;  %v1169_v43 = vsel %vm6464_vm4, %v987_v27, %v1168_v19  ;;  %v6089_v33 = vld [vmem:[#allocation2 + $0x6c] sm:$0xff] }
 0x168   : > { %v1665_v30 = vpack.c.b16 %v1644_v4, %v1643_v38  ;;  %v943_v21 = vor.u32 %v941_v63, %v6837_v12  ;;  %v585_v39 = vmax.f32 %v540_v15, 0.0  ;;  %v6849_v38 = vld [vmem:[#allocation2 + $0x14] sm:$0x1]  ;;  %v590_v44 = vmax.f32 %v553_v0, 0.0  ;;  %1167 = vst.msk [vmem:[#allocation2 + $0xac] sm:$0xf] %vm626_vm1, %v986_v26 }
 0x169   : > { %v684_v45 = vsel %vm6464_vm4, 0, %v683_v11  ;;  %v1508_v57 = vor.u32 %v1507_v41, %v1504_v20  ;;  %v740_v56 = vsel %vm6473_vm6, 0, %v739_v37  ;;  %v555_v0 = vadd.f32 %v6728_v54, %v554_v58  ;;  %1170 = vst [vmem:[#allocation2 + $0xb0] sm:$0x1] %v1169_v43  ;;  %v1154_v20 = vld [vmem:[#allocation2 + $0x98] sm:$0x1] }
 0x16a   : > { %5645 = vmatmul.msk.bf16.gmra.mxu1 %vm1671_vm8, %v1665_v30  ;;  %v1151_v47 = vsel %vm6525_vm14, %v943_v21, %v1150_v28  ;;  %v617_v48 = vpack.c.bf16 %v585_v39, %v585_v39  ;;  %v6076_v49 = vld [vmem:[#allocation2 + $0x84] sm:$0xff]  ;;  %v622_v53 = vpack.c.bf16 %v590_v44, %v590_v44  ;;  %v3427_v4 = vrot.slane %v6849_v38, 5  ;;  %685 = vst [vmem:[#allocation2 + $0xb4] sm:$0x1] %v684_v45 }
 0x16b   : > { %v1208_v55 = vld [vmem:[#allocation2 + $0x88] sm:$0xf]  ;;  %1152 = vst [vmem:[#allocation2 + $0x90] sm:$0xf] %v1151_v47  ;;  %v1229_v62 = vld [vmem:[#allocation2 + $0x8c] sm:$0x1]  ;;  %5726 = vmatmul.msk.bf16.gmra.mxu2 %vm1671_vm8, %v6076_v49 }
 0x16c   : > { %v1511_v63 = vshll.u32 %v1208_v55, 16  ;;  %v1515_v36 = vshrl.u32 %v1208_v55, 16  ;;  %v946_v1 = vshrl.u32 %v617_v48, 16  ;;  %v1521_v3 = vshll.u32 %v1229_v62, 16  ;;  %741 = vst [vmem:[#allocation2 + $0xbc] sm:$0x1] %v740_v56 }
 0x16d   : > { %v6863_v5 = vrot.slane %v2762_v35, 5  ;;  %v6865_v8 = vpop.f32.mrf.mxu0  ;;  %v989_v19 = vshrl.u32 %v622_v53, 16  ;;  %v2768_v22 = vrot.slane %v2766_v42, 4  ;;  %v949_v28 = vshll.u32 %v617_v48, 16 }
 0x16e   : > { %v1745_v7 = vpop.f32.mrf.mxu1  ;;  %8779 = vst [vmem:[#allocation14_spill] sm:$0xff] %v6865_v8  ;;  %v1513_v11 = vrot.slane %v1511_v63, 5  ;;  %v1517_v15 = vrot.slane %v1515_v36, 4  ;;  %v948_v54 = vrot.slane %v946_v1, 7  ;;  %v992_v27 = vshll.u32 %v622_v53, 16  ;;  %v1968_v37 = vpop.f32.mrf.mxu2 }
 0x16f   : > { %v6867_v30 = vadd.f32 %v1965_v31, %v1745_v7  ;;  %v1509_v21 = vrot.slane %v1508_v57, 4  ;;  %v991_v39 = vrot.slane %v989_v19, 7  ;;  %v591_v41 = vmax.f32 %v555_v0, 0.0 }
 0x170   : > { %v1518_v35 = vor.u32 %v1517_v15, %v1513_v11  ;;  %v944_v26 = vrot.slane %v6837_v12, 4  ;;  %v951_v43 = vor.u32 %v949_v28, %v948_v54  ;;  %v953_v44 = vrot.slane %v948_v54, 4  ;;  %5837 = vmatmul.msk.bf16.gmra.mxu0 %vm1671_vm8, %v6089_v33  ;;  %v6895_v54 = vld [vmem:[#allocation2 + $0x18] sm:$0xe] }
 0x171   : > { %v1523_v42 = vrot.slane %v1521_v3, 5  ;;  %v1514_v31 = vsel %vm6497_vm11, %v1509_v21, %v1513_v11  ;;  %v994_v47 = vor.u32 %v992_v27, %v991_v39  ;;  %v623_v48 = vpack.c.bf16 %v591_v41, %v591_v41  ;;  %v1171_v1 = vld [vmem:[#allocation2 + $0xb4] sm:$0xf] }
 0x172   : > { %v1519_v45 = vrot.slane %v1518_v35, 4  ;;  %v952_v49 = vsel %vm6550_vm5, %v944_v26, %v951_v43  ;;  %v1155_v55 = vsel %vm6464_vm4, %v953_v44, %v1154_v20  ;;  %v3428_v12 = vsel %vm6532_vm15, %v6763_v50, %v3427_v4  ;;  %v1209_v57 = vld [vmem:[#allocation2 + $0x90] sm:$0xf]  ;;  %v6899_v20 = vld [vmem:[#allocation2 + $0x1c] sm:$0xf] }
 0x173   : > { %v2772_v58 = vshll.u32 %v6849_v38, 16  ;;  %1153 = vst.msk [vmem:[#allocation2 + $0x94] sm:$0xf] %vm626_vm1, %v952_v49  ;;  %v997_v62 = vshrl.u32 %v623_v48, 16  ;;  %v1000_v63 = vshll.u32 %v623_v48, 16  ;;  %v1526_v36 = vshrl.u32 %v1209_v57, 16 }
 0x174   : > { %v1524_v56 = vsel %vm6497_vm11, %v1519_v45, %v1523_v42  ;;  %1156 = vst [vmem:[#allocation2 + $0x98] sm:$0x1] %v1155_v55  ;;  %v1645_v53 = vunpack.c.l.b16 %v1514_v31  ;;  %v1529_v3 = vshll.u32 %v1209_v57, 16  ;;  %v2769_v7 = vor.u32 %v2768_v22, %v6863_v5  ;;  %v1175_v27 = vld [vmem:[#allocation2 + $0xbc] sm:$0x1] }
 0x175   : > { %v1646_v0 = vunpack.c.l.b16 %v1524_v56  ;;  %v6885_v50 = vpop.f32.mrf.mxu0  ;;  %v3425_v38 = vsel %vm6532_vm15, %v5862_v51, %v3424_v34  ;;  %v995_v4 = vrot.slane %v991_v39, 4  ;;  %v1172_v15 = vsel %vm6525_vm14, %v994_v47, %v1171_v1  ;;  %v1211_v31 = vld [vmem:[#allocation2 + $0x9c] sm:$0xf]  ;;  %v6917_v57 = vld [vmem:[#allocation2 + $0x20] sm:$0x1] }
 0x176   : > { %v1748_v11 = vpop.f32.mrf.mxu1  ;;  %8780 = vst [vmem:[#allocation15_spill] sm:$0xff] %v6885_v50  ;;  %v999_v19 = vrot.slane %v997_v62, 7  ;;  %v3537_v33 = vunpack.c.l.b16 %v3428_v12  ;;  %v1970_v18 = vpop.f32.mrf.mxu2  ;;  %v1528_v35 = vrot.slane %v1526_v36, 4  ;;  %v1531_v34 = vrot.slane %v1529_v3, 5  ;;  %v3365_v50 = vld [vmem:[#allocation2 + $0x60] sm:$0xe] }
 0x177   : > { %v6897_v28 = vadd.f32 %v1968_v37, %v1748_v11  ;;  %v1666_v22 = vpack.c.b16 %v1646_v0, %v1645_v53  ;;  %1173 = vst [vmem:[#allocation2 + $0xb4] sm:$0xf] %v1172_v15  ;;  %v3536_v51 = vunpack.c.l.b16 %v3425_v38  ;;  %v6904_v39 = vrot.slane %v2759_v59, 4  ;;  %v2707_v59 = vld [vmem:[#allocation2 + $0x18] sm:$0xf] }
 0x178   : > { %v1002_v29 = vor.u32 %v1000_v63, %v999_v19  ;;  %v1004_v21 = vrot.slane %v999_v19, 4  ;;  %v2770_v41 = vrot.slane %v2769_v7, 4  ;;  %v2774_v37 = vrot.slane %v2772_v58, 5  ;;  %v6090_v11 = vld [vmem:[#allocation2 + $0x78] sm:$0xff] }
 0x179   : > { %v5863_v44 = vrot.slane %v6895_v54, 9  ;;  %v3431_v42 = vrot.slane %v6899_v20, 5  ;;  %v3568_v45 = vpack.c.b16 %v3537_v33, %v3536_v51  ;;  %v1532_v48 = vor.u32 %v1531_v34, %v1528_v35 }
 0x17a   : > { %5646 = vmatmul.msk.bf16.gmra.mxu1 %vm1671_vm8, %v1666_v22  ;;  %v1003_v26 = vsel %vm6550_vm5, %v995_v4, %v1002_v29  ;;  %v1176_v43 = vsel %vm6464_vm4, %v1004_v21, %v1175_v27  ;;  %v1210_v46 = vld [vmem:[#allocation2 + $0x94] sm:$0xf]  ;;  %v2775_v12 = vsel %vm6497_vm11, %v2770_v41, %v2774_v37  ;;  %v1550_v58 = vshrl.u32 %v1211_v31, 16 }
 0x17b   : > { %1174 = vst.msk [vmem:[#allocation2 + $0xb8] sm:$0xf] %vm626_vm1, %v1003_v26  ;;  %v1230_v47 = vld [vmem:[#allocation2 + $0x98] sm:$0x1]  ;;  %v1535_v49 = vshll.u32 %v1210_v46, 16  ;;  %v1539_v55 = vshrl.u32 %v1210_v46, 16  ;;  %5879 = vmatmul.msk.bf16.vlgmr.msrb.gmra.mxu2 %vm1671_vm8, %v3568_v45  ;;  %v2765_v37 = vsel %vm6497_vm11, %v6904_v39, %v6863_v5  ;;  %v3139_v46 = vunpack.c.l.b16 %v2775_v12 }
 0x17c   : > { %1177 = vst [vmem:[#allocation2 + $0xbc] sm:$0x1] %v1176_v43  ;;  %v2786_v56 = vshll.u32 %v6899_v20, 16  ;;  %v2790_v62 = vshrl.u32 %v6899_v20, 16  ;;  %v1545_v1 = vshll.u32 %v1230_v47, 16  ;;  %v1553_v3 = vshll.u32 %v1211_v31, 16 }
 0x17d   : > { %v6921_v36 = vpop.f32.mrf.mxu0  ;;  %v1537_v53 = vrot.slane %v1535_v49, 5  ;;  %v1541_v0 = vrot.slane %v1539_v55, 4  ;;  %v3433_v38 = vrot.slane %v3431_v42, 4  ;;  %v1559_v4 = vshll.u32 %v1212_v52, 16 }
 0x17e   : > { %v1750_v63 = vpop.f32.mrf.mxu1  ;;  %8781 = vst [vmem:[#allocation16_spill] sm:$0xff] %v6921_v36  ;;  %v1563_v15 = vshrl.u32 %v1212_v52, 16  ;;  %v1973_v19 = vpop.f32.mrf.mxu2  ;;  %v1533_v54 = vrot.slane %v1532_v48, 4  ;;  %v3434_v33 = vrot.slane %v6917_v57, 5  ;;  %v2777_v27 = vshrl.u32 %v2707_v59, 16 }
 0x17f   : > { %v6923_v7 = vadd.f32 %v1970_v18, %v1750_v63  ;;  %v1542_v22 = vor.u32 %v1541_v0, %v1537_v53  ;;  %v1552_v20 = vrot.slane %v1550_v58, 4  ;;  %v2780_v29 = vshll.u32 %v2707_v59, 16  ;;  %v1231_v59 = vld [vmem:[#allocation2 + $0xa4] sm:$0x1]  ;;  %v6947_v0 = vld [vmem:[#allocation2 + $0x28] sm:$0xf] }
 0x180   : > { %5838 = vmatmul.msk.bf16.gmra.mxu0 %vm1671_vm8, %v6090_v11  ;;  %v6927_v21 = vrot.slane %v2786_v56, 5  ;;  %v2792_v35 = vrot.slane %v2790_v62, 4  ;;  %v1538_v18 = vsel %vm6497_vm11, %v1533_v54, %v1537_v53  ;;  %v1547_v51 = vrot.slane %v1545_v1, 5 }
 0x181   : > { %v1543_v34 = vrot.slane %v1542_v22, 4  ;;  %v1555_v41 = vrot.slane %v1553_v3, 5  ;;  %v3435_v26 = vsel %vm6532_vm15, %v3433_v38, %v3434_v33  ;;  %v6937_v43 = vrot.slane %v1559_v4, 5  ;;  %v2710_v22 = vld [vmem:[#allocation2 + $0x24] sm:$0xf] }
 0x182   : > { %v1565_v31 = vrot.slane %v1563_v15, 4  ;;  %v3432_v52 = vsel %vm6532_vm15, %v5863_v44, %v3431_v42  ;;  %v2779_v47 = vrot.slane %v2777_v27, 4  ;;  %v1647_v48 = vunpack.c.l.b16 %v1538_v18 }
 0x183   : > { %v1548_v45 = vsel %vm6497_vm11, %v1543_v34, %v1547_v51  ;;  %v2782_v55 = vrot.slane %v2780_v29, 5  ;;  %v2793_v5 = vor.u32 %v2792_v35, %v6927_v21  ;;  %v3138_v56 = vunpack.c.l.b16 %v2765_v37  ;;  %v6955_v29 = vld [vmem:[#allocation2 + $0x2c] sm:$0x1]  ;;  %v1213_v51 = vld [vmem:[#allocation2 + $0xa8] sm:$0xf] }
 0x184   : > { %v1648_v49 = vunpack.c.l.b16 %v1548_v45  ;;  %v3539_v62 = vunpack.c.l.b16 %v3435_v26  ;;  %v1556_v63 = vor.u32 %v1555_v41, %v1552_v20  ;;  %v2796_v53 = vshll.u32 %v6917_v57, 16  ;;  %v1214_v41 = vld [vmem:[#allocation2 + $0xac] sm:$0xf] }
 0x185   : > { %v6944_v58 = vpop.f32.mrf.mxu0  ;;  %v1566_v42 = vor.u32 %v1565_v31, %v6937_v43  ;;  %v1569_v1 = vshll.u32 %v1231_v59, 16  ;;  %v3170_v11 = vpack.c.b16 %v3139_v46, %v3138_v56  ;;  %v3538_v38 = vunpack.c.l.b16 %v3432_v52 }
 0x186   : > { %v1753_v39 = vpop.f32.mrf.mxu1  ;;  %8782 = vst [vmem:[#allocation17_spill] sm:$0xff] %v6944_v58  ;;  %v1667_v44 = vpack.c.b16 %v1648_v49, %v1647_v48  ;;  %v1975_v3 = vpop.f32.mrf.mxu2  ;;  %v2783_v4 = vor.u32 %v2782_v55, %v2779_v47  ;;  %v2794_v15 = vrot.slane %v2793_v5, 4  ;;  %v3438_v54 = vrot.slane %v6947_v0, 5  ;;  %v6091_v47 = vld [vmem:[#allocation2 + $0x84] sm:$0xff] }
 0x187   : > { %v6949_v12 = vadd.f32 %v1973_v19, %v1753_v39  ;;  %v3569_v57 = vpack.c.b16 %v3539_v62, %v3538_v38  ;;  %v1557_v33 = vrot.slane %v1556_v63, 4  ;;  %v1567_v19 = vrot.slane %v1566_v42, 4  ;;  %v3360_v55 = vld [vmem:[#allocation2 + $0x24] sm:$0xe] }
 0x188   : > { %5647 = vmatmul.msk.bf16.vlgmr.msrb.gmra.mxu3 %vm1671_vm8, %v1667_v44  ;;  %v1571_v27 = vrot.slane %v1569_v1, 5  ;;  %v2798_v20 = vrot.slane %v2796_v53, 5  ;;  %v2784_v35 = vrot.slane %v2783_v4, 4  ;;  %v3440_v34 = vrot.slane %v3438_v54, 4 }
 0x189   : > { %v3441_v31 = vrot.slane %v6955_v29, 5  ;;  %v2801_v45 = vshrl.u32 %v2710_v22, 16  ;;  %v2804_v46 = vshll.u32 %v2710_v22, 16  ;;  %v2810_v52 = vshll.u32 %v6947_v0, 16 }
 0x18a   : > { %5846 = vmatmul.msk.bf16.vlgmr.msrb.gmra.mxu1 %vm1671_vm8, %v3170_v11  ;;  %v2799_v18 = vsel %vm6497_vm11, %v2794_v15, %v2798_v20  ;;  %v1562_v48 = vsel %vm6497_vm11, %v1557_v33, %v6937_v43  ;;  %v1572_v49 = vsel %vm6497_vm11, %v1567_v19, %v1571_v27  ;;  %v2814_v5 = vshrl.u32 %v6947_v0, 16  ;;  %v1232_v27 = vld [vmem:[#allocation2 + $0xb0] sm:$0x1] }
 0x18b   : > { %5880 = vmatmul.msk.bf16.gmra.mxu2 %vm1671_vm8, %v3569_v57  ;;  %v1574_v56 = vshrl.u32 %v1213_v51, 16  ;;  %v1577_v62 = vshll.u32 %v1213_v51, 16  ;;  %v1583_v63 = vshll.u32 %v1214_v41, 16  ;;  %v1587_v53 = vshrl.u32 %v1214_v41, 16 }
 0x18c   : > { %v2789_v44 = vsel %vm6497_vm11, %v2784_v35, %v6927_v21  ;;  %v3141_v42 = vunpack.c.l.b16 %v2799_v18  ;;  %v5864_v1 = vrot.slane %v3360_v55, 9  ;;  %v3442_v43 = vsel %vm6532_vm15, %v3440_v34, %v3441_v31 }
 0x18d   : > { %v6960_v26 = vpop.f32.mrf.mxu0  ;;  %v2806_v11 = vrot.slane %v2804_v46, 5  ;;  %v1649_v38 = vunpack.c.l.b16 %v1562_v48  ;;  %v1650_v0 = vunpack.c.l.b16 %v1572_v49  ;;  %v6978_v4 = vrot.slane %v2810_v52, 5  ;;  %v2713_v46 = vld [vmem:[#allocation2 + $0x30] sm:$0xf] }
 0x18e   : > { %v1755_v37 = vpop.f32.mrf.mxu1  ;;  %8783 = vst [vmem:[#allocation18_spill] sm:$0xff] %v6960_v26  ;;  %v1978_v39 = vpop.f32.mrf.mxu2  ;;  %v2816_v15 = vrot.slane %v2814_v5, 4  ;;  %v1576_v57 = vrot.slane %v1574_v56, 4  ;;  %v1579_v22 = vrot.slane %v1577_v62, 5  ;;  %v6980_v33 = vrot.slane %v1583_v63, 5 }
 0x18f   : > { %v6964_v59 = vadd.f32 %v1975_v3, %v1755_v37  ;;  %v2803_v3 = vrot.slane %v2801_v45, 4  ;;  %v1589_v19 = vrot.slane %v1587_v53, 4  ;;  %v3140_v35 = vunpack.c.l.b16 %v2789_v44  ;;  %v2714_v45 = vld [vmem:[#allocation2 + $0x34] sm:$0xf]  ;;  %v3361_v56 = vld [vmem:[#allocation2 + $0x30] sm:$0xe] }
 0x190   : > { %5839 = vmatmul.msk.bf16.gmra.mxu0 %vm1671_vm8, %v6091_v47  ;;  %v3439_v18 = vsel %vm6532_vm15, %v5864_v1, %v3438_v54  ;;  %v3541_v34 = vunpack.c.l.b16 %v3442_v43  ;;  %v1668_v41 = vpack.c.b16 %v1650_v0, %v1649_v38  ;;  %v2817_v31 = vor.u32 %v2816_v15, %v6978_v4  ;;  %v1215_v62 = vld [vmem:[#allocation2 + $0xb4] sm:$0xf]  ;;  %v1216_v15 = vld [vmem:[#allocation2 + $0xb8] sm:$0xf] }
 0x191   : > { %v2807_v37 = vor.u32 %v2806_v11, %v2803_v3  ;;  %v3171_v47 = vpack.c.b16 %v3141_v42, %v3140_v35  ;;  %v1580_v48 = vor.u32 %v1579_v22, %v1576_v57  ;;  %v1590_v49 = vor.u32 %v1589_v19, %v6980_v33  ;;  %v2715_v42 = vld [vmem:[#allocation2 + $0x38] sm:$0x1] }
 0x192   : > { %v1593_v55 = vshll.u32 %v1232_v27, 16  ;;  %v3540_v5 = vunpack.c.l.b16 %v3439_v18  ;;  %v2820_v54 = vshll.u32 %v6955_v29, 16  ;;  %v2825_v63 = vshrl.u32 %v2713_v46, 16 }
 0x193   : > { %v2828_v53 = vshll.u32 %v2713_v46, 16  ;;  %v2808_v1 = vrot.slane %v2807_v37, 4  ;;  %v2818_v43 = vrot.slane %v2817_v31, 4  ;;  %v2834_v3 = vshll.u32 %v2714_v45, 16  ;;  %v6092_v46 = vld [vmem:[#allocation2 + $0x90] sm:$0xff] }
 0x194   : > { %v3570_v44 = vpack.c.b16 %v3541_v34, %v3540_v5  ;;  %v1581_v11 = vrot.slane %v1580_v48, 4  ;;  %v1591_v38 = vrot.slane %v1590_v49, 4  ;;  %v1595_v0 = vrot.slane %v1593_v55, 5 }
 0x195   : > { %v6982_v21 = vpop.f32.mrf.mxu0  ;;  %v2838_v57 = vshrl.u32 %v2714_v45, 16  ;;  %v2822_v29 = vrot.slane %v2820_v54, 5  ;;  %v5865_v22 = vrot.slane %v3361_v56, 9  ;;  %v1598_v19 = vshrl.u32 %v1215_v62, 16 }
 0x196   : > { %v1758_v20 = vpop.f32.mrf.mxu1  ;;  %8784 = vst [vmem:[#allocation19_spill] sm:$0xff] %v6982_v21  ;;  %v1980_v52 = vpop.f32.mrf.mxu2  ;;  %v1601_v27 = vshll.u32 %v1215_v62, 16  ;;  %v3448_v34 = vrot.slane %v2715_v42, 5  ;;  %v2830_v37 = vrot.slane %v2828_v53, 5  ;;  %v1611_v48 = vshrl.u32 %v1216_v15, 16 }
 0x197   : > { %v6986_v51 = vadd.f32 %v1978_v39, %v1758_v20  ;;  %v3445_v39 = vrot.slane %v2714_v45, 5  ;;  %v6998_v49 = vrot.slane %v2834_v3, 5  ;;  %v686_v45 = vld [vmem:[#allocation2 + $0xc0] sm:$0x1]  ;;  %v1586_v5 = vsel %vm6497_vm11, %v1581_v11, %v6980_v33 }
 0x198   : > { %5648 = vmatmul.msk.bf16.gmra.mxu3 %vm1671_vm8, %v1668_v41  ;;  %v2827_v41 = vrot.slane %v2825_v63, 4  ;;  %v1596_v54 = vsel %vm6497_vm11, %v1591_v38, %v1595_v0  ;;  %v2840_v56 = vrot.slane %v2838_v57, 4  ;;  %v687_v62 = vsel %vm6464_vm4, 0, %v686_v45  ;;  %v7017_v0 = vld [vmem:[#allocation2 + $0x3c] sm:$0xe] }
 0x199   : > { %8785 = vst [vmem:[#allocation20_spill] sm:$0xff] %v6986_v51  ;;  %v3447_v18 = vrot.slane %v3445_v39, 4  ;;  %v2823_v63 = vsel %vm6497_vm11, %v2818_v43, %v2822_v29  ;;  %v1600_v53 = vrot.slane %v1598_v19, 4  ;;  %v3446_v33 = vsel %vm6532_vm15, %v5865_v22, %v3445_v39  ;;  %v557_v43 = vpop.f32.mrf.mxu3  ;;  %v6172_v22 = vld [vmem:[%s8744_s2] ss:$0 sm:$0xff] }
 0x19a   : > { %5847 = vmatmul.msk.bf16.gmra.mxu1 %vm1671_vm8, %v3171_v47  ;;  %v1607_v47 = vshll.u32 %v1216_v15, 16  ;;  %688 = vst [vmem:[#allocation2 + $0xc0] sm:$0x1] %v687_v62  ;;  %v2831_v11 = vor.u32 %v2830_v37, %v2827_v41  ;;  %v2844_v38 = vshll.u32 %v2715_v42, 16  ;;  %v1651_v15 = vunpack.c.l.b16 %v1586_v5  ;;  %v7042_v37 = vld [vmem:[#allocation2 + $0x20] sm:$0x1] }
 0x19b   : > { %5881 = vmatmul.msk.bf16.gmra.mxu2 %vm1671_vm8, %v3570_v44  ;;  %v1603_v44 = vrot.slane %v1601_v27, 5  ;;  %v3449_v3 = vsel %vm6532_vm15, %v3447_v18, %v3448_v34  ;;  %v1652_v57 = vunpack.c.l.b16 %v1596_v54  ;;  %v3143_v19 = vunpack.c.l.b16 %v2823_v63  ;;  %v1233_v27 = vld [vmem:[#allocation2 + $0xbc] sm:$0x1]  ;;  %v4698_v5 = vld [vmem:[#allocation2 + $0x24] sm:$0xe] }
 0x19c   : > { %v2841_v39 = vor.u32 %v2840_v56, %v6998_v49  ;;  %v558_v42 = vadd.f32 %v6172_v22, %v557_v43  ;;  %v3542_v18 = vunpack.c.l.b16 %v3446_v33  ;;  %v3543_v34 = vunpack.c.l.b16 %v3449_v3  ;;  %v7035_v56 = vld [vmem:[#allocation2 + $0x1c] sm:$0xf]  ;;  %v4697_v33 = vld [vmem:[#allocation2 + $0x18] sm:$0xe]  ;;  %v7718_v51 = vld [vmem:[#allocation2 + $0x48] sm:$0xe] }
 0x19d   : > { %v6994_v35 = vpop.f32.mrf.mxu0  ;;  %v1604_v41 = vor.u32 %v1603_v44, %v1600_v53  ;;  %v7032_v45 = vrot.slane %v2844_v38, 5  ;;  %v1617_v53 = vshll.u32 %v1233_v27, 16  ;;  %v742_v44 = vld [vmem:[#allocation2 + $0xc8] sm:$0x1]  ;;  %v8794_v2 = vrot.slane %v7017_v0, 9 }
 0x19e   : > { %v1760_v20 = vpop.f32.mrf.mxu1  ;;  %8786 = vst [vmem:[#allocation21_spill] sm:$0xff] %v6994_v35  ;;  %v1983_v55 = vpop.f32.mrf.mxu2  ;;  %v592_v54 = vmax.f32 %v558_v42, 0.0  ;;  %v2842_v61 = vrot.slane %v2841_v39, 4  ;;  %v743_v38 = vsel %vm6473_vm6, 0, %v742_v44  ;;  %v7044_v42 = vld [vmem:[#allocation2 + $0x28] sm:$0xf] }
 0x19f   : > { %v6996_v31 = vadd.f32 %v1980_v52, %v1760_v20  ;;  %v2813_v52 = vsel %vm6497_vm11, %v2808_v1, %v6978_v4  ;;  %v7019_v20 = vrot.slane %v1607_v47, 5  ;;  %v1613_v4 = vrot.slane %v1611_v48, 4  ;;  %v7021_v1 = vld [vmem:[#allocation2 + $0x40] sm:$0xf]  ;;  %744 = vst [vmem:[#allocation2 + $0xc8] sm:$0x1] %v743_v38 }
 0x1a0   : > { %5840 = vmatmul.msk.bf16.gmra.mxu0 %vm1671_vm8, %v6092_v46  ;;  %v3142_v29 = vunpack.c.l.b16 %v2813_v52  ;;  %v7030_v48 = vrot.slane %v2831_v11, 4  ;;  %v1669_v52 = vpack.c.b16 %v1652_v57, %v1651_v15  ;;  %v624_v11 = vpack.c.bf16 %v592_v54, %v592_v54 }
 0x1a1   : > { %8787 = vst [vmem:[#allocation22_spill] sm:$0xff] %v6996_v31  ;;  %v1614_v63 = vor.u32 %v1613_v4, %v7019_v20  ;;  %v1605_v15 = vrot.slane %v1604_v41, 4  ;;  %v5747_v4 = vld [vmem:[%s8745_s3 + $0x4] sm:$0x3]  ;;  %v559_v54 = vpop.f32.mrf.mxu3  ;;  %v4766_v44 = vrot.slane %v7042_v37, 5  ;;  %v4770_v14 = vrot.slane %v7044_v42, 5 }
 0x1a2   : > { %v3172_v43 = vpack.c.b16 %v3143_v19, %v3142_v29  ;;  %v4763_v29 = vrot.slane %v7035_v56, 5  ;;  %v7056_v19 = vld [vmem:[#allocation2 + $0x44] sm:$0x1]  ;;  %v1006_v27 = vshrl.u32 %v624_v11, 16  ;;  %v1009_v39 = vshll.u32 %v624_v11, 16 }
 0x1a3   : > { %v1615_v41 = vrot.slane %v1614_v63, 4  ;;  %v560_v57 = vadd.f32 %v6172_v22, %v559_v54  ;;  %v2847_v63 = vsel %vm6497_vm11, %v2842_v61, %v7032_v45  ;;  %v3455_v11 = vrot.slane %v7056_v19, 5  ;;  %v7081_v45 = vld [vmem:[#allocation2 + $0x2c] sm:$0x1] }
 0x1a4   : > { %v7060_v38 = vrot.slane %v1006_v27, 7  ;;  %v2858_v61 = vshll.u32 %v7021_v1, 16  ;;  %v2868_v25 = vshll.u32 %v7056_v19, 16 }
 0x1a5   : > { %v7028_v47 = vpop.f32.mrf.mxu0 }
 0x1a6   : > { %v1763_v46 = vpop.f32.mrf.mxu1  ;;  %8788 = vst [vmem:[#allocation23_spill] sm:$0xff] %v7028_v47  ;;  %v1985_v3 = vpop.f32.mrf.mxu2  ;;  %v1182_v0 = vld [vmem:[#allocation2 + $0xc8] sm:$0x1] }
 0x1a7   : > { %v7037_v62 = vadd.f32 %v1983_v55, %v1763_v46  ;;  %v3571_v55 = vpack.c.b16 %v3543_v34, %v3542_v18  ;;  %v2295_v18 = vsel %vm1720_vm7, %v5747_v4, 0  ;;  %v5993_v34 = vrot.slane %v4697_v33, 9  ;;  %v1178_v4 = vld [vmem:[#allocation2 + $0xc0] sm:$0xf] }
 0x1a8   : > { %5649 = vmatmul.msk.bf16.gmra.mxu3 %vm1671_vm8, %v1669_v52  ;;  %v1619_v46 = vrot.slane %v1617_v53, 5  ;;  %v4765_v52 = vrot.slane %v4763_v29, 4  ;;  %v8790_v53 = vrot.slane %v7021_v1, 5 }
 0x1a9   : > { %8789 = vst [vmem:[#allocation24_spill] sm:$0xff] %v7037_v62  ;;  %2304 = vmatpush.bf16.msrb.mxu3 %v2295_v18  ;;  %v1011_v18 = vor.u32 %v1009_v39, %v7060_v38  ;;  %v4772_v39 = vrot.slane %v4770_v14, 4  ;;  %v7496_v62 = vld [vmem:[#allocation2 + $0x70] sm:$0xf] }
 0x1aa   : > { %5848 = vmatmul.msk.bf16.gmra.mxu1 %vm1671_vm8, %v3172_v43  ;;  %v4764_v43 = vsel %vm6532_vm15, %v5993_v34, %v4763_v29  ;;  %v3454_v33 = vrot.slane %v8790_v53, 4  ;;  %v4767_v22 = vsel %vm6532_vm15, %v4765_v52, %v4766_v44  ;;  %v593_v34 = vmax.f32 %v560_v57, 0.0  ;;  %v6093_v53 = vld [vmem:[#allocation2 + $0x9c] sm:$0xff] }
 0x1ab   : > { %5882 = vmatmul.msk.bf16.gmra.mxu2 %vm1671_vm8, %v3571_v55  ;;  %v1610_v55 = vsel %vm6497_vm11, %v1605_v15, %v7019_v20  ;;  %v4875_v47 = vunpack.c.l.b16 %v4764_v43  ;;  %v4876_v35 = vunpack.c.l.b16 %v4767_v22  ;;  %v5994_v52 = vrot.slane %v4698_v5, 9 }
 0x1ac   : > { %v1179_v20 = vsel %vm6525_vm14, %v1011_v18, %v1178_v4  ;;  %v625_v15 = vpack.c.bf16 %v593_v34, %v593_v34  ;;  %v2862_v57 = vshrl.u32 %v7021_v1, 16  ;;  %v4773_v5 = vrot.slane %v7081_v45, 5  ;;  %v2716_v18 = vld [vmem:[#allocation2 + $0x3c] sm:$0xf] }
 0x1ad   : > { %v7074_v29 = vpop.f32.mrf.mxu0  ;;  %1180 = vst [vmem:[#allocation2 + $0xc0] sm:$0xf] %v1179_v20  ;;  %v4771_v43 = vsel %vm6532_vm15, %v5994_v52, %v4770_v14  ;;  %v3145_v22 = vunpack.c.l.b16 %v2847_v63  ;;  %v1653_v34 = vunpack.c.l.b16 %v1610_v55  ;;  %v2849_v20 = vshrl.u32 %v2716_v18, 16 }
 0x1ae   : > { %v1765_v27 = vpop.f32.mrf.mxu1  ;;  %8791 = vst [vmem:[#allocation25_spill] sm:$0xff] %v7074_v29  ;;  %v1988_v44 = vpop.f32.mrf.mxu2  ;;  %v1620_v29 = vsel %vm6497_vm11, %v1615_v41, %v1619_v46  ;;  %v8793_v41 = vrot.slane %v7021_v1, 5  ;;  %v1014_v4 = vshrl.u32 %v625_v15, 16  ;;  %v4774_v14 = vsel %vm6532_vm15, %v4772_v39, %v4773_v5 }
 0x1af   : > { %v7083_v54 = vadd.f32 %v1985_v3, %v1765_v27  ;;  %v7091_v3 = vpack.c.b16 %v4876_v35, %v4875_v47  ;;  %v1017_v27 = vshll.u32 %v625_v15, 16  ;;  %v3456_v35 = vsel %vm6532_vm15, %v3454_v33, %v3455_v11 }
 0x1b0   : > { %5841 = vmatmul.msk.bf16.gmra.mxu0 %vm1671_vm8, %v6093_v53  ;;  %v3453_v46 = vsel %vm6532_vm15, %v8794_v2, %v8793_v41  ;;  %v1654_v53 = vunpack.c.l.b16 %v1620_v29  ;;  %v1012_v47 = vrot.slane %v7060_v38, 4  ;;  %v1016_v63 = vrot.slane %v1014_v4, 7  ;;  %v7118_v4 = vld [vmem:[#allocation2 + $0x34] sm:$0xf] }
 0x1b1   : > { %8792 = vst [vmem:[#allocation26_spill] sm:$0xff] %v7083_v54  ;;  %v4877_v1 = vunpack.c.l.b16 %v4771_v43  ;;  %v4878_v52 = vunpack.c.l.b16 %v4774_v14  ;;  %v2852_v21 = vshll.u32 %v2716_v18, 16  ;;  %v7107_v41 = vrot.slane %v2858_v61, 5  ;;  %v4699_v61 = vld [vmem:[#allocation2 + $0x30] sm:$0xe] }
 0x1b2   : > { %v2864_v15 = vrot.slane %v2862_v57, 4  ;;  %v8795_v33 = vsel %vm6497_vm11, %v7030_v48, %v6998_v49  ;;  %v1019_v29 = vor.u32 %v1017_v27, %v1016_v63  ;;  %v1021_v55 = vrot.slane %v1016_v63, 4  ;;  %v2720_v48 = vld [vmem:[#allocation2 + $0x4c] sm:$0xf]  ;;  %v7404_v54 = vld [vmem:[#allocation2 + $0x68] sm:$0x1] }
 0x1b3   : > { %v3144_v11 = vunpack.c.l.b16 %v8795_v33  ;;  %v7114_v39 = vpack.c.b16 %v4878_v52, %v4877_v1  ;;  %v1670_v43 = vpack.c.b16 %v1654_v53, %v1653_v34  ;;  %v3545_v5 = vunpack.c.l.b16 %v3456_v35  ;;  %v7129_v35 = vld [vmem:[#allocation2 + $0x38] sm:$0x1] }
 0x1b4   : > { %v1020_v26 = vsel %vm6550_vm5, %v1012_v47, %v1019_v29  ;;  %v1183_v49 = vsel %vm6464_vm4, %v1021_v55, %v1182_v0  ;;  %v2851_v27 = vrot.slane %v2849_v20, 4  ;;  %v2854_v34 = vrot.slane %v2852_v21, 5  ;;  %v2721_v29 = vld [vmem:[#allocation2 + $0x50] sm:$0x1]  ;;  %v2719_v55 = vld [vmem:[#allocation2 + $0x48] sm:$0xf] }
 0x1b5   : > { %v7120_v18 = vpop.f32.mrf.mxu0  ;;  %v3173_v14 = vpack.c.b16 %v3145_v22, %v3144_v11  ;;  %1181 = vst.msk [vmem:[#allocation2 + $0xc4] sm:$0xf] %vm626_vm1, %v1020_v26  ;;  %v2865_v53 = vor.u32 %v2864_v15, %v7107_v41  ;;  %v5995_v22 = vrot.slane %v4699_v61, 9  ;;  %v4777_v47 = vrot.slane %v7118_v4, 5  ;;  %v6094_v11 = vld [vmem:[#allocation2 + $0xa8] sm:$0xff] }
 0x1b6   : > { %v1768_v2 = vpop.f32.mrf.mxu1  ;;  %8797 = vst [vmem:[#allocation28_spill] sm:$0xff] %v7120_v18  ;;  %v1990_v57 = vpop.f32.mrf.mxu2  ;;  %v3459_v1 = vrot.slane %v2720_v48, 5  ;;  %v4780_v21 = vrot.slane %v7129_v35, 5  ;;  %v2855_v52 = vor.u32 %v2854_v34, %v2851_v27  ;;  %v2870_v15 = vrot.slane %v2868_v25, 5  ;;  %v3363_v34 = vld [vmem:[#allocation2 + $0x48] sm:$0xe] }
 0x1b7   : > { %v7116_v38 = vadd.f32 %v1988_v44, %v1768_v2  ;;  %v3544_v44 = vunpack.c.l.b16 %v3453_v46  ;;  %1184 = vst [vmem:[#allocation2 + $0xc8] sm:$0x1] %v1183_v49  ;;  %v4778_v46 = vsel %vm6532_vm15, %v5995_v22, %v4777_v47  ;;  %v4779_v26 = vrot.slane %v4777_v47, 4  ;;  %v7188_v18 = vld [vmem:[#allocation2 + $0x64] sm:$0xf] }
 0x1b8   : > { %5650 = vmatmul.msk.bf16.gmra.mxu3 %vm1671_vm8, %v1670_v43  ;;  %v2866_v0 = vrot.slane %v2865_v53, 4  ;;  %v2882_v2 = vshll.u32 %v2720_v48, 16  ;;  %v2886_v43 = vshrl.u32 %v2720_v48, 16  ;;  %v3461_v49 = vrot.slane %v3459_v1, 4 }
 0x1b9   : > { %8796 = vst [vmem:[#allocation27_spill] sm:$0xff] %v7116_v38  ;;  %v3572_v63 = vpack.c.b16 %v3545_v5, %v3544_v44  ;;  %v4781_v19 = vsel %vm6532_vm15, %v4779_v26, %v4780_v21  ;;  %v4879_v5 = vunpack.c.l.b16 %v4778_v46  ;;  %v2856_v44 = vrot.slane %v2855_v52, 4 }
 0x1ba   : > { %5849 = vmatmul.msk.bf16.gmra.mxu1 %vm1671_vm8, %v3173_v14  ;;  %v4880_v61 = vunpack.c.l.b16 %v4781_v19  ;;  %v2871_v27 = vsel %vm6497_vm11, %v2866_v0, %v2870_v15  ;;  %v2873_v22 = vshrl.u32 %v2719_v55, 16  ;;  %v2876_v47 = vshll.u32 %v2719_v55, 16 }
 0x1bb   : > { %5883 = vmatmul.msk.bf16.gmra.mxu2 %vm1671_vm8, %v3572_v63  ;;  %v2861_v48 = vsel %vm6497_vm11, %v2856_v44, %v7107_v41  ;;  %v7152_v63 = vrot.slane %v2882_v2, 5  ;;  %v2888_v46 = vrot.slane %v2886_v43, 4  ;;  %v3147_v26 = vunpack.c.l.b16 %v2871_v27 }
 0x1bc   : > { %v7145_v53 = vpack.c.b16 %v4880_v61, %v4879_v5  ;;  %v5867_v21 = vrot.slane %v3363_v34, 9  ;;  %v2875_v19 = vrot.slane %v2873_v22, 4  ;;  %v6077_v5 = vld [vmem:[#allocation2 + $0x90] sm:$0xff]  ;;  %v2878_v41 = vrot.slane %v2876_v47, 5  ;;  %v7162_v34 = vld [vmem:[#allocation2 + $0x40] sm:$0xf] }
 0x1bd   : > { %v7147_v25 = vpop.f32.mrf.mxu0  ;;  %v2889_v2 = vor.u32 %v2888_v46, %v7152_v63  ;;  %v2892_v44 = vshll.u32 %v2721_v29, 16  ;;  %v4784_v47 = vrot.slane %v7162_v34, 5 }
 0x1be   : > { %v1770_v20 = vpop.f32.mrf.mxu1  ;;  %v1993_v14 = vpop.f32.mrf.mxu2  ;;  %8799 = vst [vmem:[#allocation30_spill] sm:$0xff] %v7147_v25  ;;  %v3460_v15 = vsel %vm6532_vm15, %v5867_v21, %v3459_v1 }
 0x1bf   : > { %v7140_v33 = vadd.f32 %v1990_v57, %v1770_v20  ;;  %v3462_v57 = vrot.slane %v2721_v29, 5  ;;  %v3146_v20 = vunpack.c.l.b16 %v2861_v48  ;;  %v3546_v27 = vunpack.c.l.b16 %v3460_v15  ;;  %v7165_v48 = vld [vmem:[#allocation2 + $0x44] sm:$0x1]  ;;  %v2722_v29 = vld [vmem:[#allocation2 + $0x54] sm:$0xf] }
 0x1c0   : > { %5842 = vmatmul.msk.bf16.gmra.mxu0 %vm1671_vm8, %v6094_v11  ;;  %v2890_v22 = vrot.slane %v2889_v2, 4  ;;  %v4786_v15 = vrot.slane %v4784_v47, 4 }
 0x1c1   : > { %8798 = vst [vmem:[#allocation29_spill] sm:$0xff] %v7140_v33  ;;  %v3463_v52 = vsel %vm6532_vm15, %v3461_v49, %v3462_v57  ;;  %v3174_v43 = vpack.c.b16 %v3147_v26, %v3146_v20  ;;  %v2723_v49 = vld [vmem:[#allocation2 + $0x58] sm:$0xf]  ;;  %v4700_v57 = vld [vmem:[#allocation2 + $0x3c] sm:$0xe] }
 0x1c2   : > { %v3547_v61 = vunpack.c.l.b16 %v3463_v52  ;;  %v3466_v26 = vrot.slane %v2723_v49, 5  ;;  %v5996_v21 = vrot.slane %v4700_v57, 9  ;;  %v2894_v52 = vrot.slane %v2892_v44, 5 }
 0x1c3   : > { %v2910_v44 = vshrl.u32 %v2723_v49, 16 }
 0x1c4   : > { %v3573_v1 = vpack.c.b16 %v3547_v61, %v3546_v27  ;;  %v4785_v20 = vsel %vm6532_vm15, %v5996_v21, %v4784_v47  ;;  %v6095_v61 = vld [vmem:[#allocation2 + $0xb4] sm:$0xff]  ;;  %v2895_v2 = vsel %vm6497_vm11, %v2890_v22, %v2894_v52  ;;  %v2897_v27 = vshrl.u32 %v2722_v29, 16  ;;  %v5976_v21 = vld [vmem:[%s8745_s3 + $0xe] sm:$0x3] }
 0x1c5   : > { %v7168_v46 = vpop.f32.mrf.mxu0  ;;  %v3468_v9 = vrot.slane %v3466_v26, 4  ;;  %v4881_v22 = vunpack.c.l.b16 %v4785_v20  ;;  %v3149_v25 = vunpack.c.l.b16 %v2895_v2  ;;  %v4043_v2 = vld [vmem:[#allocation2 + $0x18] sm:$0xf] }
 0x1c6   : > { %v1773_v0 = vpop.f32.mrf.mxu1  ;;  %v1995_v55 = vpop.f32.mrf.mxu2  ;;  %8801 = vst [vmem:[#allocation32_spill] sm:$0xff] %v7168_v46  ;;  %v2899_v20 = vrot.slane %v2897_v27, 4 }
 0x1c7   : > { %v7158_v11 = vadd.f32 %v1993_v14, %v1773_v0  ;;  %v2879_v14 = vor.u32 %v2878_v41, %v2875_v19  ;;  %v4787_v19 = vrot.slane %v7165_v48, 5 }
 0x1c8   : > { %5727 = vmatmul.msk.bf16.vlgmr.msra.gmra.mxu3 %vm1671_vm8, %v6077_v5 }
 0x1c9   : > { %8800 = vst [vmem:[#allocation31_spill] sm:$0xff] %v7158_v11  ;;  %v2880_v41 = vrot.slane %v2879_v14, 4  ;;  %v4788_v47 = vsel %vm6532_vm15, %v4786_v15, %v4787_v19  ;;  %v2900_v14 = vshll.u32 %v2722_v29, 16 }
 0x1ca   : > { %5850 = vmatmul.msk.bf16.gmra.mxu1 %vm1671_vm8, %v3174_v43  ;;  %v2724_v43 = vld [vmem:[#allocation2 + $0x5c] sm:$0x1]  ;;  %v4882_v52 = vunpack.c.l.b16 %v4788_v47 }
 0x1cb   : > { %5884 = vmatmul.msk.bf16.gmra.mxu2 %vm1671_vm8, %v3573_v1  ;;  %v2906_v1 = vshll.u32 %v2723_v49, 16  ;;  %v3469_v46 = vrot.slane %v2724_v43, 5  ;;  %v2885_v49 = vsel %vm6497_vm11, %v2880_v41, %v7152_v63  ;;  %v3473_v41 = vrot.slane %v7188_v18, 5 }
 0x1cc   : > { %v7190_v58 = vpack.c.b16 %v4882_v52, %v4881_v22  ;;  %v3148_v36 = vunpack.c.l.b16 %v2885_v49 }
 0x1cd   : > { %v3470_v19 = vsel %vm6532_vm15, %v3468_v9, %v3469_v46  ;;  %v7194_v29 = vrot.slane %v2906_v1, 5  ;;  %v7196_v47 = vpop.f32.mrf.mxu0  ;;  %v4101_v9 = vshll.u32 %v7035_v56, 16  ;;  %v4105_v46 = vshrl.u32 %v7035_v56, 16 }
 0x1ce   : > { %v1775_v0 = vpop.f32.mrf.mxu1  ;;  %v1998_v57 = vpop.f32.mrf.mxu2  ;;  %8803 = vst [vmem:[#allocation34_spill] sm:$0xff] %v7196_v47  ;;  %v3549_v52 = vunpack.c.l.b16 %v3470_v19  ;;  %v3175_v1 = vpack.c.b16 %v3149_v25, %v3148_v36  ;;  %v4095_v19 = vshll.u32 %v4043_v2, 16 }
 0x1cf   : > { %v7174_v5 = vadd.f32 %v1995_v55, %v1775_v0  ;;  %v3364_v55 = vld [vmem:[#allocation2 + $0x54] sm:$0xe]  ;;  %v4574_v0 = vsel %vm1720_vm7, %v5976_v21, 0  ;;  %v2902_v21 = vrot.slane %v2900_v14, 5  ;;  %v7210_v32 = vrot.slane %v4101_v9, 5 }
 0x1d0   : > { %5843 = vmatmul.msk.bf16.gmra.mxu0 %vm1671_vm8, %v6095_v61  ;;  %v5868_v15 = vrot.slane %v3364_v55, 9  ;;  %v2912_v61 = vrot.slane %v2910_v44, 4  ;;  %v6078_v55 = vld [vmem:[#allocation2 + $0x9c] sm:$0xff]  ;;  %v4107_v56 = vrot.slane %v4105_v46, 4 }
 0x1d1   : > { %8802 = vst [vmem:[#allocation33_spill] sm:$0xff] %v7174_v5  ;;  %4583 = vmatpush.bf16.msra.mxu0 %v4574_v0  ;;  %v2903_v49 = vor.u32 %v2902_v21, %v2899_v20  ;;  %v2725_v46 = vld [vmem:[#allocation2 + $0x60] sm:$0xf] }
 0x1d2   : > { %v3467_v63 = vsel %vm6532_vm15, %v5868_v15, %v3466_v26  ;;  %v2913_v44 = vor.u32 %v2912_v61, %v7194_v29  ;;  %v7207_v26 = vld [vmem:[#allocation2 + $0x68] sm:$0x1]  ;;  %v4092_v15 = vshrl.u32 %v4043_v2, 16  ;;  %v6096_v61 = vld [vmem:[#allocation2 + $0xc0] sm:$0xff]  ;;  %v4097_v2 = vrot.slane %v4095_v19, 5 }
 0x1d3   : > { %v3548_v14 = vunpack.c.l.b16 %v3467_v63  ;;  %v3476_v25 = vrot.slane %v7207_v26, 5  ;;  %v2904_v20 = vrot.slane %v2903_v49, 4  ;;  %v4046_v63 = vld [vmem:[#allocation2 + $0x24] sm:$0xf]  ;;  %v4108_v9 = vor.u32 %v4107_v56, %v7210_v32 }
 0x1d4   : > { %v2914_v36 = vrot.slane %v2913_v44, 4  ;;  %v4094_v21 = vrot.slane %v4092_v15, 4  ;;  %v2930_v44 = vshll.u32 %v7188_v18, 16  ;;  %v4111_v15 = vshll.u32 %v7042_v37, 16 }
 0x1d5   : > { %v3574_v47 = vpack.c.b16 %v3549_v52, %v3548_v14  ;;  %v7221_v14 = vpop.f32.mrf.mxu0  ;;  %v2909_v49 = vsel %vm6497_vm11, %v2904_v20, %v7194_v29  ;;  %v4119_v19 = vshll.u32 %v4046_v63, 16  ;;  %v4129_v56 = vshrl.u32 %v7044_v42, 16 }
 0x1d6   : > { %v1778_v0 = vpop.f32.mrf.mxu1  ;;  %v2000_v27 = vpop.f32.mrf.mxu2  ;;  %8806 = vst [vmem:[#allocation37_spill] sm:$0xff] %v7221_v14  ;;  %v2921_v29 = vshrl.u32 %v2725_v46, 16  ;;  %v2924_v20 = vshll.u32 %v2725_v46, 16  ;;  %v7234_v14 = vld [vmem:[#allocation2 + $0x4c] sm:$0xf]  ;;  %v4109_v37 = vrot.slane %v4108_v9, 4 }
 0x1d7   : > { %v7201_v22 = vadd.f32 %v1998_v57, %v1778_v0  ;;  %v2916_v57 = vshll.u32 %v2724_v43, 16  ;;  %v3475_v0 = vrot.slane %v3473_v41, 4  ;;  %v4131_v5 = vrot.slane %v4129_v56, 4  ;;  %v6079_v9 = vld [vmem:[#allocation2 + $0xa8] sm:$0xff] }
 0x1d8   : > { %5728 = vmatmul.msk.bf16.gmra.mxu3 %vm1671_vm8, %v6078_v55  ;;  %v2926_v46 = vrot.slane %v2924_v20, 5  ;;  %v5895_v20 = vld [vmem:[%s8745_s3 + $0xc] sm:$0x3] }
 0x1d9   : > { %8804 = vst [vmem:[#allocation35_spill] sm:$0xff] %v7201_v22  ;;  %v2918_v60 = vrot.slane %v2916_v57, 5  ;;  %v3477_v43 = vsel %vm6532_vm15, %v3475_v0, %v3476_v25  ;;  %v4113_v22 = vrot.slane %v4111_v15, 5  ;;  %v2033_v15 = vld [vmem:[#allocation2] sm:$0xe] }
 0x1da   : > { %5851 = vmatmul.msk.bf16.gmra.mxu1 %vm1671_vm8, %v3175_v1  ;;  %v5869_v1 = vrot.slane %v3365_v50, 9  ;;  %v3551_v25 = vunpack.c.l.b16 %v3477_v43  ;;  %v5731_v56 = vrot.slane %v2033_v15, 9 }
 0x1db   : > { %5885 = vmatmul.msk.bf16.gmra.mxu2 %vm1671_vm8, %v3574_v47  ;;  %v2934_v47 = vshrl.u32 %v7188_v18, 16  ;;  %v2919_v50 = vsel %vm6497_vm11, %v2914_v36, %v2918_v60  ;;  %v4125_v18 = vshll.u32 %v7044_v42, 16  ;;  %v7236_v36 = vrot.slane %v2930_v44, 5 }
 0x1dc   : > { %v3474_v0 = vsel %vm6532_vm15, %v5869_v1, %v3473_v41  ;;  %v3151_v60 = vunpack.c.l.b16 %v2919_v50  ;;  %v4791_v42 = vrot.slane %v7234_v14, 5 }
 0x1dd   : > { %v2936_v8 = vrot.slane %v2934_v47, 4  ;;  %v7238_v1 = vrot.slane %v4125_v18, 5  ;;  %v4114_v47 = vsel %vm6497_vm11, %v4109_v37, %v4113_v22  ;;  %v4135_v18 = vshll.u32 %v7081_v45, 16 }
 0x1de   : > { %v1780_v55 = vpop.f32.mrf.mxu1  ;;  %v2003_v57 = vpop.f32.mrf.mxu2  ;;  %v2940_v22 = vshll.u32 %v7207_v26, 16  ;;  %v4049_v26 = vld [vmem:[#allocation2 + $0x30] sm:$0xf] }
 0x1df   : > { %v7216_v52 = vadd.f32 %v2000_v27, %v1780_v55  ;;  %v4116_v27 = vshrl.u32 %v4046_v63, 16  ;;  %v4098_v55 = vor.u32 %v4097_v2, %v4094_v21  ;;  %v4121_v63 = vrot.slane %v4119_v19, 5  ;;  %v7252_v19 = vld [vmem:[#allocation2 + $0x70] sm:$0xf] }
 0x1e0   : > { %5844 = vmatmul.msk.bf16.gmra.mxu0 %vm1671_vm8, %v6096_v61  ;;  %v3150_v61 = vunpack.c.l.b16 %v2909_v49  ;;  %v2199_v21 = vunpack.c.l.b16 %v6538_v10  ;;  %v2923_v2 = vrot.slane %v2921_v29, 4  ;;  %v2937_v49 = vor.u32 %v2936_v8, %v7236_v36 }
 0x1e1   : > { %8805 = vst [vmem:[#allocation36_spill] sm:$0xff] %v7216_v52  ;;  %v3550_v52 = vunpack.c.l.b16 %v3474_v0  ;;  %v4118_v41 = vrot.slane %v4116_v27, 4  ;;  %v4099_v43 = vrot.slane %v4098_v55, 4  ;;  %v7245_v27 = vld [vmem:[#allocation2 + $0x50] sm:$0x1]  ;;  %v4132_v8 = vor.u32 %v4131_v5, %v7238_v1  ;;  %v7258_v55 = vpop.f32.mrf.mxu0 }
 0x1e2   : > { %v3176_v44 = vpack.c.b16 %v3151_v60, %v3150_v61  ;;  %8808 = vst [vmem:[#allocation39_spill] sm:$0xff] %v7258_v55  ;;  %v2927_v29 = vor.u32 %v2926_v46, %v2923_v2  ;;  %v4794_v60 = vrot.slane %v7245_v27, 5  ;;  %v2938_v37 = vrot.slane %v2937_v49, 4 }
 0x1e3   : > { %v3575_v11 = vpack.c.b16 %v3551_v25, %v3550_v52  ;;  %v4104_v10 = vsel %vm6497_vm11, %v4099_v43, %v7210_v32  ;;  %v4122_v52 = vor.u32 %v4121_v63, %v4118_v41  ;;  %v4793_v25 = vrot.slane %v4791_v42, 4  ;;  %v4701_v43 = vld [vmem:[#allocation2 + $0x48] sm:$0xe] }
 0x1e4   : > { %v8809_v32 = vrot.slane %v6489_v24, 5  ;;  %v3480_v61 = vrot.slane %v7252_v19, 5  ;;  %v3920_v63 = vsel %vm1720_vm7, %v5895_v20, 0  ;;  %v4477_v2 = vunpack.c.l.b16 %v4104_v10  ;;  %v7280_v20 = vld [vmem:[#allocation2 + $0x74] sm:$0x1] }
 0x1e5   : > { %3929 = vmatpush.bf16.msra.mxu3 %v3920_v63  ;;  %v4795_v24 = vsel %vm6532_vm15, %v4793_v25, %v4794_v60  ;;  %v2942_v46 = vrot.slane %v2940_v22, 5  ;;  %v7276_v49 = vrot.slane %v4122_v52, 4  ;;  %v4137_v15 = vrot.slane %v4135_v18, 5  ;;  %v3366_v52 = vld [vmem:[#allocation2 + $0x6c] sm:$0xe] }
 0x1e6   : > { %v2087_v45 = vsel %vm6532_vm15, %v5731_v56, %v8809_v32  ;;  %v2005_v5 = vpop.f32.mrf.mxu2  ;;  %v5997_v56 = vrot.slane %v4701_v43, 9  ;;  %v3482_v25 = vrot.slane %v3480_v61, 4  ;;  %v4133_v60 = vrot.slane %v4132_v8, 4 }
 0x1e7   : > { %v1783_v50 = vpop.f32.mrf.mxu1  ;;  %v2198_v41 = vunpack.c.l.b16 %v2087_v45  ;;  %v2928_v45 = vrot.slane %v2927_v29, 4  ;;  %v2943_v10 = vsel %vm6497_vm11, %v2938_v37, %v2942_v46  ;;  %v2954_v22 = vshll.u32 %v7252_v19, 16 }
 0x1e8   : > { %v7247_v0 = vadd.f32 %v2003_v57, %v1783_v50  ;;  %5729 = vmatmul.msk.bf16.gmra.mxu3 %vm1671_vm8, %v6079_v9  ;;  %v4478_v57 = vunpack.c.l.b16 %v4114_v47  ;;  %v4140_v9 = vshrl.u32 %v4049_v26, 16  ;;  %v4792_v18 = vsel %vm6532_vm15, %v5997_v56, %v4791_v42 }
 0x1e9   : > { %v7274_v50 = vpack.c.b16 %v2199_v21, %v2198_v41  ;;  %v2728_v21 = vld [vmem:[#allocation2 + $0x6c] sm:$0xf]  ;;  %v4128_v29 = vsel %vm6497_vm11, %v7276_v49, %v7238_v1  ;;  %v4149_v8 = vshll.u32 %v7118_v4, 16  ;;  %v2933_v42 = vsel %vm6497_vm11, %v2928_v45, %v7236_v36 }
 0x1ea   : > { %8807 = vst [vmem:[#allocation38_spill] sm:$0xff] %v7247_v0  ;;  %5852 = vmatmul.msk.bf16.gmra.mxu1 %vm1671_vm8, %v3176_v44  ;;  %v4143_v44 = vshll.u32 %v4049_v26, 16  ;;  %v4509_v47 = vpack.c.b16 %v4478_v57, %v4477_v2  ;;  %v2958_v57 = vshrl.u32 %v7252_v19, 16  ;;  %v4153_v26 = vshrl.u32 %v7118_v4, 16  ;;  %v7305_v4 = vld [vmem:[#allocation2 + $0x58] sm:$0xf] }
 0x1eb   : > { %5886 = vmatmul.msk.bf16.gmra.mxu2 %vm1671_vm8, %v3575_v11  ;;  %v4884_v19 = vunpack.c.l.b16 %v4795_v24  ;;  %v3483_v37 = vrot.slane %v7280_v20, 5  ;;  %v7302_v41 = vrot.slane %v4140_v9, 4  ;;  %v3153_v1 = vunpack.c.l.b16 %v2943_v10 }
 0x1ec   : > { %v2945_v43 = vshrl.u32 %v2728_v21, 16  ;;  %v2948_v2 = vshll.u32 %v2728_v21, 16  ;;  %v4883_v46 = vunpack.c.l.b16 %v4792_v18  ;;  %v5870_v24 = vrot.slane %v3366_v52, 9 }
 0x1ed   : > { %v3484_v49 = vsel %vm6532_vm15, %v3482_v25, %v3483_v37  ;;  %v7311_v36 = vrot.slane %v2954_v22, 5  ;;  %v2960_v56 = vrot.slane %v2958_v57, 4  ;;  %v7313_v45 = vrot.slane %v4149_v8, 5  ;;  %v6080_v57 = vld [vmem:[#allocation2 + $0xb4] sm:$0xff] }
 0x1ee   : > { %v2008_v9 = vpop.f32.mrf.mxu2  ;;  %v4155_v10 = vrot.slane %v4153_v26, 4  ;;  %v7317_v21 = vpack.c.b16 %v4884_v19, %v4883_v46  ;;  %v3481_v18 = vsel %vm6532_vm15, %v5870_v24, %v3480_v61  ;;  %v4138_v52 = vsel %vm6497_vm11, %v4133_v60, %v4137_v15  ;;  %v7331_v60 = vld [vmem:[#allocation2 + $0x7c] sm:$0xf] }
 0x1ef   : > { %v1785_v32 = vpop.f32.mrf.mxu1  ;;  %v8753_v25 = vrot.slane %v7305_v4, 5  ;;  %v2947_v8 = vrot.slane %v2945_v43, 4  ;;  %v2961_v19 = vor.u32 %v2960_v56, %v7311_v36  ;;  %v4480_v15 = vunpack.c.l.b16 %v4138_v52  ;;  %v7344_v52 = vld [vmem:[#allocation2 + $0x10] sm:$0xf] }
 0x1f0   : > { %v7282_v11 = vadd.f32 %v2005_v5, %v1785_v32  ;;  %5977 = vmatmul.msk.bf16.vlgmr.msra.gmra.mxu0 %vm1671_vm8, %v4509_v47  ;;  %v6009_v5 = vld [vmem:[%s8745_s3 + $0x10] sm:$0x3]  ;;  %v7307_v47 = vpop.f32.mrf.mxu0  ;;  %v3152_v32 = vunpack.c.l.b16 %v2933_v42  ;;  %v3553_v42 = vunpack.c.l.b16 %v3484_v49  ;;  %v4159_v43 = vshll.u32 %v7129_v35, 16  ;;  %v7347_v35 = vld [vmem:[#allocation2 + $0x18] sm:$0xe] }
 0x1f1   : > { %v4972_v63 = vsel %vm1720_vm7, %v6009_v5, 0  ;;  %8811 = vst [vmem:[#allocation41_spill] sm:$0xff] %v7307_v47  ;;  %v7315_v5 = vld [vmem:[#allocation2 + $0x5c] sm:$0x1]  ;;  %v2950_v47 = vrot.slane %v2948_v2, 5  ;;  %v4800_v46 = vrot.slane %v8753_v25, 4 }
 0x1f2   : > { %8810 = vst [vmem:[#allocation40_spill] sm:$0xff] %v7282_v11  ;;  %4981 = vmatpush.bf16.msra.mxu1 %v4972_v63  ;;  %v4145_v63 = vrot.slane %v4143_v44, 5  ;;  %v3177_v37 = vpack.c.b16 %v3153_v1, %v3152_v32  ;;  %v4801_v61 = vrot.slane %v7315_v5, 5  ;;  %v3552_v44 = vunpack.c.l.b16 %v3481_v18  ;;  %v7342_v18 = vld [vmem:[#allocation2 + $0xc] sm:$0xe] }
 0x1f3   : > { %v4156_v1 = vor.u32 %v4155_v10, %v7313_v45  ;;  %v2964_v2 = vshll.u32 %v7280_v20, 16  ;;  %v2951_v32 = vor.u32 %v2950_v47, %v2947_v8  ;;  %v2962_v20 = vrot.slane %v2961_v19, 4 }
 0x1f4   : > { %v4146_v24 = vor.u32 %v4145_v63, %v7302_v41  ;;  %v7340_v49 = vsel %vm6532_vm15, %v4800_v46, %v4801_v61  ;;  %v3576_v56 = vpack.c.b16 %v3553_v42, %v3552_v44  ;;  %v3487_v41 = vrot.slane %v7331_v60, 5  ;;  %v4052_v63 = vld [vmem:[#allocation2 + $0x3c] sm:$0xf]  ;;  %v4702_v46 = vld [vmem:[#allocation2 + $0x54] sm:$0xe] }
 0x1f5   : > { %v7354_v47 = vrot.slane %v4156_v1, 4  ;;  %v7356_v8 = vrot.slane %v4159_v43, 5  ;;  %v2966_v44 = vrot.slane %v2964_v2, 5  ;;  %v5732_v19 = vrot.slane %v7342_v18, 9  ;;  %v3367_v18 = vld [vmem:[#allocation2 + $0x78] sm:$0xe] }
 0x1f6   : > { %v2010_v10 = vpop.f32.mrf.mxu2  ;;  %v2952_v42 = vrot.slane %v2951_v32, 4  ;;  %v4164_v43 = vshrl.u32 %v4052_v63, 16  ;;  %v3489_v25 = vrot.slane %v3487_v41, 4 }
 0x1f7   : > { %v1788_v22 = vpop.f32.mrf.mxu1 }
 0x1f8   : > { %v7324_v26 = vadd.f32 %v2008_v9, %v1788_v22  ;;  %5730 = vmatmul.msk.bf16.gmra.mxu3 %vm1671_vm8, %v6080_v57  ;;  %v4479_v9 = vunpack.c.l.b16 %v4128_v29  ;;  %v6174_v22 = vld [vmem:[#allocation2 + $0x14] sm:$0x1]  ;;  %v7358_v61 = vpop.f32.mrf.mxu0 }
 0x1f9   : > { %v2096_v57 = vrot.slane %v6174_v22, 5  ;;  %8813 = vst [vmem:[#allocation43_spill] sm:$0xff] %v7358_v61  ;;  %v7360_v22 = vrot.slane %v4146_v24, 4  ;;  %v2967_v24 = vsel %vm6497_vm11, %v2962_v20, %v2966_v44  ;;  %v5998_v61 = vrot.slane %v4702_v46, 9  ;;  %v7386_v44 = vld [vmem:[#allocation2 + $0x64] sm:$0xf] }
 0x1fa   : > { %8812 = vst [vmem:[#allocation42_spill] sm:$0xff] %v7324_v26  ;;  %5853 = vmatmul.msk.bf16.gmra.mxu1 %vm1671_vm8, %v3177_v37  ;;  %v7350_v37 = vld [vmem:[#allocation2 + $0x20] sm:$0x1]  ;;  %v4510_v29 = vpack.c.b16 %v4480_v15, %v4479_v9  ;;  %v8814_v15 = vrot.slane %v7344_v52, 5  ;;  %v2982_v20 = vshrl.u32 %v7331_v60, 16  ;;  %v4167_v9 = vshll.u32 %v4052_v63, 16 }
 0x1fb   : > { %5887 = vmatmul.msk.bf16.gmra.mxu2 %vm1671_vm8, %v3576_v56  ;;  %v7364_v26 = vld [vmem:[#allocation2 + $0x80] sm:$0x1]  ;;  %v7368_v56 = vld [vmem:[#allocation2 + $0x1c] sm:$0xf]  ;;  %v4152_v32 = vsel %vm6497_vm11, %v7360_v22, %v7313_v45  ;;  %v8816_v45 = vrot.slane %v7305_v4, 5 }
 0x1fc   : > { %v2095_v1 = vrot.slane %v8814_v15, 4  ;;  %v4162_v15 = vsel %vm6497_vm11, %v7354_v47, %v7356_v8  ;;  %v3490_v46 = vrot.slane %v7364_v26, 5  ;;  %v3155_v47 = vunpack.c.l.b16 %v2967_v24 }
 0x1fd   : > { %v4799_v22 = vsel %vm6532_vm15, %v5998_v61, %v8816_v45  ;;  %v5871_v8 = vrot.slane %v3367_v18, 9  ;;  %v2984_v38 = vrot.slane %v2982_v20, 4 }
 0x1fe   : > { %v3491_v11 = vsel %vm6532_vm15, %v3489_v25, %v3490_v46  ;;  %v4885_v61 = vunpack.c.l.b16 %v4799_v22  ;;  %v4177_v46 = vshrl.u32 %v7162_v34, 16  ;;  %v4808_v22 = vrot.slane %v7404_v54, 5 }
 0x1ff   : > { %v1790_v55 = vpop.f32.mrf.mxu1  ;;  %v3488_v24 = vsel %vm6532_vm15, %v5871_v8, %v3487_v41 }
 0x200   : > { %v7371_v2 = vadd.f32 %v2010_v10, %v1790_v55  ;;  %5978 = vmatmul.msk.bf16.gmra.mxu0 %vm1671_vm8, %v4510_v29  ;;  %v2731_v55 = vld [vmem:[#allocation2 + $0x78] sm:$0xf]  ;;  %v2978_v10 = vshll.u32 %v7331_v60, 16  ;;  %v2957_v29 = vsel %vm6497_vm11, %v2952_v42, %v7311_v36  ;;  %v4886_v60 = vunpack.c.l.b16 %v7340_v49  ;;  %v7417_v41 = vpop.f32.mrf.mxu0 }
 0x201   : > { %v2969_v0 = vshrl.u32 %v2731_v55, 16  ;;  %v2972_v36 = vshll.u32 %v2731_v55, 16  ;;  %v8754_v42 = vrot.slane %v7386_v44, 5  ;;  %v3154_v63 = vunpack.c.l.b16 %v2957_v29  ;;  %8819 = vst [vmem:[#allocation47_spill] sm:$0xff] %v7417_v41 }
 0x202   : > { %8815 = vst [vmem:[#allocation44_spill] sm:$0xff] %v7371_v2  ;;  %v2097_v2 = vsel %vm6532_vm15, %v2095_v1, %v2096_v57  ;;  %v7402_v33 = vrot.slane %v2978_v10, 5  ;;  %v4166_v57 = vrot.slane %v4164_v43, 4  ;;  %v4169_v1 = vrot.slane %v4167_v9, 5 }
 0x203   : > { %v4173_v49 = vshll.u32 %v7162_v34, 16  ;;  %v3178_v25 = vpack.c.b16 %v3155_v47, %v3154_v63  ;;  %v3555_v55 = vunpack.c.l.b16 %v3491_v11  ;;  %v7412_v29 = vpack.c.b16 %v4886_v60, %v4885_v61 }
 0x204   : > { %v2971_v10 = vrot.slane %v2969_v0, 4  ;;  %v2974_v20 = vrot.slane %v2972_v36, 5  ;;  %v4807_v45 = vrot.slane %v8754_v42, 4  ;;  %v3554_v43 = vunpack.c.l.b16 %v3488_v24  ;;  %v7426_v0 = vld [vmem:[#allocation2 + $0x88] sm:$0xf] }
 0x205   : > { %8818 = vst [vmem:[#allocation46_spill] sm:$0xff] %v7412_v29  ;;  %v8820_v9 = vrot.slane %v7344_v52, 5  ;;  %v2985_v11 = vor.u32 %v2984_v38, %v7402_v33  ;;  %v8821_v47 = vrot.slane %v7368_v56, 5  ;;  %v4482_v60 = vunpack.c.l.b16 %v4162_v15 }
 0x206   : > { %v2201_v36 = vunpack.c.l.b16 %v2097_v2  ;;  %v4170_v63 = vor.u32 %v4169_v1, %v4166_v57  ;;  %v3577_v52 = vpack.c.b16 %v3555_v55, %v3554_v43  ;;  %v2988_v61 = vshll.u32 %v7364_v26, 16  ;;  %v4703_v2 = vld [vmem:[#allocation2 + $0x60] sm:$0xe]  ;;  %v7442_v57 = vld [vmem:[#allocation2 + $0x2c] sm:$0x1] }
 0x207   : > { %v7409_v18 = vpop.f32.mrf.mxu1  ;;  %v2094_v34 = vsel %vm6532_vm15, %v5732_v19, %v8820_v9  ;;  %v2102_v8 = vrot.slane %v8821_v47, 4  ;;  %v7436_v19 = vrot.slane %v4173_v49, 5  ;;  %v4179_v38 = vrot.slane %v4177_v46, 4  ;;  %v4055_v46 = vld [vmem:[#allocation2 + $0x48] sm:$0xf] }
 0x208   : > { %8817 = vst [vmem:[#allocation45_spill] sm:$0xff] %v7409_v18  ;;  %5748 = vmatmul.msk.bf16.vlgmr.msrb.gmra.mxu3 %vm1671_vm8, %v7274_v50  ;;  %v7433_v50 = vsel %vm6532_vm15, %v4807_v45, %v4808_v22  ;;  %v4481_v9 = vunpack.c.l.b16 %v4152_v32  ;;  %v2975_v42 = vor.u32 %v2974_v20, %v2971_v10  ;;  %v3494_v47 = vrot.slane %v7426_v0, 5  ;;  %v7462_v22 = vld [vmem:[#allocation2 + $0x28] sm:$0xf] }
 0x209   : > { %v4183_v15 = vshll.u32 %v7165_v48, 16  ;;  %v2986_v26 = vrot.slane %v2985_v11, 4  ;;  %v8822_v49 = vrot.slane %v7368_v56, 5  ;;  %v8823_v55 = vrot.slane %v7347_v35, 9  ;;  %v7467_v11 = vld [vmem:[#allocation2 + $0x8c] sm:$0x1] }
 0x20a   : > { %5854 = vmatmul.msk.bf16.gmra.mxu1 %vm1671_vm8, %v3178_v25  ;;  %v2200_v25 = vunpack.c.l.b16 %v2094_v34  ;;  %v4511_v10 = vpack.c.b16 %v4482_v60, %v4481_v9  ;;  %v7454_v48 = vrot.slane %v4170_v63, 4  ;;  %v8824_v20 = vrot.slane %v7350_v37, 5 }
 0x20b   : > { %v7438_v24 = vpop.f32.mrf.mxu3  ;;  %5888 = vmatmul.msk.bf16.gmra.mxu2 %vm1671_vm8, %v3577_v52  ;;  %v7452_v32 = vsel %vm6532_vm15, %v8823_v55, %v8822_v49  ;;  %v2990_v34 = vrot.slane %v2988_v61, 5  ;;  %v3368_v52 = vld [vmem:[#allocation2 + $0x84] sm:$0xe]  ;;  %v4180_v60 = vor.u32 %v4179_v38, %v7436_v19  ;;  %v5999_v63 = vrot.slane %v4703_v2, 9 }
 0x20c   : > { %v7460_v45 = vsel %vm6532_vm15, %v2102_v8, %v8824_v20  ;;  %v2231_v35 = vpack.c.b16 %v2201_v36, %v2200_v25  ;;  %v2976_v9 = vrot.slane %v2975_v42, 4  ;;  %v3496_v37 = vrot.slane %v3494_v47, 4  ;;  %v2734_v2 = vld [vmem:[#allocation2 + $0x84] sm:$0xf] }
 0x20d   : > { %v4185_v49 = vrot.slane %v4183_v15, 5  ;;  %v4188_v55 = vshrl.u32 %v4055_v46, 16  ;;  %v2991_v8 = vsel %vm6497_vm11, %v2986_v26, %v2990_v34  ;;  %v3002_v20 = vshll.u32 %v7426_v0, 16 }
 0x20e   : > { %v3006_v36 = vshrl.u32 %v7426_v0, 16  ;;  %v8826_v61 = vrot.slane %v7386_v44, 5  ;;  %v5872_v38 = vrot.slane %v3368_v52, 9  ;;  %v3497_v42 = vrot.slane %v7467_v11, 5 }
 0x20f   : > { %v7465_v43 = vpop.f32.mrf.mxu1  ;;  %v4191_v15 = vshll.u32 %v4055_v46, 16  ;;  %v4888_v1 = vunpack.c.l.b16 %v7433_v50  ;;  %v2981_v26 = vsel %vm6497_vm11, %v2976_v9, %v7402_v33  ;;  %v4181_v34 = vrot.slane %v4180_v60, 4 }
 0x210   : > { %8825 = vst [vmem:[#allocation48_spill] sm:$0xff] %v7465_v43  ;;  %5979 = vmatmul.msk.bf16.gmra.mxu0 %vm1671_vm8, %v4511_v10  ;;  %v4806_v25 = vsel %vm6532_vm15, %v5999_v63, %v8826_v61  ;;  %v7481_v10 = vpop.f32.mrf.mxu0  ;;  %v4197_v0 = vshll.u32 %v7234_v14, 16  ;;  %v4201_v56 = vshrl.u32 %v7234_v14, 16  ;;  %v3157_v52 = vunpack.c.l.b16 %v2991_v8 }
 0x211   : > { %8827 = vst [vmem:[#allocation49_spill] sm:$0xff] %v7481_v10  ;;  %v3495_v63 = vsel %vm6532_vm15, %v5872_v38, %v3494_v47  ;;  %v3498_v50 = vsel %vm6532_vm15, %v3496_v37, %v3497_v42  ;;  %v4887_v46 = vunpack.c.l.b16 %v4806_v25  ;;  %v2993_v61 = vshrl.u32 %v2734_v2, 16 }
 0x212   : > { %v2996_v10 = vshll.u32 %v2734_v2, 16  ;;  %v7494_v43 = vrot.slane %v3002_v20, 5  ;;  %v3008_v33 = vrot.slane %v3006_v36, 4  ;;  %v3156_v60 = vunpack.c.l.b16 %v2981_v26  ;;  %v2036_v20 = vld [vmem:[#allocation2 + $0x24] sm:$0xe] }
 0x213   : > { %v7488_v41 = vpop.f32.mrf.mxu3  ;;  %v4190_v9 = vrot.slane %v4188_v55, 4  ;;  %v4193_v18 = vrot.slane %v4191_v15, 5  ;;  %v7498_v14 = vpack.c.b16 %v4888_v1, %v4887_v46  ;;  %v3557_v31 = vunpack.c.l.b16 %v3498_v50  ;;  %v7514_v50 = vld [vmem:[#allocation2 + $0x94] sm:$0xf] }
 0x214   : > { %v4176_v47 = vsel %vm6497_vm11, %v7454_v48, %v7436_v19  ;;  %v4186_v37 = vsel %vm6497_vm11, %v4181_v34, %v4185_v49  ;;  %v8830_v36 = vrot.slane %v7462_v22, 5  ;;  %v3179_v25 = vpack.c.b16 %v3157_v52, %v3156_v60  ;;  %v7520_v52 = vld [vmem:[#allocation2 + $0x74] sm:$0x1] }
 0x215   : > { %8828 = vst [vmem:[#allocation50_spill] sm:$0xff] %v7498_v14  ;;  %v3556_v38 = vunpack.c.l.b16 %v3495_v63  ;;  %v7510_v42 = vrot.slane %v4197_v0, 5  ;;  %v4203_v1 = vrot.slane %v4201_v56, 4  ;;  %v2995_v2 = vrot.slane %v2993_v61, 4 }
 0x216   : > { %v2109_v55 = vrot.slane %v8830_v36, 4  ;;  %v2998_v15 = vrot.slane %v2996_v10, 5  ;;  %v3009_v26 = vor.u32 %v3008_v33, %v7494_v43  ;;  %v4812_v19 = vrot.slane %v7496_v62, 5 }
 0x217   : > { %v7500_v8 = vpop.f32.mrf.mxu1  ;;  %v2203_v48 = vunpack.c.l.b16 %v7460_v45  ;;  %v3012_v49 = vshll.u32 %v7467_v11, 16  ;;  %v4194_v34 = vor.u32 %v4193_v18, %v4190_v9  ;;  %v5734_v0 = vrot.slane %v2036_v20, 9 }
 0x218   : > { %8829 = vst [vmem:[#allocation51_spill] sm:$0xff] %v7500_v8  ;;  %5749 = vmatmul.msk.bf16.gmra.mxu3 %vm1671_vm8, %v2231_v35  ;;  %v3578_v56 = vpack.c.b16 %v3557_v31, %v3556_v38  ;;  %v4484_v35 = vunpack.c.l.b16 %v4186_v37  ;;  %v2202_v10 = vunpack.c.l.b16 %v7452_v32  ;;  %v8831_v63 = vrot.slane %v7442_v57, 5  ;;  %v7534_v60 = vpop.f32.mrf.mxu0 }
 0x219   : > { %v4483_v33 = vunpack.c.l.b16 %v4176_v47  ;;  %v3501_v45 = vrot.slane %v7514_v50, 5  ;;  %v4204_v18 = vor.u32 %v4203_v1, %v7510_v42  ;;  %v4207_v11 = vshll.u32 %v7245_v27, 16  ;;  %8832 = vst [vmem:[#allocation52_spill] sm:$0xff] %v7534_v60  ;;  %v4058_v27 = vld [vmem:[#allocation2 + $0x54] sm:$0xf] }
 0x21a   : > { %5855 = vmatmul.msk.bf16.gmra.mxu1 %vm1671_vm8, %v3179_v25  ;;  %v7527_v46 = vsel %vm6532_vm15, %v2109_v55, %v8831_v63  ;;  %v2999_v31 = vor.u32 %v2998_v15, %v2995_v2  ;;  %v3010_v32 = vrot.slane %v3009_v26, 4  ;;  %v4814_v57 = vrot.slane %v4812_v19, 4  ;;  %v7548_v1 = vld [vmem:[#allocation2 + $0x98] sm:$0x1]  ;;  %v2737_v2 = vld [vmem:[#allocation2 + $0x90] sm:$0xf] }
 0x21b   : > { %v7529_v61 = vpop.f32.mrf.mxu3  ;;  %5889 = vmatmul.msk.bf16.gmra.mxu2 %vm1671_vm8, %v3578_v56  ;;  %v4815_v9 = vrot.slane %v7520_v52, 5  ;;  %v2232_v37 = vpack.c.b16 %v2203_v48, %v2202_v10  ;;  %v3014_v20 = vrot.slane %v3012_v49, 5  ;;  %v7538_v36 = vrot.slane %v4194_v34, 4  ;;  %v4704_v56 = vld [vmem:[#allocation2 + $0x6c] sm:$0xe] }
 0x21c   : > { %v8833_v47 = vrot.slane %v7462_v22, 5  ;;  %v4512_v38 = vpack.c.b16 %v4484_v35, %v4483_v33  ;;  %v3026_v15 = vshll.u32 %v7514_v50, 16  ;;  %v3030_v26 = vshrl.u32 %v7514_v50, 16  ;;  %v3369_v50 = vld [vmem:[#allocation2 + $0x90] sm:$0xe] }
 0x21d   : > { %v4816_v48 = vsel %vm6532_vm15, %v4814_v57, %v4815_v9  ;;  %v3503_v49 = vrot.slane %v3501_v45, 4  ;;  %v4200_v22 = vsel %vm6497_vm11, %v7538_v36, %v7510_v42  ;;  %v4209_v34 = vrot.slane %v4207_v11, 5 }
 0x21e   : > { %v7544_v55 = vsel %vm6532_vm15, %v5734_v0, %v8833_v47  ;;  %v2205_v0 = vunpack.c.l.b16 %v7527_v46  ;;  %v3000_v35 = vrot.slane %v2999_v31, 4  ;;  %v3015_v10 = vsel %vm6497_vm11, %v3010_v32, %v3014_v20 }
 0x21f   : > { %v7546_v25 = vpop.f32.mrf.mxu1  ;;  %v4205_v63 = vrot.slane %v4204_v18, 4  ;;  %v4212_v33 = vshrl.u32 %v4058_v27, 16  ;;  %v3504_v57 = vrot.slane %v7548_v1, 5  ;;  %v3017_v9 = vshrl.u32 %v2737_v2, 16 }
 0x220   : > { %8834 = vst [vmem:[#allocation53_spill] sm:$0xff] %v7546_v25  ;;  %5980 = vmatmul.msk.bf16.gmra.mxu0 %vm1671_vm8, %v4512_v38  ;;  %v3020_v47 = vshll.u32 %v2737_v2, 16  ;;  %v4215_v60 = vshll.u32 %v4058_v27, 16  ;;  %v7563_v25 = vld [vmem:[#allocation2 + $0x7c] sm:$0xf]  ;;  %v3005_v42 = vsel %vm6497_vm11, %v3000_v35, %v7494_v43  ;;  %v7568_v46 = vrot.slane %v3026_v15, 5 }
 0x221   : > { %v3032_v11 = vrot.slane %v3030_v26, 4  ;;  %v6000_v31 = vrot.slane %v4704_v56, 9  ;;  %v3159_v32 = vunpack.c.l.b16 %v3015_v10  ;;  %v5873_v18 = vrot.slane %v3369_v50, 9  ;;  %v7581_v26 = vpop.f32.mrf.mxu2  ;;  %v7585_v50 = vpop.f32.mrf.mxu0 }
 0x222   : > { %v3505_v20 = vsel %vm6532_vm15, %v3503_v49, %v3504_v57  ;;  %v4221_v38 = vshll.u32 %v7305_v4, 16  ;;  %v4210_v27 = vsel %vm6497_vm11, %v4205_v63, %v4209_v34  ;;  %v4225_v2 = vshrl.u32 %v7305_v4, 16  ;;  %8835 = vst [vmem:[#allocation54_spill] sm:$0xff] %v7581_v26  ;;  %v7592_v26 = vld [vmem:[#allocation2 + $0x80] sm:$0x1] }
 0x223   : > { %v7570_v36 = vpop.f32.mrf.mxu3  ;;  %v4813_v43 = vsel %vm6532_vm15, %v6000_v31, %v4812_v19  ;;  %v3158_v56 = vunpack.c.l.b16 %v3005_v42  ;;  %v3502_v35 = vsel %vm6532_vm15, %v5873_v18, %v3501_v45  ;;  %v3019_v10 = vrot.slane %v3017_v9, 4  ;;  %8836 = vst [vmem:[#allocation55_spill] sm:$0xff] %v7585_v50 }
 0x224   : > { %v3022_v49 = vrot.slane %v3020_v47, 5  ;;  %v3559_v34 = vunpack.c.l.b16 %v3505_v20  ;;  %v3033_v4 = vor.u32 %v3032_v11, %v7568_v46  ;;  %v4214_v63 = vrot.slane %v4212_v33, 4  ;;  %v2741_v11 = vld [vmem:[#allocation2 + $0xa0] sm:$0xf] }
 0x225   : > { %v4890_v8 = vunpack.c.l.b16 %v4816_v48  ;;  %v3180_v19 = vpack.c.b16 %v3159_v32, %v3158_v56  ;;  %v4217_v31 = vrot.slane %v4215_v60, 5  ;;  %v7590_v15 = vrot.slane %v4221_v38, 5 }
 0x226   : > { %v4889_v42 = vunpack.c.l.b16 %v4813_v43  ;;  %v3558_v45 = vunpack.c.l.b16 %v3502_v35  ;;  %v3036_v9 = vshll.u32 %v7548_v1, 16  ;;  %v4227_v47 = vrot.slane %v4225_v2, 4 }
 0x227   : > { %v7587_v57 = vpop.f32.mrf.mxu1  ;;  %v8838_v18 = vrot.slane %v7563_v25, 5  ;;  %v4486_v33 = vunpack.c.l.b16 %v4210_v27  ;;  %v2204_v48 = vunpack.c.l.b16 %v7544_v55  ;;  %v3023_v60 = vor.u32 %v3022_v49, %v3019_v10  ;;  %v3370_v27 = vld [vmem:[#allocation2 + $0x9c] sm:$0xe] }
 0x228   : > { %8837 = vst [vmem:[#allocation56_spill] sm:$0xff] %v7587_v57  ;;  %5750 = vmatmul.msk.bf16.gmra.mxu3 %vm1671_vm8, %v2232_v37  ;;  %v7600_v32 = vpack.c.b16 %v4890_v8, %v4889_v42  ;;  %v3579_v38 = vpack.c.b16 %v3559_v34, %v3558_v45  ;;  %v3034_v43 = vrot.slane %v3033_v4, 4  ;;  %v3508_v56 = vrot.slane %v2741_v11, 5  ;;  %v7602_v37 = vld [vmem:[#allocation2 + $0x30] sm:$0xe] }
 0x229   : > { %v4821_v20 = vrot.slane %v8838_v18, 4  ;;  %v4822_v1 = vrot.slane %v7592_v26, 5  ;;  %v4485_v35 = vunpack.c.l.b16 %v4200_v22  ;;  %v7607_v18 = vpack.c.b16 %v2205_v0, %v2204_v48  ;;  %v2740_v49 = vld [vmem:[#allocation2 + $0x9c] sm:$0xf]  ;;  %v4705_v0 = vld [vmem:[#allocation2 + $0x78] sm:$0xe] }
 0x22a   : > { %5856 = vmatmul.msk.bf16.gmra.mxu1 %vm1671_vm8, %v3180_v19  ;;  %8839 = vst [vmem:[#allocation57_spill] sm:$0xff] %v7600_v32  ;;  %v7609_v19 = vld [vmem:[#allocation2 + $0xa4] sm:$0x1]  ;;  %v3038_v55 = vrot.slane %v3036_v9, 5  ;;  %v4218_v8 = vor.u32 %v4217_v31, %v4214_v63  ;;  %v4228_v10 = vor.u32 %v4227_v47, %v7590_v15  ;;  %v3024_v42 = vrot.slane %v3023_v60, 4  ;;  %v7624_v60 = vpop.f32.mrf.mxu0 }
 0x22b   : > { %v7605_v2 = vpop.f32.mrf.mxu3  ;;  %5890 = vmatmul.msk.bf16.gmra.mxu2 %vm1671_vm8, %v3579_v38  ;;  %v4823_v34 = vsel %vm6532_vm15, %v4821_v20, %v4822_v1  ;;  %v4513_v4 = vpack.c.b16 %v4486_v33, %v4485_v35  ;;  %v4231_v45 = vshll.u32 %v7315_v5, 16  ;;  %v5735_v22 = vrot.slane %v7602_v37, 9  ;;  %v7622_v33 = vpop.f32.mrf.mxu2  ;;  %8842 = vst [vmem:[#allocation60_spill] sm:$0xff] %v7624_v60  ;;  %v6179_v1 = vld [vmem:[#allocation2 + $0x34] sm:$0xf] }
 0x22c   : > { %v3039_v38 = vsel %vm6497_vm11, %v3034_v43, %v3038_v55  ;;  %v5874_v9 = vrot.slane %v3370_v27, 9  ;;  %v3510_v63 = vrot.slane %v3508_v56, 4  ;;  %v3511_v31 = vrot.slane %v7609_v19, 5  ;;  %8841 = vst [vmem:[#allocation59_spill] sm:$0xff] %v7622_v33  ;;  %v4061_v55 = vld [vmem:[#allocation2 + $0x60] sm:$0xf] }
 0x22d   : > { %v3041_v47 = vshrl.u32 %v2740_v49, 16  ;;  %v3044_v50 = vshll.u32 %v2740_v49, 16  ;;  %v3050_v57 = vshll.u32 %v2741_v11, 16  ;;  %v3054_v20 = vshrl.u32 %v2741_v11, 16 }
 0x22e   : > { %v4219_v5 = vrot.slane %v4218_v8, 4  ;;  %v4229_v37 = vrot.slane %v4228_v10, 4  ;;  %v2114_v35 = vrot.slane %v6179_v1, 5  ;;  %v3029_v43 = vsel %vm6497_vm11, %v3024_v42, %v7568_v46 }
 0x22f   : > { %v7617_v48 = vpop.f32.mrf.mxu1  ;;  %v4233_v27 = vrot.slane %v4231_v45, 5  ;;  %v4245_v49 = vshll.u32 %v7386_v44, 16  ;;  %v4249_v11 = vshrl.u32 %v7386_v44, 16  ;;  %v3161_v33 = vunpack.c.l.b16 %v3039_v38 }
 0x230   : > { %8840 = vst [vmem:[#allocation58_spill] sm:$0xff] %v7617_v48  ;;  %5981 = vmatmul.msk.bf16.gmra.mxu0 %vm1671_vm8, %v4513_v4  ;;  %v6001_v48 = vrot.slane %v4705_v0, 9  ;;  %v3509_v60 = vsel %vm6532_vm15, %v5874_v9, %v3508_v56  ;;  %v3512_v8 = vsel %vm6532_vm15, %v3510_v63, %v3511_v31  ;;  %v8843_v10 = vrot.slane %v7563_v25, 5 }
 0x231   : > { %v3043_v46 = vrot.slane %v3041_v47, 4  ;;  %v3046_v42 = vrot.slane %v3044_v50, 5  ;;  %v7642_v45 = vrot.slane %v3050_v57, 5  ;;  %v3056_v1 = vrot.slane %v3054_v20, 4 }
 0x232   : > { %v4820_v4 = vsel %vm6532_vm15, %v6001_v48, %v8843_v10  ;;  %v3160_v44 = vunpack.c.l.b16 %v3029_v43  ;;  %v4224_v56 = vsel %vm6497_vm11, %v4219_v5, %v7590_v15  ;;  %v4234_v38 = vsel %vm6497_vm11, %v4229_v37, %v4233_v27  ;;  %v6180_v37 = vld [vmem:[#allocation2 + $0x38] sm:$0x1] }
 0x233   : > { %v7640_v0 = vpop.f32.mrf.mxu3  ;;  %v4236_v9 = vshrl.u32 %v4061_v55, 16  ;;  %v4239_v63 = vshll.u32 %v4061_v55, 16  ;;  %v7649_v31 = vrot.slane %v4245_v49, 5  ;;  %v4891_v48 = vunpack.c.l.b16 %v4820_v4  ;;  %v7666_v4 = vpop.f32.mrf.mxu0 }
 0x234   : > { %v4892_v10 = vunpack.c.l.b16 %v4823_v34  ;;  %v3181_v50 = vpack.c.b16 %v3161_v33, %v3160_v44  ;;  %v3560_v57 = vunpack.c.l.b16 %v3509_v60  ;;  %v3561_v47 = vunpack.c.l.b16 %v3512_v8  ;;  %8847 = vst [vmem:[#allocation64_spill] sm:$0xff] %v7666_v4  ;;  %v2038_v44 = vld [vmem:[#allocation2 + $0x3c] sm:$0xe] }
 0x235   : > { %v4251_v20 = vrot.slane %v4249_v11, 4  ;;  %v3047_v43 = vor.u32 %v3046_v42, %v3043_v46  ;;  %v3057_v14 = vor.u32 %v3056_v1, %v7642_v45  ;;  %v3060_v15 = vshll.u32 %v7609_v19, 16  ;;  %v6181_v11 = vld [vmem:[#allocation2 + $0x40] sm:$0xf]  ;;  %v7664_v19 = vpop.f32.mrf.mxu2  ;;  %v2744_v42 = vld [vmem:[#allocation2 + $0xac] sm:$0xf] }
 0x236   : > { %v7655_v5 = vpack.c.b16 %v4892_v10, %v4891_v48  ;;  %v2117_v27 = vrot.slane %v6180_v37, 5  ;;  %v7661_v34 = vsel %vm6532_vm15, %v5735_v22, %v2114_v35  ;;  %v2116_v33 = vrot.slane %v2114_v35, 4  ;;  %8846 = vst [vmem:[#allocation63_spill] sm:$0xff] %v7664_v19 }
 0x237   : > { %v7651_v32 = vpop.f32.mrf.mxu1  ;;  %v4487_v60 = vunpack.c.l.b16 %v4224_v56  ;;  %v4488_v55 = vunpack.c.l.b16 %v4234_v38  ;;  %v4238_v49 = vrot.slane %v4236_v9, 4  ;;  %v2121_v8 = vrot.slane %v6181_v11, 5  ;;  %v7672_v9 = vld [vmem:[#allocation2 + $0xb0] sm:$0x1] }
 0x238   : > { %8844 = vst [vmem:[#allocation61_spill] sm:$0xff] %v7651_v32  ;;  %5751 = vmatmul.msk.bf16.gmra.mxu3 %vm1671_vm8, %v7607_v18  ;;  %v3580_v46 = vpack.c.b16 %v3561_v47, %v3560_v57  ;;  %v4241_v1 = vrot.slane %v4239_v63, 5  ;;  %v4252_v18 = vor.u32 %v4251_v20, %v7649_v31  ;;  %v4255_v22 = vshll.u32 %v7404_v54, 16  ;;  %v7674_v11 = vld [vmem:[#allocation2 + $0x50] sm:$0x1] }
 0x239   : > { %8845 = vst [vmem:[#allocation62_spill] sm:$0xff] %v7655_v5  ;;  %v3048_v48 = vrot.slane %v3047_v43, 4  ;;  %v3058_v56 = vrot.slane %v3057_v14, 4  ;;  %v3062_v38 = vrot.slane %v3060_v15, 5  ;;  %v3515_v10 = vrot.slane %v2744_v42, 5 }
 0x23a   : > { %5857 = vmatmul.msk.bf16.gmra.mxu1 %vm1671_vm8, %v3181_v50  ;;  %v6182_v50 = vld [vmem:[#allocation2 + $0x44] sm:$0x1]  ;;  %v2206_v63 = vunpack.c.l.b16 %v7661_v34  ;;  %v3371_v54 = vld [vmem:[#allocation2 + $0xa8] sm:$0xe]  ;;  %v4514_v47 = vpack.c.b16 %v4488_v55, %v4487_v60  ;;  %v2118_v20 = vsel %vm6532_vm15, %v2116_v33, %v2117_v27  ;;  %v5736_v14 = vrot.slane %v2038_v44, 9 }
 0x23b   : > { %v7670_v35 = vpop.f32.mrf.mxu3  ;;  %v2124_v37 = vrot.slane %v6182_v50, 5  ;;  %5891 = vmatmul.msk.bf16.gmra.mxu2 %vm1671_vm8, %v3580_v46  ;;  %v2123_v43 = vrot.slane %v2121_v8, 4  ;;  %v2743_v15 = vld [vmem:[#allocation2 + $0xa8] sm:$0xf]  ;;  %v3518_v50 = vrot.slane %v7672_v9, 5  ;;  %v4242_v32 = vor.u32 %v4241_v1, %v4238_v49 }
 0x23c   : > { %v4253_v19 = vrot.slane %v4252_v18, 4  ;;  %v4257_v5 = vrot.slane %v4255_v22, 5  ;;  %v3053_v46 = vsel %vm6497_vm11, %v3048_v48, %v7642_v45  ;;  %v3063_v34 = vsel %vm6497_vm11, %v3058_v56, %v3062_v38  ;;  %v7694_v18 = vld [vmem:[#allocation2 + $0x4c] sm:$0xf] }
 0x23d   : > { %v5875_v60 = vrot.slane %v3371_v54, 9  ;;  %v3517_v55 = vrot.slane %v3515_v10, 4  ;;  %v3065_v27 = vshrl.u32 %v2743_v15, 16  ;;  %v3068_v33 = vshll.u32 %v2743_v15, 16 }
 0x23e   : > { %v3074_v44 = vshll.u32 %v2744_v42, 16  ;;  %v3078_v57 = vshrl.u32 %v2744_v42, 16  ;;  %v2122_v49 = vsel %vm6532_vm15, %v5736_v14, %v2121_v8  ;;  %v2125_v1 = vsel %vm6532_vm15, %v2123_v43, %v2124_v37  ;;  %v7707_v14 = vpop.f32.mrf.mxu2 }
 0x23f   : > { %v7681_v4 = vpop.f32.mrf.mxu1  ;;  %v8755_v45 = vrot.slane %v7694_v18, 5  ;;  %v4243_v22 = vrot.slane %v4242_v32, 4  ;;  %v4258_v48 = vsel %vm6497_vm11, %v4253_v19, %v4257_v5  ;;  %v4269_v56 = vshll.u32 %v7496_v62, 16  ;;  %8849 = vst [vmem:[#allocation66_spill] sm:$0xff] %v7707_v14  ;;  %v7709_v32 = vpop.f32.mrf.mxu0 }
 0x240   : > { %8848 = vst [vmem:[#allocation65_spill] sm:$0xff] %v7681_v4  ;;  %5982 = vmatmul.msk.bf16.gmra.mxu0 %vm1671_vm8, %v4514_v47  ;;  %v2207_v4 = vunpack.c.l.b16 %v2118_v20  ;;  %v4273_v38 = vshrl.u32 %v7496_v62, 16  ;;  %v3162_v54 = vunpack.c.l.b16 %v3053_v46  ;;  %v3163_v47 = vunpack.c.l.b16 %v3063_v34  ;;  %v4064_v20 = vld [vmem:[#allocation2 + $0x6c] sm:$0xf] }
 0x241   : > { %v3516_v8 = vsel %vm6532_vm15, %v5875_v60, %v3515_v10  ;;  %v3519_v37 = vsel %vm6532_vm15, %v3517_v55, %v3518_v50  ;;  %8850 = vst [vmem:[#allocation67_spill] sm:$0xff] %v7709_v32  ;;  %v3067_v5 = vrot.slane %v3065_v27, 4  ;;  %v3070_v19 = vrot.slane %v3068_v33, 5 }
 0x242   : > { %v7711_v43 = vrot.slane %v3074_v44, 5  ;;  %v3080_v62 = vrot.slane %v3078_v57, 4  ;;  %v2234_v15 = vpack.c.b16 %v2207_v4, %v2206_v63  ;;  %v4248_v46 = vsel %vm6497_vm11, %v4243_v22, %v7649_v31 }
 0x243   : > { %v7701_v42 = vpop.f32.mrf.mxu3  ;;  %v2209_v34 = vunpack.c.l.b16 %v2125_v1  ;;  %v2130_v10 = vrot.slane %v8755_v45, 4  ;;  %v3562_v50 = vunpack.c.l.b16 %v3516_v8  ;;  %v3563_v60 = vunpack.c.l.b16 %v3519_v37 }
 0x244   : > { %v4260_v55 = vshrl.u32 %v4064_v20, 16  ;;  %v4263_v14 = vshll.u32 %v4064_v20, 16  ;;  %v3182_v33 = vpack.c.b16 %v3163_v47, %v3162_v54  ;;  %v4490_v44 = vunpack.c.l.b16 %v4258_v48  ;;  %v2747_v48 = vld [vmem:[#allocation2 + $0xb8] sm:$0xf] }
 0x245   : > { %v2208_v57 = vunpack.c.l.b16 %v2122_v49  ;;  %v3084_v4 = vshll.u32 %v7672_v9, 16  ;;  %v3071_v31 = vor.u32 %v3070_v19, %v3067_v5  ;;  %v3081_v63 = vor.u32 %v3080_v62, %v7711_v43 }
 0x246   : > { %v7725_v1 = vrot.slane %v4269_v56, 5  ;;  %v4275_v22 = vrot.slane %v4273_v38, 4  ;;  %v4489_v8 = vunpack.c.l.b16 %v4248_v46  ;;  %v5737_v20 = vrot.slane %v7718_v51, 9  ;;  %v2746_v56 = vld [vmem:[#allocation2 + $0xb4] sm:$0xf] }
 0x247   : > { %v7720_v27 = vpop.f32.mrf.mxu1  ;;  %v7728_v37 = vpack.c.b16 %v2209_v34, %v2208_v57  ;;  %v3581_v54 = vpack.c.b16 %v3563_v60, %v3562_v50  ;;  %v4262_v49 = vrot.slane %v4260_v55, 4  ;;  %v4265_v47 = vrot.slane %v4263_v14, 5  ;;  %v4067_v34 = vld [vmem:[#allocation2 + $0x78] sm:$0xf]  ;;  %v3372_v60 = vld [vmem:[#allocation2 + $0xb4] sm:$0xe] }
 0x248   : > { %8851 = vst [vmem:[#allocation68_spill] sm:$0xff] %v7720_v27  ;;  %5752 = vmatmul.msk.bf16.gmra.mxu3 %vm1671_vm8, %v2234_v15  ;;  %v8852_v9 = vrot.slane %v7674_v11, 5  ;;  %v4515_v38 = vpack.c.b16 %v4490_v44, %v4489_v8  ;;  %v3086_v62 = vrot.slane %v3084_v4, 5  ;;  %v3522_v15 = vrot.slane %v2747_v48, 5  ;;  %v2748_v11 = vld [vmem:[#allocation2 + $0xbc] sm:$0x1]  ;;  %v7743_v4 = vpop.f32.mrf.mxu2  ;;  %v7745_v8 = vpop.f32.mrf.mxu0 }
 0x249   : > { %v4279_v46 = vshll.u32 %v7520_v52, 16  ;;  %v3072_v14 = vrot.slane %v3071_v31, 4  ;;  %v3082_v50 = vrot.slane %v3081_v63, 4  ;;  %v3089_v55 = vshrl.u32 %v2746_v56, 16  ;;  %8854 = vst [vmem:[#allocation70_spill] sm:$0xff] %v7743_v4 }
 0x24a   : > { %5858 = vmatmul.msk.bf16.gmra.mxu1 %vm1671_vm8, %v3182_v33  ;;  %v7735_v5 = vsel %vm6532_vm15, %v2130_v10, %v8852_v9  ;;  %v4276_v10 = vor.u32 %v4275_v22, %v7725_v1  ;;  %v3092_v33 = vshll.u32 %v2746_v56, 16  ;;  %v3098_v57 = vshll.u32 %v2747_v48, 16  ;;  %8855 = vst [vmem:[#allocation71_spill] sm:$0xff] %v7745_v8 }
 0x24b   : > { %v2013_v19 = vpop.f32.mrf.mxu3  ;;  %5892 = vmatmul.msk.bf16.gmra.mxu2 %vm1671_vm8, %v3581_v54  ;;  %v3102_v44 = vshrl.u32 %v2747_v48, 16  ;;  %v4284_v52 = vshrl.u32 %v4067_v34, 16  ;;  %v4287_v9 = vshll.u32 %v4067_v34, 16  ;;  %v4297_v54 = vshrl.u32 %v7563_v25, 16 }
 0x24c   : > { %v7739_v51 = vadd.f32 %v2013_v19, %v7438_v24  ;;  %v4293_v24 = vshll.u32 %v7563_v25, 16  ;;  %v5876_v31 = vrot.slane %v3372_v60, 9  ;;  %v3524_v63 = vrot.slane %v3522_v15, 4 }
 0x24d   : > { %v3525_v19 = vrot.slane %v2748_v11, 5  ;;  %v4266_v45 = vor.u32 %v4265_v47, %v4262_v49  ;;  %v3077_v22 = vsel %vm6497_vm11, %v3072_v14, %v7711_v43  ;;  %v3087_v48 = vsel %vm6497_vm11, %v3082_v50, %v3086_v62 }
 0x24e   : > { %8853 = vst [vmem:[#allocation69_spill] sm:$0xff] %v7739_v51  ;;  %v4277_v56 = vrot.slane %v4276_v10, 4  ;;  %v4281_v8 = vrot.slane %v4279_v46, 5  ;;  %v3091_v32 = vrot.slane %v3089_v55, 4  ;;  %v3094_v27 = vrot.slane %v3092_v33, 5 }
 0x24f   : > { %v7755_v34 = vpop.f32.mrf.mxu1  ;;  %v7757_v25 = vrot.slane %v3098_v57, 5  ;;  %v3104_v60 = vrot.slane %v3102_v44, 4  ;;  %v4286_v4 = vrot.slane %v4284_v52, 4  ;;  %v4289_v49 = vrot.slane %v4287_v9, 5 }
 0x250   : > { %5983 = vmatmul.msk.bf16.gmra.mxu0 %vm1671_vm8, %v4515_v38  ;;  %8856 = vst [vmem:[#allocation72_spill] sm:$0xff] %v7755_v34  ;;  %v7759_v47 = vrot.slane %v4293_v24, 5  ;;  %v4299_v38 = vrot.slane %v4297_v54, 4  ;;  %v3164_v29 = vunpack.c.l.b16 %v3077_v22  ;;  %v3165_v43 = vunpack.c.l.b16 %v3087_v48  ;;  %v2750_v54 = vld [vmem:[#allocation2 + $0xc4] sm:$0xf] }
 0x251   : > { %v3523_v62 = vsel %vm6532_vm15, %v5876_v31, %v3522_v15  ;;  %v3526_v46 = vsel %vm6532_vm15, %v3524_v63, %v3525_v19  ;;  %v4267_v50 = vrot.slane %v4266_v45, 4  ;;  %v4282_v10 = vsel %vm6497_vm11, %v4277_v56, %v4281_v8  ;;  %v7775_v15 = vld [vmem:[#allocation2 + $0x58] sm:$0xf]  ;;  %v7793_v48 = vld [vmem:[#allocation2 + $0xc8] sm:$0x1] }
 0x252   : > { %v3108_v55 = vshll.u32 %v2748_v11, 16  ;;  %v8857_v33 = vrot.slane %v7694_v18, 5  ;;  %v3095_v44 = vor.u32 %v3094_v27, %v3091_v32  ;;  %v3105_v52 = vor.u32 %v3104_v60, %v7757_v25  ;;  %v7783_v27 = vpop.f32.mrf.mxu2  ;;  %v3373_v56 = vld [vmem:[#allocation2 + $0xc0] sm:$0xe]  ;;  %v7795_v60 = vld [vmem:[#allocation2 + $0x5c] sm:$0x1] }
 0x253   : > { %v2015_v51 = vpop.f32.mrf.mxu3  ;;  %v8756_v9 = vrot.slane %v7775_v15, 5  ;;  %v3564_v24 = vunpack.c.l.b16 %v3523_v62  ;;  %v4272_v45 = vsel %vm6497_vm11, %v4267_v50, %v7725_v1  ;;  %v3183_v11 = vpack.c.b16 %v3165_v43, %v3164_v29  ;;  %8858 = vst [vmem:[#allocation73_spill] sm:$0xff] %v7783_v27  ;;  %v7790_v1 = vld [vmem:[#allocation2 + $0x88] sm:$0xf] }
 0x254   : > { %v7766_v14 = vadd.f32 %v2015_v51, %v7488_v41  ;;  %v2129_v57 = vsel %vm6532_vm15, %v5737_v20, %v8857_v33  ;;  %v3565_v41 = vunpack.c.l.b16 %v3526_v46  ;;  %v4290_v51 = vor.u32 %v4289_v49, %v4286_v4  ;;  %v7785_v20 = vpop.f32.mrf.mxu0  ;;  %v7806_v33 = vld [vmem:[#allocation2 + $0x84] sm:$0xf] }
 0x255   : > { %v4492_v8 = vunpack.c.l.b16 %v4282_v10  ;;  %v2211_v18 = vunpack.c.l.b16 %v7735_v5  ;;  %v4300_v32 = vor.u32 %v4299_v38, %v7759_v47  ;;  %8859 = vst [vmem:[#allocation74_spill] sm:$0xff] %v7785_v20  ;;  %v3110_v31 = vrot.slane %v3108_v55, 5  ;;  %v2749_v55 = vld [vmem:[#allocation2 + $0xc0] sm:$0xf] }
 0x256   : > { %v3529_v63 = vrot.slane %v2750_v54, 5  ;;  %v4303_v19 = vshll.u32 %v7592_v26, 16  ;;  %v4491_v29 = vunpack.c.l.b16 %v4272_v45  ;;  %v2210_v5 = vunpack.c.l.b16 %v2129_v57  ;;  %v4706_v45 = vld [vmem:[#allocation2 + $0x84] sm:$0xe] }
 0x257   : > { %v3096_v4 = vrot.slane %v3095_v44, 4  ;;  %v3106_v22 = vrot.slane %v3105_v52, 4  ;;  %v4291_v38 = vrot.slane %v4290_v51, 4  ;;  %v7800_v26 = vrot.slane %v8756_v9, 4  ;;  %v7802_v43 = vpop.f32.mrf.mxu1 }
 0x258   : > { %5753 = vmatmul.msk.bf16.gmra.mxu3 %vm1671_vm8, %v7728_v37  ;;  %v3582_v37 = vpack.c.b16 %v3565_v41, %v3564_v24  ;;  %8860 = vst [vmem:[#allocation75_spill] sm:$0xff] %v7802_v43  ;;  %v4516_v46 = vpack.c.b16 %v4492_v8, %v4491_v29  ;;  %v7804_v50 = vpack.c.b16 %v2211_v18, %v2210_v5  ;;  %v4301_v10 = vrot.slane %v4300_v32, 4 }
 0x259   : > { %v4826_v57 = vrot.slane %v7790_v1, 5  ;;  %v5877_v52 = vrot.slane %v3373_v56, 9  ;;  %v3531_v24 = vrot.slane %v3529_v63, 4  ;;  %v3532_v41 = vrot.slane %v7793_v48, 5  ;;  %v7822_v56 = vld [vmem:[#allocation2 + $0x8c] sm:$0x1] }
 0x25a   : > { %5859 = vmatmul.msk.bf16.gmra.mxu1 %vm1671_vm8, %v3183_v11  ;;  %v3101_v51 = vsel %vm6497_vm11, %v3096_v4, %v7757_v25  ;;  %v3111_v11 = vsel %vm6497_vm11, %v3106_v22, %v3110_v31  ;;  %v4296_v8 = vsel %vm6497_vm11, %v4291_v38, %v7759_v47  ;;  %v3113_v18 = vshrl.u32 %v2749_v55, 16 }
 0x25b   : > { %v2018_v62 = vpop.f32.mrf.mxu3  ;;  %5893 = vmatmul.msk.bf16.gmra.mxu2 %vm1671_vm8, %v3582_v37  ;;  %v3116_v32 = vshll.u32 %v2749_v55, 16  ;;  %v3122_v29 = vshll.u32 %v2750_v54, 16  ;;  %v3126_v5 = vshrl.u32 %v2750_v54, 16  ;;  %v6002_v25 = vrot.slane %v4706_v45, 9  ;;  %v7837_v45 = vpop.f32.mrf.mxu2 }
 0x25c   : > { %v7810_v44 = vadd.f32 %v2018_v62, %v7529_v61  ;;  %v4305_v61 = vrot.slane %v4303_v19, 5  ;;  %v4308_v62 = vshrl.u32 %v7806_v33, 16  ;;  %v4828_v4 = vrot.slane %v4826_v57, 4  ;;  %8861 = vst [vmem:[#allocation76_spill] sm:$0xff] %v7837_v45 }
 0x25d   : > { %v3530_v31 = vsel %vm6532_vm15, %v5877_v52, %v3529_v63  ;;  %v3533_v47 = vsel %vm6532_vm15, %v3531_v24, %v3532_v41  ;;  %v4317_v19 = vshll.u32 %v7790_v1, 16  ;;  %v4321_v54 = vshrl.u32 %v7790_v1, 16 }
 0x25e   : > { %v4306_v37 = vsel %vm6497_vm11, %v4301_v10, %v4305_v61  ;;  %v3166_v22 = vunpack.c.l.b16 %v3101_v51  ;;  %v3167_v38 = vunpack.c.l.b16 %v3111_v11  ;;  %v4827_v10 = vsel %vm6532_vm15, %v6002_v25, %v4826_v57 }
 0x25f   : > { %v4829_v55 = vrot.slane %v7822_v56, 5  ;;  %v3115_v61 = vrot.slane %v3113_v18, 4  ;;  %v3118_v63 = vrot.slane %v3116_v32, 5  ;;  %v7841_v52 = vrot.slane %v3122_v29, 5  ;;  %v7854_v32 = vld [vmem:[#allocation2 + $0x94] sm:$0xf] }
 0x260   : > { %5984 = vmatmul.msk.bf16.gmra.mxu0 %vm1671_vm8, %v4516_v46  ;;  %v7839_v46 = vpop.f32.mrf.mxu0  ;;  %v3128_v24 = vrot.slane %v3126_v5, 4  ;;  %v3566_v9 = vunpack.c.l.b16 %v3530_v31  ;;  %v3567_v49 = vunpack.c.l.b16 %v3533_v47  ;;  %v3132_v1 = vshll.u32 %v7793_v48, 16  ;;  %v4707_v29 = vld [vmem:[#allocation2 + $0x90] sm:$0xe]  ;;  %v7856_v5 = vpop.f32.mrf.mxu1 }
 0x261   : > { %8862 = vst [vmem:[#allocation77_spill] sm:$0xff] %v7839_v46  ;;  %v4830_v51 = vsel %vm6532_vm15, %v4828_v4, %v4829_v55  ;;  %v7849_v11 = vunpack.c.l.b16 %v4296_v8  ;;  %v7851_v25 = vrot.slane %v4308_v62, 4  ;;  %v4311_v18 = vshll.u32 %v7806_v33, 16  ;;  %v7862_v4 = vld [vmem:[#allocation2 + $0x98] sm:$0x1] }
 0x262   : > { %8864 = vst [vmem:[#allocation79_spill] sm:$0xff] %v7856_v5  ;;  %v3184_v31 = vpack.c.b16 %v3167_v38, %v3166_v22  ;;  %v4494_v47 = vunpack.c.l.b16 %v4306_v37  ;;  %v7858_v48 = vrot.slane %v4317_v19, 5  ;;  %v7860_v46 = vrot.slane %v4321_v54, 4  ;;  %v7865_v55 = vld [vmem:[#allocation2 + $0xa0] sm:$0xf] }
 0x263   : > { %v2020_v41 = vpop.f32.mrf.mxu3  ;;  %v3119_v8 = vor.u32 %v3118_v63, %v3115_v61  ;;  %v3129_v62 = vor.u32 %v3128_v24, %v7841_v52  ;;  %v7867_v33 = vld [vmem:[#allocation2 + $0xa4] sm:$0x1]  ;;  %v4894_v20 = vunpack.c.l.b16 %v4830_v51  ;;  %v3583_v43 = vpack.c.b16 %v3567_v49, %v3566_v9  ;;  %v7869_v22 = vld [vmem:[#allocation2 + $0xb0] sm:$0x1]  ;;  %v4709_v24 = vld [vmem:[#allocation2 + $0xa8] sm:$0xe] }
 0x264   : > { %v7847_v57 = vadd.f32 %v2020_v41, %v7570_v36  ;;  %v4708_v36 = vld [vmem:[#allocation2 + $0x9c] sm:$0xe]  ;;  %v4893_v41 = vunpack.c.l.b16 %v4827_v10  ;;  %v3134_v5 = vrot.slane %v3132_v1, 5  ;;  %v6003_v37 = vrot.slane %v4707_v29, 9 }
 0x265   : > { %v4833_v19 = vrot.slane %v7854_v32, 5  ;;  %v4836_v38 = vrot.slane %v7862_v4, 5  ;;  %v6004_v61 = vrot.slane %v4708_v36, 9  ;;  %v4840_v63 = vrot.slane %v7865_v55, 5 }
 0x266   : > { %8863 = vst [vmem:[#allocation78_spill] sm:$0xff] %v7847_v57  ;;  %v7874_v54 = vpack.c.b16 %v4894_v20, %v4893_v41  ;;  %v4843_v10 = vrot.slane %v7867_v33, 5  ;;  %v6005_v1 = vrot.slane %v4709_v24, 9  ;;  %v3120_v51 = vrot.slane %v3119_v8, 4 }
 0x267   : > { %v4834_v9 = vsel %vm6532_vm15, %v6003_v37, %v4833_v19  ;;  %v4835_v49 = vrot.slane %v4833_v19, 4  ;;  %v3130_v29 = vrot.slane %v3129_v62, 4  ;;  %v4841_v20 = vsel %vm6532_vm15, %v6004_v61, %v4840_v63  ;;  %v7890_v19 = vpop.f32.mrf.mxu2  ;;  %v2040_v62 = vld [vmem:[#allocation2 + $0x54] sm:$0xe] }
 0x268   : > { %5754 = vmatmul.msk.bf16.gmra.mxu3 %vm1671_vm8, %v7804_v50  ;;  %v7882_v50 = vld [vmem:[#allocation2 + $0xac] sm:$0xf]  ;;  %v4842_v36 = vrot.slane %v4840_v63, 4  ;;  %v4850_v37 = vrot.slane %v7869_v22, 5  ;;  %8865 = vst [vmem:[#allocation80_spill] sm:$0xff] %v7890_v19  ;;  %v7892_v24 = vpop.f32.mrf.mxu0  ;;  %v4895_v61 = vunpack.c.l.b16 %v4834_v9  ;;  %v4517_v19 = vpack.c.b16 %v4494_v47, %v7849_v11 }
 0x269   : > { %v4837_v34 = vsel %vm6532_vm15, %v4835_v49, %v4836_v38  ;;  %v4847_v45 = vrot.slane %v7882_v50, 5  ;;  %8866 = vst [vmem:[#allocation81_spill] sm:$0xff] %v7892_v24  ;;  %v4313_v49 = vrot.slane %v4311_v18, 5  ;;  %v7907_v24 = vpop.f32.mrf.mxu1  ;;  %v8867_v9 = vrot.slane %v7795_v60, 5 }
 0x26a   : > { %5860 = vmatmul.msk.bf16.gmra.mxu1 %vm1671_vm8, %v3184_v31  ;;  %v4897_v31 = vunpack.c.l.b16 %v4841_v20  ;;  %v4896_v63 = vunpack.c.l.b16 %v4837_v34  ;;  %v4844_v38 = vsel %vm6532_vm15, %v4842_v36, %v4843_v10  ;;  %v5738_v34 = vrot.slane %v2040_v62, 9 }
 0x26b   : > { %v2023_v41 = vpop.f32.mrf.mxu3  ;;  %5894 = vmatmul.msk.bf16.gmra.mxu2 %vm1671_vm8, %v3583_v43  ;;  %v4898_v20 = vunpack.c.l.b16 %v4844_v38  ;;  %v4848_v27 = vsel %vm6532_vm15, %v6005_v1, %v4847_v45  ;;  %v4849_v57 = vrot.slane %v4847_v45, 4  ;;  %v2139_v18 = vsel %vm6532_vm15, %v7800_v26, %v8867_v9  ;;  %v7939_v38 = vld [vmem:[#allocation2 + $0xb8] sm:$0xf]  ;;  %v4710_v9 = vld [vmem:[#allocation2 + $0xb4] sm:$0xe] }
 0x26c   : > { %v7895_v8 = vadd.f32 %v2023_v41, %v7605_v2  ;;  %v4324_v2 = vor.u32 %v7860_v46, %v7858_v48  ;;  %v7905_v41 = vpack.c.b16 %v4896_v63, %v4895_v61  ;;  %v4899_v43 = vunpack.c.l.b16 %v4848_v27  ;;  %v6187_v63 = vld [vmem:[#allocation2 + $0x64] sm:$0xf] }
 0x26d   : > { %v7914_v10 = vpack.c.b16 %v4898_v20, %v4897_v31  ;;  %v4851_v45 = vsel %vm6532_vm15, %v4849_v57, %v4850_v37  ;;  %v3125_v27 = vsel %vm6497_vm11, %v3120_v51, %v7841_v52  ;;  %v3135_v46 = vsel %vm6497_vm11, %v3130_v29, %v3134_v5 }
 0x26e   : > { %v4327_v60 = vshll.u32 %v7822_v56, 16  ;;  %v4900_v11 = vunpack.c.l.b16 %v4851_v45  ;;  %v8868_v47 = vrot.slane %v7775_v15, 5  ;;  %v2213_v1 = vunpack.c.l.b16 %v2139_v18 }
 0x26f   : > { %v4314_v57 = vor.u32 %v4313_v49, %v7851_v25  ;;  %v4325_v36 = vrot.slane %v4324_v2, 4  ;;  %v3169_v52 = vunpack.c.l.b16 %v3135_v46  ;;  %v2142_v25 = vrot.slane %v6187_v63, 5  ;;  %v7941_v49 = vld [vmem:[#allocation2 + $0xbc] sm:$0x1]  ;;  %v4073_v2 = vld [vmem:[#allocation2 + $0x90] sm:$0xf] }
 0x270   : > { %5985 = vmatmul.msk.bf16.gmra.mxu0 %vm1671_vm8, %v4517_v19  ;;  %v2136_v26 = vsel %vm6532_vm15, %v5738_v34, %v8868_v47  ;;  %v7930_v31 = vpack.c.b16 %v4900_v11, %v4899_v43  ;;  %v3168_v19 = vunpack.c.l.b16 %v3125_v27  ;;  %v4329_v56 = vrot.slane %v4327_v60, 5  ;;  %v7935_v29 = vpop.f32.mrf.mxu0 }
 0x271   : > { %v2212_v5 = vunpack.c.l.b16 %v2136_v26  ;;  %8869 = vst [vmem:[#allocation82_spill] sm:$0xff] %v7935_v29  ;;  %v4315_v62 = vrot.slane %v4314_v57, 4  ;;  %v4345_v43 = vshrl.u32 %v7854_v32, 16  ;;  %v4854_v34 = vrot.slane %v7939_v38, 5  ;;  %v7947_v18 = vpop.f32.mrf.mxu1 }
 0x272   : > { %v4330_v61 = vsel %vm6497_vm11, %v4325_v36, %v4329_v56  ;;  %v3185_v20 = vpack.c.b16 %v3169_v52, %v3168_v19  ;;  %v6006_v27 = vrot.slane %v4710_v9, 9  ;;  %v4857_v60 = vrot.slane %v7941_v49, 5 }
 0x273   : > { %v2025_v37 = vpop.f32.mrf.mxu3  ;;  %v2237_v15 = vpack.c.b16 %v2213_v1, %v2212_v5  ;;  %v4320_v45 = vsel %vm6497_vm11, %v4315_v62, %v7858_v48  ;;  %v4856_v46 = vrot.slane %v4854_v34, 4  ;;  %v4496_v11 = vunpack.c.l.b16 %v4330_v61  ;;  %v2041_v5 = vld [vmem:[#allocation2 + $0x60] sm:$0xe]  ;;  %v6188_v62 = vld [vmem:[#allocation2 + $0x68] sm:$0x1] }
 0x274   : > { %v7933_v51 = vadd.f32 %v2025_v37, %v7640_v0  ;;  %v4341_v0 = vshll.u32 %v7854_v32, 16  ;;  %v2144_v47 = vrot.slane %v2142_v25, 4  ;;  %v4332_v32 = vshrl.u32 %v4073_v2, 16 }
 0x275   : > { %v4335_v26 = vshll.u32 %v4073_v2, 16  ;;  %v4347_v36 = vrot.slane %v4345_v43, 4  ;;  %v4855_v37 = vsel %vm6532_vm15, %v6006_v27, %v4854_v34  ;;  %v4858_v19 = vsel %vm6532_vm15, %v4856_v46, %v4857_v60 }
 0x276   : > { %v4343_v57 = vrot.slane %v4341_v0, 5  ;;  %v4495_v48 = vunpack.c.l.b16 %v4320_v45  ;;  %v4901_v56 = vunpack.c.l.b16 %v4855_v37  ;;  %v2145_v61 = vrot.slane %v6188_v62, 5 }
 0x277   : > { %v4337_v2 = vrot.slane %v4335_v26, 5  ;;  %v5739_v43 = vrot.slane %v2041_v5, 9  ;;  %v4351_v46 = vshll.u32 %v7862_v4, 16 }
 0x278   : > { %5755 = vmatmul.msk.bf16.gmra.mxu3 %vm1671_vm8, %v2237_v15  ;;  %v4902_v15 = vunpack.c.l.b16 %v4858_v19  ;;  %v4518_v63 = vpack.c.b16 %v4496_v11, %v4495_v48  ;;  %v2146_v34 = vsel %vm6532_vm15, %v2144_v47, %v2145_v61  ;;  %v4348_v9 = vor.u32 %v4347_v36, %v4343_v57  ;;  %v7965_v27 = vpop.f32.mrf.mxu0  ;;  %v4076_v36 = vld [vmem:[#allocation2 + $0x9c] sm:$0xf] }
 0x279   : > { %8870 = vst [vmem:[#allocation83_spill] sm:$0xff] %v7965_v27  ;;  %v2143_v45 = vsel %vm6532_vm15, %v5739_v43, %v2142_v25  ;;  %v2215_v11 = vunpack.c.l.b16 %v2146_v34  ;;  %v7975_v47 = vpop.f32.mrf.mxu1  ;;  %v4353_v48 = vrot.slane %v4351_v46, 5  ;;  %v6189_v25 = vld [vmem:[#allocation2 + $0x70] sm:$0xf]  ;;  %v4356_v4 = vshrl.u32 %v4076_v36, 16 }
 0x27a   : > { %5861 = vmatmul.msk.bf16.gmra.mxu1 %vm1671_vm8, %v3185_v20  ;;  %v4334_v20 = vrot.slane %v4332_v32, 4  ;;  %v7961_v0 = vpack.c.b16 %v4902_v15, %v4901_v56  ;;  %v2214_v19 = vunpack.c.l.b16 %v2143_v45  ;;  %v2149_v15 = vrot.slane %v6189_v25, 5 }
 0x27b   : > { %v2028_v1 = vpop.f32.mrf.mxu3  ;;  %v4359_v61 = vshll.u32 %v4076_v36, 16  ;;  %v4358_v45 = vrot.slane %v4356_v4, 4  ;;  %v4079_v4 = vld [vmem:[#allocation2 + $0xa8] sm:$0xf] }
 0x27c   : > { %v7959_v52 = vadd.f32 %v2028_v1, %v7670_v35  ;;  %v5179_v35 = vld [vmem:[%s8747_s5] sm:$0x3]  ;;  %v4338_v32 = vor.u32 %v4337_v2, %v4334_v20  ;;  %v4349_v1 = vrot.slane %v4348_v9, 4  ;;  %v2238_v5 = vpack.c.b16 %v2215_v11, %v2214_v19 }
 0x27d   : > { %v5233_v60 = vsel %vm1720_vm7, %v5179_v35, 0  ;;  %v4369_v20 = vshrl.u32 %v7865_v55, 16  ;;  %v2151_v34 = vrot.slane %v2149_v15, 4  ;;  %v2042_v35 = vld [vmem:[#allocation2 + $0x6c] sm:$0xe]  ;;  %v4361_v46 = vrot.slane %v4359_v61, 5 }
 0x27e   : > { %5242 = vmatpush.bf16.msra.mxu2 %v5233_v60  ;;  %v4339_v56 = vrot.slane %v4338_v32, 4  ;;  %v4354_v62 = vsel %vm6497_vm11, %v4349_v1, %v4353_v48 }
 0x27f   : > { %v4498_v43 = vunpack.c.l.b16 %v4354_v62  ;;  %v4371_v11 = vrot.slane %v4369_v20, 4  ;;  %v4362_v48 = vor.u32 %v4361_v46, %v4358_v45  ;;  %v6191_v46 = vld [vmem:[#allocation2 + $0x7c] sm:$0xf] }
 0x280   : > { %5986 = vmatmul.msk.bf16.gmra.mxu0 %vm1671_vm8, %v4518_v63  ;;  %v4365_v63 = vshll.u32 %v7865_v55, 16  ;;  %v7989_v2 = vpop.f32.mrf.mxu0 }
 0x281   : > { %8871 = vst [vmem:[#allocation84_spill] sm:$0xff] %v7989_v2  ;;  %v4363_v61 = vrot.slane %v4362_v48, 4 }
 0x282   : > { %v4367_v60 = vrot.slane %v4365_v63, 5 }
 0x283   : > { %v2030_v26 = vpop.f32.mrf.mxu3 }
 0x284   : > { %v7978_v37 = vadd.f32 %v2030_v26, %v7701_v42  ;;  %v4344_v42 = vsel %vm6497_vm11, %v4339_v56, %v4343_v57  ;;  %v6190_v26 = vld [vmem:[#allocation2 + $0x74] sm:$0x1]  ;;  %v5740_v57 = vrot.slane %v2042_v35, 9  ;;  %v4375_v56 = vshll.u32 %v7867_v33, 16 }
 0x285   : > { %v4497_v32 = vunpack.c.l.b16 %v4344_v42  ;;  %v2152_v1 = vrot.slane %v6190_v26, 5  ;;  %v4389_v35 = vshll.u32 %v7882_v50, 16  ;;  %v4393_v33 = vshrl.u32 %v7882_v50, 16 }
 0x286   : > { %v4377_v20 = vrot.slane %v4375_v56, 5 }
 0x287   : > { %v4519_v36 = vpack.c.b16 %v4498_v43, %v4497_v32  ;;  %v2153_v19 = vsel %vm6532_vm15, %v2151_v34, %v2152_v1  ;;  %v4380_v34 = vshrl.u32 %v4079_v4, 16  ;;  %v4368_v32 = vsel %vm6497_vm11, %v4363_v61, %v4367_v60 }
 0x288   : > { %5756 = vmatmul.msk.bf16.gmra.mxu3 %vm1671_vm8, %v2238_v5  ;;  %v4372_v5 = vor.u32 %v4371_v11, %v4367_v60  ;;  %v2217_v25 = vunpack.c.l.b16 %v2153_v19  ;;  %v8004_v42 = vpop.f32.mrf.mxu0  ;;  %v2156_v11 = vrot.slane %v6191_v46, 5  ;;  %v4395_v50 = vrot.slane %v4393_v33, 4 }
 0x289   : > { %8872 = vst [vmem:[#allocation85_spill] sm:$0xff] %v8004_v42  ;;  %v4382_v1 = vrot.slane %v4380_v34, 4  ;;  %v4499_v19 = vunpack.c.l.b16 %v4368_v32 }
 0x28a   : > { %6010 = vmatmul.msk.bf16.vlgmr.msra.gmra.mxu1 %vm1671_vm8, %v7091_v3  ;;  %v7994_v3 = vpop.f32.mrf.mxu1  ;;  %v4373_v63 = vrot.slane %v4372_v5, 4  ;;  %v2158_v5 = vrot.slane %v2156_v11, 4 }
 0x28b   : > { %v2306_v9 = vpop.f32.mrf.mxu3 }
 0x28c   : > { %v7992_v55 = vadd.f32 %v2306_v9, %v6713_v23  ;;  %v2150_v23 = vsel %vm6532_vm15, %v5740_v57, %v2149_v15  ;;  %v4383_v9 = vshll.u32 %v4079_v4, 16  ;;  %v4378_v26 = vsel %vm6497_vm11, %v4373_v63, %v4377_v20 }
 0x28d   : > { %v2216_v43 = vunpack.c.l.b16 %v2150_v23  ;;  %v4391_v57 = vrot.slane %v4389_v35, 5  ;;  %v4500_v48 = vunpack.c.l.b16 %v4378_v26  ;;  %v2043_v23 = vld [vmem:[#allocation2 + $0x78] sm:$0xe]  ;;  %v4399_v20 = vshll.u32 %v7869_v22, 16 }
 0x28e   : > { %v5741_v34 = vrot.slane %v2043_v23, 9  ;;  %v4417_v23 = vshrl.u32 %v7939_v38, 16 }
 0x28f   : > { %v2239_v45 = vpack.c.b16 %v2217_v25, %v2216_v43  ;;  %v6192_v25 = vld [vmem:[#allocation2 + $0x80] sm:$0x1]  ;;  %v4396_v63 = vor.u32 %v4395_v50, %v4391_v57  ;;  %v4401_v32 = vrot.slane %v4399_v20, 5 }
 0x290   : > { %5987 = vmatmul.msk.bf16.gmra.mxu0 %vm1671_vm8, %v4519_v36  ;;  %v4385_v36 = vrot.slane %v4383_v9, 5  ;;  %v2159_v4 = vrot.slane %v6192_v25, 5  ;;  %v8021_v43 = vpop.f32.mrf.mxu0  ;;  %v2157_v35 = vsel %vm6532_vm15, %v5741_v34, %v2156_v11  ;;  %v6193_v25 = vld [vmem:[#allocation2 + $0x88] sm:$0xf]  ;;  %v4419_v34 = vrot.slane %v4417_v23, 4 }
 0x291   : > { %v4397_v46 = vrot.slane %v4396_v63, 4  ;;  %v2218_v22 = vunpack.c.l.b16 %v2157_v35 }
 0x292   : > { %v8008_v15 = vpop.f32.mrf.mxu1  ;;  %v4386_v61 = vor.u32 %v4385_v36, %v4382_v1  ;;  %v2160_v9 = vsel %vm6532_vm15, %v2158_v5, %v2159_v4  ;;  %v4082_v1 = vld [vmem:[#allocation2 + $0xb4] sm:$0xf]  ;;  %v2163_v4 = vrot.slane %v6193_v25, 5 }
 0x293   : > { %v8002_v62 = vpop.f32.mrf.mxu3  ;;  %v4404_v11 = vshrl.u32 %v4082_v1, 16  ;;  %v4407_v5 = vshll.u32 %v4082_v1, 16 }
 0x295   : > { %v4406_v63 = vrot.slane %v4404_v11, 4  ;;  %v4409_v20 = vrot.slane %v4407_v5, 5 }
 0x298   : > { %5757 = vmatmul.msk.bf16.gmra.mxu3 %vm1671_vm8, %v2239_v45  ;;  %v4387_v45 = vrot.slane %v4386_v61, 4  ;;  %v8039_v61 = vpop.f32.mrf.mxu0 }
 0x29a   : > { %6011 = vmatmul.msk.bf16.gmra.mxu1 %vm1671_vm8, %v7114_v39  ;;  %v4520_v39 = vpack.c.b16 %v4500_v48, %v4499_v19  ;;  %v8028_v33 = vpop.f32.mrf.mxu1  ;;  %v4392_v19 = vsel %vm6497_vm11, %v4387_v45, %v4391_v57  ;;  %v4402_v48 = vsel %vm6497_vm11, %v4397_v46, %v4401_v32  ;;  %v2044_v45 = vld [vmem:[#allocation2 + $0x84] sm:$0xe]  ;;  %v6194_v46 = vld [vmem:[#allocation2 + $0x8c] sm:$0x1] }
 0x29b   : > { %v2311_v56 = vpop.f32.mrf.mxu3  ;;  %8873 = vst [vmem:[#allocation86_spill] sm:$0xff] %v8028_v33  ;;  %v4502_v57 = vunpack.c.l.b16 %v4402_v48  ;;  %v2166_v32 = vrot.slane %v6194_v46, 5 }
 0x29c   : > { %v8018_v60 = vadd.f32 %v2311_v56, %v6793_v13  ;;  %v2219_v13 = vunpack.c.l.b16 %v2160_v9  ;;  %v4413_v56 = vshll.u32 %v7939_v38, 16 }
 0x29e   : > { %v2240_v50 = vpack.c.b16 %v2219_v13, %v2218_v22  ;;  %v2165_v13 = vrot.slane %v2163_v4, 4  ;;  %v4410_v22 = vor.u32 %v4409_v20, %v4406_v63  ;;  %v8060_v63 = vld [vmem:[#allocation2 + $0xc4] sm:$0xf] }
 0x2a0   : > { %5988 = vmatmul.msk.bf16.gmra.mxu0 %vm1671_vm8, %v4520_v39  ;;  %v4415_v39 = vrot.slane %v4413_v56, 5  ;;  %v8055_v11 = vpop.f32.mrf.mxu0  ;;  %v4411_v5 = vrot.slane %v4410_v22, 4 }
 0x2a2   : > { %v8044_v9 = vpop.f32.mrf.mxu1  ;;  %v4420_v1 = vor.u32 %v4419_v34, %v4415_v39 }
 0x2a3   : > { %v2313_v26 = vpop.f32.mrf.mxu3  ;;  %8874 = vst [vmem:[#allocation87_spill] sm:$0xff] %v8044_v9 }
 0x2a4   : > { %v8031_v36 = vadd.f32 %v2313_v26, %v6818_v16  ;;  %v4501_v16 = vunpack.c.l.b16 %v4392_v19  ;;  %v2167_v19 = vsel %vm6532_vm15, %v2165_v13, %v2166_v32  ;;  %v4421_v56 = vrot.slane %v4420_v1, 4  ;;  %v6195_v13 = vld [vmem:[#allocation2 + $0x94] sm:$0xf] }
 0x2a6   : > { %v4521_v26 = vpack.c.b16 %v4502_v57, %v4501_v16  ;;  %v4085_v57 = vld [vmem:[#allocation2 + $0xc0] sm:$0xf] }
 0x2a7   : > { %v4428_v46 = vshrl.u32 %v4085_v57, 16  ;;  %v4431_v32 = vshll.u32 %v4085_v57, 16 }
 0x2a8   : > { %5758 = vmatmul.msk.bf16.gmra.mxu3 %vm1671_vm8, %v2240_v50  ;;  %v5742_v50 = vrot.slane %v2044_v45, 9  ;;  %v2170_v45 = vrot.slane %v6195_v13, 5 }
 0x2aa   : > { %6012 = vmatmul.msk.bf16.gmra.mxu1 %vm1671_vm8, %v7145_v53  ;;  %v4423_v53 = vshll.u32 %v7941_v49, 16  ;;  %v2164_v48 = vsel %vm6532_vm15, %v5742_v50, %v2163_v4  ;;  %v8062_v20 = vpop.f32.mrf.mxu1  ;;  %v4416_v4 = vsel %vm6497_vm11, %v4411_v5, %v4415_v39  ;;  %v2045_v50 = vld [vmem:[#allocation2 + $0x90] sm:$0xe] }
 0x2ab   : > { %v2316_v35 = vpop.f32.mrf.mxu3  ;;  %v2220_v49 = vunpack.c.l.b16 %v2164_v48  ;;  %8875 = vst [vmem:[#allocation88_spill] sm:$0xff] %v8062_v20  ;;  %v4503_v22 = vunpack.c.l.b16 %v4416_v4  ;;  %v4433_v48 = vrot.slane %v4431_v32, 5 }
 0x2ac   : > { %v8047_v38 = vadd.f32 %v2316_v35, %v6840_v17  ;;  %v2221_v17 = vunpack.c.l.b16 %v2167_v19  ;;  %v4425_v23 = vrot.slane %v4423_v53, 5  ;;  %v2172_v53 = vrot.slane %v2170_v45, 4 }
 0x2ad   : > { %v4430_v19 = vrot.slane %v4428_v46, 4 }
 0x2ae   : > { %v2241_v34 = vpack.c.b16 %v2221_v17, %v2220_v49  ;;  %v4426_v35 = vsel %vm6497_vm11, %v4421_v56, %v4425_v23  ;;  %v8073_v56 = vpop.f32.mrf.mxu0  ;;  %v6196_v49 = vld [vmem:[#allocation2 + $0x98] sm:$0x1] }
 0x2af   : > { %v4504_v1 = vunpack.c.l.b16 %v4426_v35  ;;  %v2173_v57 = vrot.slane %v6196_v49, 5  ;;  %v4434_v13 = vor.u32 %v4433_v48, %v4430_v19 }
 0x2b0   : > { %5989 = vmatmul.msk.bf16.gmra.mxu0 %vm1671_vm8, %v4521_v26  ;;  %v4441_v26 = vshrl.u32 %v8060_v63, 16 }
 0x2b1   : > { %v2174_v35 = vsel %vm6532_vm15, %v2172_v53, %v2173_v57  ;;  %v2046_v57 = vld [vmem:[#allocation2 + $0x9c] sm:$0xe] }
 0x2b2   : > { %v4443_v5 = vrot.slane %v4441_v26, 4  ;;  %v8080_v4 = vpop.f32.mrf.mxu1 }
 0x2b3   : > { %v2318_v25 = vpop.f32.mrf.mxu3  ;;  %8876 = vst [vmem:[#allocation89_spill] sm:$0xff] %v8080_v4 }
 0x2b4   : > { %v8058_v16 = vadd.f32 %v2318_v25, %v6867_v30  ;;  %v4437_v30 = vshll.u32 %v8060_v63, 16  ;;  %v8078_v25 = vld [vmem:[#allocation2 + $0xc8] sm:$0x1] }
 0x2b5   : > { %v4447_v32 = vshll.u32 %v8078_v25, 16 }
 0x2b6   : > { %v4439_v17 = vrot.slane %v4437_v30, 5  ;;  %v2223_v30 = vunpack.c.l.b16 %v2174_v35  ;;  %v8091_v2 = vpop.f32.mrf.mxu0  ;;  %v6198_v35 = vld [vmem:[#allocation2 + $0xa4] sm:$0x1] }
 0x2b8   : > { %5759 = vmatmul.msk.bf16.gmra.mxu3 %vm1671_vm8, %v2241_v34  ;;  %v4522_v34 = vpack.c.b16 %v4504_v1, %v4503_v22  ;;  %v4444_v46 = vor.u32 %v4443_v5, %v4439_v17  ;;  %v4449_v22 = vrot.slane %v4447_v32, 5  ;;  %v6197_v5 = vld [vmem:[#allocation2 + $0xa0] sm:$0xf]  ;;  %v5744_v32 = vrot.slane %v2046_v57, 9  ;;  %v8879_v57 = vld [vmem:[#allocation46_spill] sm:$0xff] }
 0x2ba   : > { %6013 = vmatmul.msk.bf16.gmra.mxu1 %vm1671_vm8, %v7190_v58  ;;  %v5743_v58 = vrot.slane %v2045_v50, 9  ;;  %v4445_v49 = vrot.slane %v4444_v46, 4 }
 0x2bb   : > { %v2321_v39 = vpop.f32.mrf.mxu3 }
 0x2bc   : > { %v8076_v23 = vadd.f32 %v2321_v39, %v6897_v28  ;;  %v2171_v28 = vsel %vm6532_vm15, %v5743_v58, %v2170_v45  ;;  %v4435_v39 = vrot.slane %v4434_v13, 4  ;;  %v4450_v48 = vsel %vm6497_vm11, %v4445_v49, %v4449_v22 }
 0x2bd   : > { %v2222_v50 = vunpack.c.l.b16 %v2171_v28  ;;  %v2177_v45 = vrot.slane %v6197_v5, 5  ;;  %v4506_v58 = vunpack.c.l.b16 %v4450_v48  ;;  %v2180_v13 = vrot.slane %v6198_v35, 5  ;;  %v6199_v48 = vld [vmem:[#allocation2 + $0xac] sm:$0xf] }
 0x2be   : > { %v4440_v19 = vsel %vm6497_vm11, %v4435_v39, %v4439_v17  ;;  %v8109_v49 = vpop.f32.mrf.mxu0  ;;  %v2184_v5 = vrot.slane %v6199_v48, 5  ;;  %v4861_v48 = vrot.slane %v8060_v63, 5 }
 0x2bf   : > { %v2242_v53 = vpack.c.b16 %v2223_v30, %v2222_v50  ;;  %v2179_v17 = vrot.slane %v2177_v45, 4 }
 0x2c0   : > { %5990 = vmatmul.msk.bf16.gmra.mxu0 %vm1671_vm8, %v4522_v34  ;;  %v8098_v34 = vpop.f32.mrf.mxu1  ;;  %v4863_v29 = vrot.slane %v4861_v48, 4 }
 0x2c1   : > { %8877 = vst [vmem:[#allocation90_spill] sm:$0xff] %v8098_v34  ;;  %v2181_v39 = vsel %vm6532_vm15, %v2179_v17, %v2180_v13  ;;  %v8916_v34 = vld [vmem:[#allocation78_spill] sm:$0xff] }
 0x2c2   : > { %v2225_v22 = vunpack.c.l.b16 %v2181_v39 }
 0x2c3   : > { %v2323_v26 = vpop.f32.mrf.mxu3 }
 0x2c4   : > { %v8089_v1 = vadd.f32 %v2323_v26, %v6923_v7  ;;  %v4505_v7 = vunpack.c.l.b16 %v4440_v19  ;;  %v2178_v26 = vsel %vm6532_vm15, %v5744_v32, %v2177_v45  ;;  %v2047_v45 = vld [vmem:[#allocation2 + $0xa8] sm:$0xe] }
 0x2c5   : > { %v5745_v13 = vrot.slane %v2047_v45, 9  ;;  %v8880_v32 = vld [vmem:[#allocation20_spill] sm:$0xff] }
 0x2c6   : > { %v4523_v30 = vpack.c.b16 %v4506_v58, %v4505_v7  ;;  %v6200_v7 = vld [vmem:[#allocation2 + $0xb0] sm:$0x1]  ;;  %v8287_v9 = vpop.f32.mrf.mxu0 }
 0x2c7   : > { %v2187_v58 = vrot.slane %v6200_v7, 5 }
 0x2c8   : > { %5760 = vmatmul.msk.bf16.gmra.mxu3 %vm1671_vm8, %v2242_v53  ;;  %v8112_v50 = vpop.f32.mrf.mxu1 }
 0x2c9   : > { %8878 = vst [vmem:[#allocation91_spill] sm:$0xff] %v8112_v50 }
 0x2ca   : > { %6014 = vmatmul.msk.bf16.gmra.mxu1 %vm1671_vm8, %v7317_v21  ;;  %v2224_v21 = vunpack.c.l.b16 %v2178_v26 }
 0x2cb   : > { %v2326_v46 = vpop.f32.mrf.mxu3 }
 0x2cc   : > { %v8103_v28 = vadd.f32 %v2326_v46, %v6949_v12  ;;  %v2243_v12 = vpack.c.b16 %v2225_v22, %v2224_v21  ;;  %v2186_v46 = vrot.slane %v2184_v5, 4 }
 0x2ce   : > { %v2188_v26 = vsel %vm6532_vm15, %v2186_v46, %v2187_v58  ;;  %v2048_v58 = vld [vmem:[#allocation2 + $0xb4] sm:$0xe] }
 0x2cf   : > { %v2227_v21 = vunpack.c.l.b16 %v2188_v26 }
 0x2d0   : > { %5991 = vmatmul.msk.bf16.gmra.mxu0 %vm1671_vm8, %v4523_v30  ;;  %v8123_v30 = vpop.f32.mrf.mxu1 }
 0x2d1   : > { %8881 = vst [vmem:[#allocation46_spill] sm:$0xff] %v8123_v30 }
 0x2d3   : > { %v2328_v53 = vpop.f32.mrf.mxu3 }
 0x2d4   : > { %v8115_v19 = vadd.f32 %v2328_v53, %v6964_v59  ;;  %v2185_v59 = vsel %vm6532_vm15, %v5745_v13, %v2184_v5  ;;  %v8882_v53 = vld [vmem:[#allocation22_spill] sm:$0xff]  ;;  %v4864_v5 = vrot.slane %v8078_v25, 5  ;;  %v8885_v25 = vld [vmem:[#allocation24_spill] sm:$0xff] }
 0x2d5   : > { %v2226_v39 = vunpack.c.l.b16 %v2185_v59  ;;  %v8884_v13 = vld [vmem:[#allocation50_spill] sm:$0xff] }
 0x2d6   : > { %v4865_v63 = vsel %vm6532_vm15, %v4863_v29, %v4864_v5 }
 0x2d7   : > { %v2244_v45 = vpack.c.b16 %v2227_v21, %v2226_v39  ;;  %v4904_v26 = vunpack.c.l.b16 %v4865_v63  ;;  %v6202_v39 = vld [vmem:[#allocation2 + $0xbc] sm:$0x1] }
 0x2d8   : > { %5761 = vmatmul.msk.bf16.gmra.mxu3 %vm1671_vm8, %v2243_v12  ;;  %v8133_v7 = vpop.f32.mrf.mxu1  ;;  %v2194_v21 = vrot.slane %v6202_v39, 5  ;;  %v8887_v63 = vld [vmem:[#allocation26_spill] sm:$0xff] }
 0x2d9   : > { %8883 = vst [vmem:[#allocation20_spill] sm:$0xff] %v8133_v7  ;;  %v6101_v7 = vld [vmem:[#allocation2 + $0x48] sm:$0xff] }
 0x2da   : > { %6015 = vmatmul.msk.bf16.gmra.mxu1 %vm1671_vm8, %v8879_v57  ;;  %v4711_v57 = vld [vmem:[#allocation2 + $0xc0] sm:$0xe] }
 0x2db   : > { %v2331_v35 = vpop.f32.mrf.mxu3  ;;  %v6007_v27 = vrot.slane %v4711_v57, 9 }
 0x2dc   : > { %v8121_v17 = vadd.f32 %v2331_v35, %v8880_v32  ;;  %v6201_v35 = vld [vmem:[#allocation2 + $0xb8] sm:$0xf] }
 0x2dd   : > { %v2191_v32 = vrot.slane %v6201_v35, 5  ;;  %v4862_v46 = vsel %vm6532_vm15, %v6007_v27, %v4861_v48 }
 0x2de   : > { %v4903_v59 = vunpack.c.l.b16 %v4862_v46 }
 0x2df   : > { %v2193_v57 = vrot.slane %v2191_v32, 4 }
 0x2e0   : > { %v8152_v48 = vpop.f32.mrf.mxu1 }
 0x2e1   : > { %v2195_v27 = vsel %vm6532_vm15, %v2193_v57, %v2194_v21  ;;  %8886 = vst [vmem:[#allocation22_spill] sm:$0xff] %v8152_v48  ;;  %v8891_v57 = vld [vmem:[#allocation29_spill] sm:$0xff] }
 0x2e2   : > { %v2229_v5 = vunpack.c.l.b16 %v2195_v27  ;;  %v6097_v27 = vld [vmem:[#allocation2 + $0x18] sm:$0xff] }
 0x2e3   : > { %v2333_v22 = vpop.f32.mrf.mxu3 }
 0x2e4   : > { %v8130_v12 = vadd.f32 %v2333_v22, %v8882_v53  ;;  %v5746_v53 = vrot.slane %v2048_v58, 9 }
 0x2e8   : > { %5762 = vmatmul.msk.bf16.gmra.mxu3 %vm1671_vm8, %v2244_v45  ;;  %v8146_v45 = vpack.c.b16 %v4904_v26, %v4903_v59  ;;  %v8160_v59 = vpop.f32.mrf.mxu1  ;;  %v8890_v26 = vld [vmem:[#allocation27_spill] sm:$0xff] }
 0x2e9   : > { %8889 = vst [vmem:[#allocation50_spill] sm:$0xff] %v8160_v59 }
 0x2ea   : > { %6016 = vmatmul.msk.bf16.gmra.mxu1 %vm1671_vm8, %v8884_v13  ;;  %v2192_v13 = vsel %vm6532_vm15, %v5746_v53, %v2191_v32 }
 0x2eb   : > { %v2336_v22 = vpop.f32.mrf.mxu3  ;;  %v2228_v29 = vunpack.c.l.b16 %v2192_v13 }
 0x2ec   : > { %v8144_v35 = vadd.f32 %v2336_v22, %v8885_v25  ;;  %v8888_v22 = vld [vmem:[#allocation57_spill] sm:$0xff] }
 0x2ed   : > { %v2245_v58 = vpack.c.b16 %v2229_v5, %v2228_v29  ;;  %v8893_v29 = vld [vmem:[#allocation62_spill] sm:$0xff] }
 0x2f0   : > { %v8168_v13 = vpop.f32.mrf.mxu1 }
 0x2f1   : > { %8892 = vst [vmem:[#allocation24_spill] sm:$0xff] %v8168_v13 }
 0x2f3   : > { %v2338_v46 = vpop.f32.mrf.mxu3 }
 0x2f4   : > { %v8155_v39 = vadd.f32 %v2338_v46, %v8887_v63  ;;  %v8894_v46 = vld [vmem:[#allocation31_spill] sm:$0xff] }
 0x2f8   : > { %5763 = vmatmul.msk.bf16.gmra.mxu3 %vm1671_vm8, %v2245_v58  ;;  %v8176_v58 = vpop.f32.mrf.mxu1 }
 0x2f9   : > { %8895 = vst [vmem:[#allocation26_spill] sm:$0xff] %v8176_v58  ;;  %v8901_v58 = vld [vmem:[#allocation36_spill] sm:$0xff] }
 0x2fa   : > { %6017 = vmatmul.msk.bf16.gmra.mxu1 %vm1671_vm8, %v8888_v22 }
 0x2fb   : > { %v2341_v32 = vpop.f32.mrf.mxu3 }
 0x2fc   : > { %v8163_v53 = vadd.f32 %v2341_v32, %v8890_v26  ;;  %v8896_v32 = vld [vmem:[#allocation33_spill] sm:$0xff] }
 0x303   : > { %v2343_v21 = vpop.f32.mrf.mxu3 }
 0x304   : > { %v8166_v25 = vadd.f32 %v2343_v21, %v8891_v57  ;;  %v6098_v21 = vld [vmem:[#allocation2 + $0x24] sm:$0xff]  ;;  %v8182_v57 = vpop.f32.mrf.mxu1 }
 0x305   : > { %8897 = vst [vmem:[#allocation57_spill] sm:$0xff] %v8182_v57 }
 0x308   : > { %5960 = vmatmul.msk.bf16.vlgmr.msra.gmra.mxu3 %vm1671_vm8, %v6097_v27 }
 0x30a   : > { %6018 = vmatmul.msk.bf16.gmra.mxu1 %vm1671_vm8, %v8893_v29  ;;  %v8898_v29 = vld [vmem:[#allocation35_spill] sm:$0xff] }
 0x30b   : > { %v2346_v5 = vpop.f32.mrf.mxu3 }
 0x30c   : > { %v8174_v63 = vadd.f32 %v2346_v5, %v8894_v46  ;;  %v8189_v5 = vpop.f32.mrf.mxu1 }
 0x30d   : > { %8900 = vst [vmem:[#allocation29_spill] sm:$0xff] %v8189_v5  ;;  %v8205_v5 = vpop.f32.mrf.mxu2 }
 0x313   : > { %v2348_v22 = vpop.f32.mrf.mxu3 }
 0x314   : > { %v8179_v26 = vadd.f32 %v2348_v22, %v8896_v32  ;;  %v6099_v22 = vld [vmem:[#allocation2 + $0x30] sm:$0xff] }
 0x318   : > { %5961 = vmatmul.msk.bf16.gmra.mxu3 %vm1671_vm8, %v6098_v21  ;;  %v8903_v21 = vld [vmem:[#allocation38_spill] sm:$0xff] }
 0x31a   : > { %6019 = vmatmul.msk.bf16.gmra.mxu1 %vm1671_vm8, %v7874_v54  ;;  %v8200_v54 = vpop.f32.mrf.mxu1 }
 0x31b   : > { %v2351_v27 = vpop.f32.mrf.mxu3  ;;  %8905 = vst [vmem:[#allocation33_spill] sm:$0xff] %v8200_v54 }
 0x31c   : > { %v8187_v13 = vadd.f32 %v2351_v27, %v8898_v29  ;;  %v8906_v29 = vld [vmem:[#allocation40_spill] sm:$0xff] }
 0x31e   : > { %8899 = vst [vmem:[#allocation27_spill] sm:$0xff] %v8187_v13  ;;  %v8935_v13 = vld [vmem:[#allocation53_spill] sm:$0xff] }
 0x323   : > { %v2353_v46 = vpop.f32.mrf.mxu3 }
 0x324   : > { %v8192_v42 = vadd.f32 %v2353_v46, %v8901_v58  ;;  %v6100_v58 = vld [vmem:[#allocation2 + $0x3c] sm:$0xff]  ;;  %v8207_v46 = vpop.f32.mrf.mxu1 }
 0x326   : > { %8902 = vst [vmem:[#allocation62_spill] sm:$0xff] %v8192_v42 }
 0x328   : > { %5962 = vmatmul.msk.bf16.gmra.mxu3 %vm1671_vm8, %v6099_v22  ;;  %v8908_v22 = vld [vmem:[#allocation42_spill] sm:$0xff] }
 0x32a   : > { %6020 = vmatmul.msk.bf16.gmra.mxu1 %vm1671_vm8, %v7905_v41 }
 0x32b   : > { %v2356_v32 = vpop.f32.mrf.mxu3 }
 0x32c   : > { %v8198_v57 = vadd.f32 %v2356_v32, %v8903_v21  ;;  %v8215_v21 = vpop.f32.mrf.mxu2  ;;  %v8217_v54 = vpop.f32.mrf.mxu1 }
 0x32e   : > { %8904 = vst [vmem:[#allocation31_spill] sm:$0xff] %v8198_v57 }
 0x333   : > { %v2358_v27 = vpop.f32.mrf.mxu3 }
 0x334   : > { %v8203_v59 = vadd.f32 %v2358_v27, %v8906_v29  ;;  %v8910_v29 = vld [vmem:[#allocation44_spill] sm:$0xff]  ;;  %v8223_v30 = vpop.f32.mrf.mxu2 }
 0x336   : > { %8907 = vst [vmem:[#allocation35_spill] sm:$0xff] %v8203_v59 }
 0x338   : > { %5963 = vmatmul.msk.bf16.gmra.mxu3 %vm1671_vm8, %v6100_v58 }
 0x33a   : > { %6021 = vmatmul.msk.bf16.gmra.mxu1 %vm1671_vm8, %v7914_v10  ;;  %v8227_v10 = vpop.f32.mrf.mxu1 }
 0x33b   : > { %v2361_v41 = vpop.f32.mrf.mxu3 }
 0x33c   : > { %v8213_v32 = vadd.f32 %v2361_v41, %v8908_v22  ;;  %v8912_v41 = vld [vmem:[#allocation69_spill] sm:$0xff]  ;;  %v8232_v50 = vpop.f32.mrf.mxu2 }
 0x33e   : > { %8909 = vst [vmem:[#allocation36_spill] sm:$0xff] %v8213_v32 }
 0x343   : > { %v2363_v27 = vpop.f32.mrf.mxu3 }
 0x344   : > { %v8220_v48 = vadd.f32 %v2363_v27, %v8910_v29  ;;  %v8237_v29 = vpop.f32.mrf.mxu1 }
 0x346   : > { %8911 = vst [vmem:[#allocation38_spill] sm:$0xff] %v8220_v48 }
 0x348   : > { %5964 = vmatmul.msk.bf16.gmra.mxu3 %vm1671_vm8, %v6101_v7  ;;  %v6102_v7 = vld [vmem:[#allocation2 + $0x54] sm:$0xff] }
 0x34a   : > { %6022 = vmatmul.msk.bf16.gmra.mxu1 %vm1671_vm8, %v7930_v31 }
 0x34b   : > { %v2366_v58 = vpop.f32.mrf.mxu3 }
 0x34c   : > { %v8230_v22 = vadd.f32 %v2366_v58, %v8912_v41  ;;  %v8245_v58 = vpop.f32.mrf.mxu2  ;;  %v8247_v41 = vpop.f32.mrf.mxu1 }
 0x34e   : > { %8913 = vst [vmem:[#allocation40_spill] sm:$0xff] %v8230_v22 }
 0x353   : > { %v2368_v32 = vpop.f32.mrf.mxu3 }
 0x354   : > { %v8235_v27 = vadd.f32 %v2368_v32, %v7766_v14  ;;  %v6103_v32 = vld [vmem:[#allocation2 + $0x60] sm:$0xff] }
 0x356   : > { %8914 = vst [vmem:[#allocation42_spill] sm:$0xff] %v8235_v27  ;;  %v8252_v27 = vpop.f32.mrf.mxu2 }
 0x358   : > { %5965 = vmatmul.msk.bf16.gmra.mxu3 %vm1671_vm8, %v6102_v7  ;;  %v8255_v7 = vpop.f32.mrf.mxu1 }
 0x35a   : > { %6023 = vmatmul.msk.bf16.gmra.mxu1 %vm1671_vm8, %v7961_v0 }
 0x35b   : > { %v2371_v31 = vpop.f32.mrf.mxu3 }
 0x35c   : > { %v8243_v48 = vadd.f32 %v2371_v31, %v7810_v44 }
 0x35e   : > { %8915 = vst [vmem:[#allocation44_spill] sm:$0xff] %v8243_v48  ;;  %v8262_v31 = vpop.f32.mrf.mxu2 }
 0x363   : > { %v2373_v22 = vpop.f32.mrf.mxu3 }
 0x364   : > { %v8250_v14 = vadd.f32 %v2373_v22, %v8916_v34  ;;  %v6104_v22 = vld [vmem:[#allocation2 + $0x6c] sm:$0xff] }
 0x366   : > { %8917 = vst [vmem:[#allocation69_spill] sm:$0xff] %v8250_v14  ;;  %v8268_v14 = vpop.f32.mrf.mxu2 }
 0x368   : > { %5966 = vmatmul.msk.bf16.gmra.mxu3 %vm1671_vm8, %v6103_v32 }
 0x36a   : > { %6024 = vmatmul.msk.bf16.gmra.mxu1 %vm1671_vm8, %v8146_v45  ;;  %v8921_v45 = vld [vmem:[#allocation14_spill] sm:$0xff] }
 0x36b   : > { %v2376_v44 = vpop.f32.mrf.mxu3  ;;  %v2672_v4 = vadd.f32 %v8921_v45, %v7992_v55 }
 0x36c   : > { %v8260_v0 = vadd.f32 %v2376_v44, %v7895_v8  ;;  %v8922_v44 = vld [vmem:[#allocation13_spill] sm:$0xff] }
 0x36e   : > { %8918 = vst [vmem:[#allocation78_spill] sm:$0xff] %v8260_v0  ;;  %v8923_v0 = vld [vmem:[#allocation12_spill] sm:$0xff] }
 0x36f   : > { %v1956_v57 = vadd.f32 %v8923_v0, %v8922_v44  ;;  %v8289_v44 = vpop.f32.mrf.mxu1 }
 0x373   : > { %v2378_v48 = vpop.f32.mrf.mxu3 }
 0x374   : > { %v8265_v34 = vadd.f32 %v2378_v48, %v7933_v51  ;;  %v8280_v51 = vpop.f32.mrf.mxu2  ;;  %v2387_v48 = vadd.f32 %v8002_v62, %v1956_v57 }
 0x376   : > { %8919 = vst [vmem:[#allocation92_spill] sm:$0xff] %v8265_v34  ;;  %v8925_v34 = vld [vmem:[#allocation45_spill] sm:$0xff] }
 0x377   : > { %v3326_v42 = vadd.f32 %v8925_v34, %v2672_v4  ;;  %v8930_v4 = vld [vmem:[#allocation16_spill] sm:$0xff]  ;;  %v8931_v34 = vld [vmem:[#allocation59_spill] sm:$0xff] }
 0x378   : > { %5967 = vmatmul.msk.bf16.gmra.mxu3 %vm1671_vm8, %v6104_v22  ;;  %v6105_v22 = vld [vmem:[#allocation2 + $0x78] sm:$0xff]  ;;  %v2674_v57 = vadd.f32 %v8930_v4, %v8018_v60 }
 0x37b   : > { %v2381_v32 = vpop.f32.mrf.mxu3 }
 0x37c   : > { %v8271_v59 = vadd.f32 %v2381_v32, %v7959_v52  ;;  %v8926_v52 = vld [vmem:[#allocation15_spill] sm:$0xff] }
 0x37d   : > { %v2673_v32 = vadd.f32 %v8926_v52, %v2387_v48 }
 0x37e   : > { %8920 = vst [vmem:[#allocation93_spill] sm:$0xff] %v8271_v59  ;;  %v8927_v59 = vld [vmem:[#allocation54_spill] sm:$0xff] }
 0x37f   : > { %v3724_v55 = vadd.f32 %v8927_v59, %v3326_v42  ;;  %v8302_v59 = vld [vmem:[%s8746_s4] ss:$0 sm:$0xff] }
 0x383   : > { %v2383_v8 = vpop.f32.mrf.mxu3 }
 0x384   : > { %v8278_v20 = vadd.f32 %v2383_v8, %v7978_v37  ;;  %v8928_v37 = vld [vmem:[#allocation48_spill] sm:$0xff] }
 0x385   : > { %v3327_v8 = vadd.f32 %v8928_v37, %v2673_v32  ;;  %v8308_v37 = vpop.f32.mrf.mxu1 }
 0x386   : > { %8924 = vst [vmem:[#allocation14_spill] sm:$0xff] %v8278_v20  ;;  %v8292_v20 = vpop.f32.mrf.mxu2 }
 0x387   : > { %8929 = vst [vmem:[#allocation13_spill] sm:$0xff] %v8292_v20 }
 0x388   : > { %5968 = vmatmul.msk.bf16.gmra.mxu3 %vm1671_vm8, %v6105_v22  ;;  %v3725_v22 = vadd.f32 %v8931_v34, %v3327_v8 }
 0x38b   : > { %v3931_v45 = vpop.f32.mrf.mxu3 }
 0x38c   : > { %v4011_v0 = vadd.f32 %v3931_v45, %v3724_v55  ;;  %v8304_v55 = vpop.f32.mrf.mxu0  ;;  %v6106_v45 = vld [vmem:[#allocation2 + $0x84] sm:$0xff] }
 0x38e   : > { %v4665_v62 = vadd.f32 %v8021_v43, %v4011_v0  ;;  %v8932_v43 = vld [vmem:[#allocation51_spill] sm:$0xff] }
 0x38f   : > { %v3328_v0 = vadd.f32 %v8932_v43, %v2674_v57 }
 0x390   : > { %v5063_v42 = vadd.f32 %v8207_v46, %v4665_v62  ;;  %v8313_v46 = vpop.f32.mrf.mxu2  ;;  %v8933_v62 = vld [vmem:[#allocation17_spill] sm:$0xff] }
 0x391   : > { %v2675_v4 = vadd.f32 %v8933_v62, %v8031_v36 }
 0x392   : > { %v5099_v60 = vadd.f32 %v8302_v59, %v5063_v42 }
 0x393   : > { %v3933_v48 = vpop.f32.mrf.mxu3  ;;  %v3329_v42 = vadd.f32 %v8935_v13, %v2675_v4  ;;  %v6107_v4 = vld [vmem:[#allocation2 + $0x90] sm:$0xff] }
 0x394   : > { %v4012_v52 = vadd.f32 %v3933_v48, %v3725_v22  ;;  %v8934_v22 = vld [vmem:[#allocation63_spill] sm:$0xff]  ;;  %v8320_v33 = vpop.f32.mrf.mxu0 }
 0x396   : > { %v4666_v32 = vadd.f32 %v8039_v61, %v4012_v52  ;;  %v3726_v61 = vadd.f32 %v8934_v22, %v3328_v0  ;;  %v5131_v52 = vmax.f32 %v5099_v60, 0.0 }
 0x398   : > { %v5064_v8 = vadd.f32 %v8217_v54, %v4666_v32  ;;  %5969 = vmatmul.msk.bf16.gmra.mxu3 %vm1671_vm8, %v6106_v45  ;;  %v8936_v32 = vld [vmem:[#allocation18_spill] sm:$0xff]  ;;  %v8326_v45 = vpop.f32.mrf.mxu1  ;;  %v8329_v62 = vpop.f32.mrf.mxu2 }
 0x399   : > { %v2676_v36 = vadd.f32 %v8936_v32, %v8047_v38  ;;  %v8939_v38 = vld [vmem:[#allocation19_spill] sm:$0xff] }
 0x39a   : > { %v5100_v34 = vadd.f32 %v8302_v59, %v5064_v8  ;;  %v8937_v8 = vld [vmem:[#allocation66_spill] sm:$0xff] }
 0x39b   : > { %v3936_v48 = vpop.f32.mrf.mxu3  ;;  %v3727_v0 = vadd.f32 %v8937_v8, %v3329_v42 }
 0x39c   : > { %v5132_v57 = vmax.f32 %v5100_v34, 0.0  ;;  %v4013_v43 = vadd.f32 %v3936_v48, %v3726_v61  ;;  %v8938_v61 = vld [vmem:[#allocation56_spill] sm:$0xff] }
 0x39e   : > { %v5163_v20 = vpack.c.bf16 %v5132_v57, %v5131_v52  ;;  %v4667_v54 = vadd.f32 %v8055_v11, %v4013_v43  ;;  %v3330_v11 = vadd.f32 %v8938_v61, %v2676_v36  ;;  %v2677_v52 = vadd.f32 %v8939_v38, %v8058_v16  ;;  %v8339_v57 = vpop.f32.mrf.mxu0  ;;  %v8942_v16 = vld [vmem:[#allocation21_spill] sm:$0xff] }
 0x3a0   : > { %6026 = vmatmul.msk.bf16.vlgmr.msra.gmra.mxu2 %vm1671_vm8, %v5163_v20  ;;  %v5065_v34 = vadd.f32 %v8227_v10, %v4667_v54  ;;  %v8940_v10 = vld [vmem:[#allocation70_spill] sm:$0xff] }
 0x3a1   : > { %v3728_v42 = vadd.f32 %v8940_v10, %v3330_v11 }
 0x3a2   : > { %v5101_v20 = vadd.f32 %v8302_v59, %v5065_v34 }
 0x3a3   : > { %v3938_v60 = vpop.f32.mrf.mxu3 }
 0x3a4   : > { %v4014_v22 = vadd.f32 %v3938_v60, %v3727_v0  ;;  %v5133_v32 = vmax.f32 %v5101_v20, 0.0  ;;  %v8345_v0 = vpop.f32.mrf.mxu2  ;;  %v8941_v60 = vld [vmem:[#allocation58_spill] sm:$0xff] }
 0x3a5   : > { %v3331_v34 = vadd.f32 %v8941_v60, %v2677_v52  ;;  %v6108_v52 = vld [vmem:[#allocation2 + $0x9c] sm:$0xff] }
 0x3a6   : > { %v4668_v13 = vadd.f32 %v8073_v56, %v4014_v22  ;;  %v8343_v56 = vpop.f32.mrf.mxu1 }
 0x3a8   : > { %v5066_v48 = vadd.f32 %v8237_v29, %v4668_v13  ;;  %5970 = vmatmul.msk.bf16.gmra.mxu3 %vm1671_vm8, %v6107_v4  ;;  %v2678_v13 = vadd.f32 %v8942_v16, %v8076_v23  ;;  %v8943_v4 = vld [vmem:[#allocation73_spill] sm:$0xff] }
 0x3a9   : > { %v3729_v61 = vadd.f32 %v8943_v4, %v3331_v34 }
 0x3aa   : > { %v5102_v43 = vadd.f32 %v8302_v59, %v5066_v48  ;;  %v8353_v48 = vpop.f32.mrf.mxu0 }
 0x3ab   : > { %v3941_v54 = vpop.f32.mrf.mxu3 }
 0x3ac   : > { %v5134_v36 = vmax.f32 %v5102_v43, 0.0  ;;  %v4015_v8 = vadd.f32 %v3941_v54, %v3728_v42  ;;  %v8944_v42 = vld [vmem:[#allocation61_spill] sm:$0xff]  ;;  %v8360_v54 = vpop.f32.mrf.mxu2 }
 0x3ae   : > { %v5164_v29 = vpack.c.bf16 %v5134_v36, %v5133_v32  ;;  %v4669_v22 = vadd.f32 %v8091_v2, %v4015_v8  ;;  %v8356_v43 = vpop.f32.mrf.mxu1  ;;  %v3332_v2 = vadd.f32 %v8944_v42, %v2678_v13  ;;  %v8945_v36 = vld [vmem:[#allocation23_spill] sm:$0xff] }
 0x3af   : > { %v2679_v8 = vadd.f32 %v8945_v36, %v8089_v1 }
 0x3b0   : > { %6027 = vmatmul.msk.bf16.gmra.mxu2 %vm1671_vm8, %v5164_v29  ;;  %v5067_v20 = vadd.f32 %v8247_v41, %v4669_v22  ;;  %v8946_v29 = vld [vmem:[#allocation76_spill] sm:$0xff] }
 0x3b1   : > { %v3730_v60 = vadd.f32 %v8946_v29, %v3332_v2 }
 0x3b2   : > { %v5103_v32 = vadd.f32 %v8302_v59, %v5067_v20  ;;  %v8369_v13 = vpop.f32.mrf.mxu0 }
 0x3b3   : > { %v3943_v11 = vpop.f32.mrf.mxu3 }
 0x3b4   : > { %v4016_v38 = vadd.f32 %v3943_v11, %v3729_v61  ;;  %v8947_v61 = vld [vmem:[#allocation65_spill] sm:$0xff]  ;;  %v8376_v1 = vpop.f32.mrf.mxu2 }
 0x3b5   : > { %v3333_v11 = vadd.f32 %v8947_v61, %v2679_v8  ;;  %v6109_v8 = vld [vmem:[#allocation2 + $0xa8] sm:$0xff] }
 0x3b6   : > { %v4670_v10 = vadd.f32 %v8109_v49, %v4016_v38  ;;  %v5135_v49 = vmax.f32 %v5103_v32, 0.0  ;;  %v8372_v20 = vpop.f32.mrf.mxu1  ;;  %v8948_v38 = vld [vmem:[#allocation25_spill] sm:$0xff] }
 0x3b8   : > { %v5068_v23 = vadd.f32 %v8255_v7, %v4670_v10  ;;  %5971 = vmatmul.msk.bf16.gmra.mxu3 %vm1671_vm8, %v6108_v52  ;;  %v2680_v10 = vadd.f32 %v8948_v38, %v8103_v28  ;;  %v8949_v52 = vld [vmem:[#allocation80_spill] sm:$0xff] }
 0x3b9   : > { %v3731_v42 = vadd.f32 %v8949_v52, %v3333_v11  ;;  %v8951_v28 = vld [vmem:[#allocation28_spill] sm:$0xff] }
 0x3ba   : > { %v5104_v41 = vadd.f32 %v8302_v59, %v5068_v23 }
 0x3bb   : > { %v3946_v34 = vpop.f32.mrf.mxu3 }
 0x3bc   : > { %v5136_v22 = vmax.f32 %v5104_v41, 0.0  ;;  %v4017_v16 = vadd.f32 %v3946_v34, %v3730_v60  ;;  %v8950_v41 = vld [vmem:[#allocation68_spill] sm:$0xff]  ;;  %v8384_v60 = vpop.f32.mrf.mxu0 }
 0x3bd   : > { %v3334_v29 = vadd.f32 %v8950_v41, %v2680_v10  ;;  %v8952_v10 = vld [vmem:[#allocation72_spill] sm:$0xff] }
 0x3be   : > { %v5165_v4 = vpack.c.bf16 %v5136_v22, %v5135_v49  ;;  %v4671_v7 = vadd.f32 %v8287_v9, %v4017_v16  ;;  %v2681_v49 = vadd.f32 %v8951_v28, %v8115_v19  ;;  %v8391_v22 = vpop.f32.mrf.mxu1  ;;  %v8395_v16 = vpop.f32.mrf.mxu2 }
 0x3c0   : > { %6028 = vmatmul.msk.bf16.gmra.mxu2 %vm1671_vm8, %v5165_v4  ;;  %v5069_v32 = vadd.f32 %v8289_v44, %v4671_v7 }
 0x3c2   : > { %v5105_v9 = vadd.f32 %v8302_v59, %v5069_v32 }
 0x3c3   : > { %v3948_v2 = vpop.f32.mrf.mxu3 }
 0x3c4   : > { %v4018_v23 = vadd.f32 %v3948_v2, %v3731_v42  ;;  %v5137_v61 = vmax.f32 %v5105_v9, 0.0  ;;  %v8400_v19 = vpop.f32.mrf.mxu0  ;;  %v8953_v42 = vld [vmem:[#allocation30_spill] sm:$0xff]  ;;  %v8954_v9 = vld [vmem:[#allocation75_spill] sm:$0xff] }
 0x3c5   : > { %v2682_v2 = vadd.f32 %v8953_v42, %v8121_v17  ;;  %v8955_v17 = vld [vmem:[#allocation32_spill] sm:$0xff]  ;;  %v4089_v42 = vld [vmem:[#allocation2 + $0xd0] sm:$0xf] }
 0x3c6   : > { %v4672_v36 = vadd.f32 %v8304_v55, %v4018_v23  ;;  %v3732_v55 = vadd.f32 %v8205_v5, %v3334_v29  ;;  %v8405_v23 = vpop.f32.mrf.mxu1  ;;  %v8408_v41 = vpop.f32.mrf.mxu2 }
 0x3c8   : > { %v5070_v34 = vadd.f32 %v8308_v37, %v4672_v36  ;;  %5972 = vmatmul.msk.bf16.gmra.mxu3 %vm1671_vm8, %v6109_v8  ;;  %v3335_v37 = vadd.f32 %v8952_v10, %v2681_v49 }
 0x3ca   : > { %v5106_v44 = vadd.f32 %v8302_v59, %v5070_v34  ;;  %v3733_v5 = vadd.f32 %v8215_v21, %v3335_v37  ;;  %v3336_v34 = vadd.f32 %v8954_v9, %v2682_v2  ;;  %v2683_v21 = vadd.f32 %v8955_v17, %v8130_v12 }
 0x3cb   : > { %v3951_v4 = vpop.f32.mrf.mxu3  ;;  %v4868_v17 = vrot.slane %v4089_v42, 5 }
 0x3cc   : > { %v5138_v11 = vmax.f32 %v5106_v44, 0.0  ;;  %v4019_v7 = vadd.f32 %v3951_v4, %v3732_v55  ;;  %v8419_v4 = vpop.f32.mrf.mxu0 }
 0x3ce   : > { %v5166_v38 = vpack.c.bf16 %v5138_v11, %v5137_v61  ;;  %v4673_v52 = vadd.f32 %v8320_v33, %v4019_v7  ;;  %v6110_v33 = vld [vmem:[#allocation2 + $0xb4] sm:$0xff]  ;;  %v689_v7 = vld [vmem:[#allocation2 + $0xcc] sm:$0x1]  ;;  %v8425_v12 = vpop.f32.mrf.mxu1 }
 0x3d0   : > { %6029 = vmatmul.msk.bf16.gmra.mxu2 %vm1671_vm8, %v5166_v38  ;;  %v5071_v36 = vadd.f32 %v8326_v45, %v4673_v52  ;;  %v3734_v45 = vadd.f32 %v8223_v30, %v3336_v34  ;;  %v745_v38 = vld [vmem:[#allocation2 + $0xd4] sm:$0x1] }
 0x3d1   : > { %v746_v52 = vsel %vm6473_vm6, 0, %v745_v38 }
 0x3d2   : > { %v5107_v28 = vadd.f32 %v8302_v59, %v5071_v36  ;;  %v4465_v36 = vshrl.u32 %v4089_v42, 16  ;;  %747 = vst [vmem:[#allocation2 + $0xd4] sm:$0x1] %v746_v52 }
 0x3d3   : > { %v3953_v32 = vpop.f32.mrf.mxu3 }
 0x3d4   : > { %v4020_v8 = vadd.f32 %v3953_v32, %v3733_v5  ;;  %v8958_v5 = vld [vmem:[#allocation79_spill] sm:$0xff]  ;;  %v4461_v32 = vshll.u32 %v4089_v42, 16  ;;  %v4467_v34 = vrot.slane %v4465_v36, 4 }
 0x3d5   : > { %v3337_v30 = vadd.f32 %v8958_v5, %v2683_v21 }
 0x3d6   : > { %v4674_v29 = vadd.f32 %v8339_v57, %v4020_v8  ;;  %v5139_v57 = vmax.f32 %v5107_v28, 0.0  ;;  %v8428_v8 = vpop.f32.mrf.mxu2  ;;  %v4463_v9 = vrot.slane %v4461_v32, 5  ;;  %v8959_v28 = vld [vmem:[#allocation34_spill] sm:$0xff] }
 0x3d8   : > { %v5072_v49 = vadd.f32 %v8343_v56, %v4674_v29  ;;  %5973 = vmatmul.msk.bf16.gmra.mxu3 %vm1671_vm8, %v6110_v33  ;;  %v690_v56 = vsel %vm6464_vm4, 0, %v689_v7  ;;  %v4712_v29 = vld [vmem:[#allocation2 + $0xcc] sm:$0xe] }
 0x3d9   : > { %691 = vst [vmem:[#allocation2 + $0xcc] sm:$0x1] %v690_v56  ;;  %v6008_v21 = vrot.slane %v4712_v29, 9  ;;  %v6111_v56 = vld [vmem:[#allocation2 + $0xc0] sm:$0xff]  ;;  %v4090_v37 = vld [vmem:[#allocation2 + $0xd4] sm:$0x1] }
 0x3da   : > { %v5108_v44 = vadd.f32 %v8302_v59, %v5072_v49  ;;  %v2684_v49 = vadd.f32 %v8959_v28, %v8144_v35  ;;  %v4871_v5 = vrot.slane %v4090_v37, 5  ;;  %v8960_v29 = vld [vmem:[#allocation37_spill] sm:$0xff] }
 0x3db   : > { %v3956_v55 = vpop.f32.mrf.mxu3 }
 0x3dc   : > { %v5140_v61 = vmax.f32 %v5108_v44, 0.0  ;;  %v4021_v11 = vadd.f32 %v3956_v55, %v3734_v45  ;;  %v3735_v44 = vadd.f32 %v8232_v50, %v3337_v30  ;;  %v4468_v55 = vor.u32 %v4467_v34, %v4463_v9 }
 0x3dd   : > { %v3338_v7 = vadd.f32 %v7907_v24, %v2684_v49  ;;  %v4869_v50 = vsel %vm6532_vm15, %v6008_v21, %v4868_v17 }
 0x3de   : > { %v5167_v2 = vpack.c.bf16 %v5140_v61, %v5139_v57  ;;  %v4675_v33 = vadd.f32 %v8353_v48, %v4021_v11  ;;  %v4870_v48 = vrot.slane %v4868_v17, 4  ;;  %v8437_v11 = vpop.f32.mrf.mxu0  ;;  %v4469_v42 = vrot.slane %v4468_v55, 4  ;;  %v8447_v36 = vpop.f32.mrf.mxu2 }
 0x3df   : > { %v4905_v49 = vunpack.c.l.b16 %v4869_v50  ;;  %v8961_v50 = vld [vmem:[#allocation39_spill] sm:$0xff] }
 0x3e0   : > { %6030 = vmatmul.msk.bf16.gmra.mxu2 %vm1671_vm8, %v5167_v2  ;;  %v5073_v57 = vadd.f32 %v8356_v43, %v4675_v33  ;;  %v4088_v38 = vld [vmem:[#allocation2 + $0xcc] sm:$0xf]  ;;  %v4471_v2 = vshll.u32 %v4090_v37, 16  ;;  %v8442_v43 = vpop.f32.mrf.mxu1  ;;  %v2685_v33 = vadd.f32 %v8960_v29, %v8155_v39  ;;  %v4872_v28 = vsel %vm6532_vm15, %v4870_v48, %v4871_v5  ;;  %v8962_v29 = vld [vmem:[#allocation41_spill] sm:$0xff] }
 0x3e1   : > { %v4452_v35 = vshrl.u32 %v4088_v38, 16  ;;  %v4455_v52 = vshll.u32 %v4088_v38, 16 }
 0x3e2   : > { %v5109_v24 = vadd.f32 %v8302_v59, %v5073_v57  ;;  %v4473_v34 = vrot.slane %v4471_v2, 5  ;;  %v3339_v6 = vadd.f32 %v7947_v18, %v2685_v33  ;;  %v2687_v33 = vadd.f32 %v8962_v29, %v8166_v25  ;;  %v8963_v25 = vld [vmem:[#allocation43_spill] sm:$0xff] }
 0x3e3   : > { %v3958_v45 = vpop.f32.mrf.mxu3  ;;  %v4454_v32 = vrot.slane %v4452_v35, 4  ;;  %v8969_v29 = vld [vmem:[#allocation87_spill] sm:$0xff] }
 0x3e4   : > { %v4022_v61 = vadd.f32 %v3958_v45, %v3735_v44  ;;  %v3736_v44 = vadd.f32 %v8245_v58, %v3338_v7  ;;  %v4474_v55 = vsel %vm6497_vm11, %v4469_v42, %v4473_v34  ;;  %v5141_v57 = vmax.f32 %v5109_v24, 0.0 }
 0x3e5   : > { %v4508_v39 = vunpack.c.l.b16 %v4474_v55  ;;  %v2686_v42 = vadd.f32 %v8961_v50, %v8163_v53  ;;  %v3737_v5 = vadd.f32 %v8252_v27, %v3339_v6 }
 0x3e6   : > { %v4676_v10 = vadd.f32 %v8369_v13, %v4022_v61  ;;  %v4457_v13 = vrot.slane %v4455_v52, 5  ;;  %v4625_v58 = vpop.f32.mrf.mxu0  ;;  %v8466_v24 = vpop.f32.mrf.mxu2 }
 0x3e8   : > { %v5074_v30 = vadd.f32 %v8372_v20, %v4676_v10  ;;  %5974 = vmatmul.msk.bf16.gmra.mxu3 %vm1671_vm8, %v6111_v56  ;;  %v4458_v21 = vor.u32 %v4457_v13, %v4454_v32  ;;  %v4906_v20 = vunpack.c.l.b16 %v4872_v28  ;;  %v5023_v2 = vpop.f32.mrf.mxu1  ;;  %v3340_v32 = vadd.f32 %v7975_v47, %v2686_v42 }
 0x3ea   : > { %v5110_v17 = vadd.f32 %v8302_v59, %v5074_v30  ;;  %v4459_v10 = vrot.slane %v4458_v21, 4  ;;  %v4922_v56 = vpack.c.b16 %v4906_v20, %v4905_v49  ;;  %v6112_v30 = vld [vmem:[#allocation2 + $0xcc] sm:$0xff] }
 0x3eb   : > { %v3961_v45 = vpop.f32.mrf.mxu3 }
 0x3ec   : > { %v5142_v61 = vmax.f32 %v5110_v17, 0.0  ;;  %v4023_v38 = vadd.f32 %v3961_v45, %v3736_v44  ;;  %v4464_v48 = vsel %vm6497_vm11, %v4459_v10, %v4463_v9  ;;  %6025 = vmatmul.msk.bf16.gmra.mxu1 %vm1671_vm8, %v4922_v56  ;;  %v2688_v45 = vadd.f32 %v8963_v25, %v8174_v63  ;;  %v8964_v63 = vld [vmem:[#allocation47_spill] sm:$0xff] }
 0x3ed   : > { %v4507_v35 = vunpack.c.l.b16 %v4464_v48  ;;  %v2689_v6 = vadd.f32 %v8964_v63, %v8179_v26  ;;  %v8967_v26 = vld [vmem:[#allocation49_spill] sm:$0xff] }
 0x3ee   : > { %v5168_v37 = vpack.c.bf16 %v5142_v61, %v5141_v57  ;;  %v4677_v7 = vadd.f32 %v8384_v60, %v4023_v38  ;;  %v4627_v27 = vpop.f32.mrf.mxu0  ;;  %v8479_v47 = vpop.f32.mrf.mxu2  ;;  %v3342_v56 = vadd.f32 %v8008_v15, %v2688_v45  ;;  %v8965_v15 = vld [vmem:[#allocation86_spill] sm:$0xff] }
 0x3ef   : > { %v4524_v52 = vpack.c.b16 %v4508_v39, %v4507_v35  ;;  %v3343_v42 = vadd.f32 %v8965_v15, %v2689_v6  ;;  %v8975_v15 = vld [vmem:[#allocation89_spill] sm:$0xff] }
 0x3f0   : > { %6031 = vmatmul.msk.bf16.gmra.mxu2 %vm1671_vm8, %v5168_v37  ;;  %v5075_v40 = vadd.f32 %v8391_v22, %v4677_v7  ;;  %v3738_v22 = vadd.f32 %v8262_v31, %v3340_v32  ;;  %v5025_v49 = vpop.f32.mrf.mxu1  ;;  %v3740_v48 = vadd.f32 %v8280_v51, %v3342_v56  ;;  %v8973_v56 = vld [vmem:[#allocation31_spill] sm:$0xff] }
 0x3f1   : > { %5992 = vmatmul.msk.bf16.gmra.mxu0 %vm1671_vm8, %v4524_v52 }
 0x3f2   : > { %v5111_v13 = vadd.f32 %v8302_v59, %v5075_v40  ;;  %v8966_v40 = vld [vmem:[#allocation27_spill] sm:$0xff] }
 0x3f3   : > { %v3963_v18 = vpop.f32.mrf.mxu3 }
 0x3f4   : > { %v4024_v9 = vadd.f32 %v3963_v18, %v3737_v5  ;;  %v5143_v17 = vmax.f32 %v5111_v13, 0.0 }
 0x3f6   : > { %v4678_v60 = vadd.f32 %v8400_v19, %v4024_v9  ;;  %v4630_v57 = vpop.f32.mrf.mxu0  ;;  %v2690_v9 = vadd.f32 %v8967_v26, %v8966_v40 }
 0x3f8   : > { %v5076_v53 = vadd.f32 %v8405_v23, %v4678_v60  ;;  %5975 = vmatmul.msk.bf16.gmra.mxu3 %vm1671_vm8, %v6112_v30  ;;  %v3341_v23 = vadd.f32 %v7994_v3, %v2687_v33  ;;  %v5028_v10 = vpop.f32.mrf.mxu1  ;;  %v8490_v3 = vpop.f32.mrf.mxu2  ;;  %v8968_v30 = vld [vmem:[#allocation13_spill] sm:$0xff]  ;;  %v3344_v33 = vadd.f32 %v8969_v29, %v2690_v9  ;;  %v8976_v9 = vld [vmem:[#allocation35_spill] sm:$0xff] }
 0x3f9   : > { %v3741_v60 = vadd.f32 %v8968_v30, %v3343_v42  ;;  %v8977_v30 = vld [vmem:[#allocation60_spill] sm:$0xff] }
 0x3fa   : > { %v5112_v34 = vadd.f32 %v8302_v59, %v5076_v53  ;;  %v3739_v55 = vadd.f32 %v8268_v14, %v3341_v23  ;;  %v3742_v23 = vadd.f32 %v8313_v46, %v3344_v33 }
 0x3fb   : > { %v3966_v28 = vpop.f32.mrf.mxu3 }
 0x3fc   : > { %v5144_v19 = vmax.f32 %v5112_v34, 0.0  ;;  %v4025_v44 = vadd.f32 %v3966_v28, %v3738_v22  ;;  %v8970_v28 = vld [vmem:[#allocation62_spill] sm:$0xff] }
 0x3fe   : > { %v5169_v21 = vpack.c.bf16 %v5144_v19, %v5143_v17  ;;  %v4679_v20 = vadd.f32 %v8419_v4, %v4025_v44  ;;  %v8971_v17 = vld [vmem:[#allocation52_spill] sm:$0xff] }
 0x3ff   : > { %v2691_v19 = vadd.f32 %v8971_v17, %v8970_v28  ;;  %v8978_v17 = vld [vmem:[#allocation90_spill] sm:$0xff] }
 0x400   : > { %6032 = vmatmul.msk.bf16.gmra.mxu2 %vm1671_vm8, %v5169_v21  ;;  %v5077_v61 = vadd.f32 %v8425_v12, %v4679_v20  ;;  %v5030_v5 = vpop.f32.mrf.mxu1 }
 0x402   : > { %v5113_v4 = vadd.f32 %v8302_v59, %v5077_v61 }
 0x403   : > { %v3968_v31 = vpop.f32.mrf.mxu3 }
 0x404   : > { %v4026_v38 = vadd.f32 %v3968_v31, %v3739_v55  ;;  %v5145_v35 = vmax.f32 %v5113_v4, 0.0  ;;  %v8972_v31 = vld [vmem:[#allocation88_spill] sm:$0xff]  ;;  %v8974_v4 = vld [vmem:[#allocation55_spill] sm:$0xff] }
 0x405   : > { %v3345_v61 = vadd.f32 %v8972_v31, %v2691_v19 }
 0x406   : > { %v4680_v39 = vadd.f32 %v8437_v11, %v4026_v38  ;;  %v4632_v11 = vpop.f32.mrf.mxu0  ;;  %v300_v38 = vld [vmem:[%s6436_s16] sm:$0xff]  }
 0x407   : > { %v3743_v63 = vadd.f32 %v8329_v62, %v3345_v61  ;;  %v5324_v6 = vunpack.c.l.bf16 %v300_v38  ;;  %v2693_v62 = vadd.f32 %v8977_v30, %v8976_v9 }
 0x408   : > { %v5078_v37 = vadd.f32 %v8442_v43, %v4680_v39  ;;  %v8500_v43 = vpop.f32.mrf.mxu2  ;;  %v5033_v44 = vpop.f32.mrf.mxu1  ;;  %v8519_v39 = vld [vmem:[%s8748_s6] ss:$0 sm:$0xff] }
 0x409   : > { %v3347_v19 = vadd.f32 %v8978_v17, %v2693_v62  ;;  %v8984_v62 = vld [vmem:[#allocation46_spill] sm:$0xff] }
 0x40a   : > { %v5114_v14 = vadd.f32 %v8302_v59, %v5078_v37  ;;  %v2692_v37 = vadd.f32 %v8974_v4, %v8973_v56 }
 0x40b   : > { %v3971_v12 = vpop.f32.mrf.mxu3 }
 0x40c   : > { %v5146_v7 = vmax.f32 %v5114_v14, 0.0  ;;  %v4027_v52 = vadd.f32 %v3971_v12, %v3740_v48  ;;  %v3346_v42 = vadd.f32 %v8975_v15, %v2692_v37 }
 0x40e   : > { %v5170_v50 = vpack.c.bf16 %v5146_v7, %v5145_v35  ;;  %v4681_v18 = vadd.f32 %v4625_v58, %v4027_v52  ;;  %v4635_v34 = vpop.f32.mrf.mxu0 }
 0x410   : > { %6033 = vmatmul.msk.bf16.gmra.mxu2 %vm1671_vm8, %v5170_v50  ;;  %v5079_v32 = vadd.f32 %v5023_v2, %v4681_v18  ;;  %v8511_v20 = vpop.f32.mrf.mxu2  ;;  %v5035_v12 = vpop.f32.mrf.mxu1 }
 0x412   : > { %v5115_v22 = vadd.f32 %v8302_v59, %v5079_v32 }
 0x413   : > { %v3973_v51 = vpop.f32.mrf.mxu3 }
 0x414   : > { %v4028_v13 = vadd.f32 %v3973_v51, %v3741_v60  ;;  %v5147_v25 = vmax.f32 %v5115_v22, 0.0 }
 0x416   : > { %v4682_v53 = vadd.f32 %v4627_v27, %v4028_v13  ;;  %v4637_v46 = vpop.f32.mrf.mxu0 }
 0x418   : > { %v5080_v58 = vadd.f32 %v5025_v49, %v4682_v53  ;;  %v5038_v22 = vpop.f32.mrf.mxu1 }
 0x41a   : > { %v5116_v21 = vadd.f32 %v8302_v59, %v5080_v58 }
 0x41b   : > { %v3976_v2 = vpop.f32.mrf.mxu3 }
 0x41c   : > { %v5148_v27 = vmax.f32 %v5116_v21, 0.0  ;;  %v4029_v45 = vadd.f32 %v3976_v2, %v3742_v23  ;;  %v302_v21 = vld [vmem:[%s6436_s16 + $0x8] sm:$0xff]  }
 0x41d   : > { %v5327_v15 = vunpack.c.h.bf16 %v302_v21 }
 0x41e   : > { %v5171_v55 = vpack.c.bf16 %v5148_v27, %v5147_v25  ;;  %v4683_v49 = vadd.f32 %v4630_v57, %v4029_v45  ;;  %v4640_v13 = vpop.f32.mrf.mxu0  ;;  %v8980_v25 = vld [vmem:[#allocation64_spill] sm:$0xff]  ;;  %v3745_v45 = vadd.f32 %v8360_v54, %v3347_v19  ;;  %v8982_v54 = vld [vmem:[#allocation38_spill] sm:$0xff] }
 0x420   : > { %6034 = vmatmul.msk.bf16.gmra.mxu2 %vm1671_vm8, %v5171_v55  ;;  %v5081_v35 = vadd.f32 %v5028_v10, %v4683_v49  ;;  %v3744_v10 = vadd.f32 %v8345_v0, %v3346_v42  ;;  %v8979_v0 = vld [vmem:[#allocation36_spill] sm:$0xff]  ;;  %v5326_v55 = vunpack.c.l.bf16 %v302_v21 }
 0x421   : > { %v2694_v27 = vadd.f32 %v8980_v25, %v8979_v0  ;;  %v8987_v0 = vld [vmem:[#allocation20_spill] sm:$0xff] }
 0x422   : > { %v5117_v18 = vadd.f32 %v8302_v59, %v5081_v35 }
 0x423   : > { %v3978_v14 = vpop.f32.mrf.mxu3  ;;  %v5244_v48 = vpop.f32.mrf.mxu2 }
 0x424   : > { %v4030_v7 = vadd.f32 %v3978_v14, %v3743_v63  ;;  %v5245_v57 = vadd.f32 %v8519_v39, %v5244_v48  ;;  %v8981_v63 = vld [vmem:[#allocation91_spill] sm:$0xff]  ;;  %v5040_v14 = vpop.f32.mrf.mxu1 }
 0x426   : > { %v4684_v52 = vadd.f32 %v4632_v11, %v4030_v7  ;;  %v5356_v50 = vadd.f32 %v5324_v6, %v5245_v57  ;;  %v5325_v11 = vunpack.c.h.bf16 %v300_v38  ;;  %v4642_v4 = vpop.f32.mrf.mxu0  ;;  %v3348_v6 = vadd.f32 %v8981_v63, %v2694_v27  ;;  %v8983_v57 = vld [vmem:[#allocation67_spill] sm:$0xff] }
 0x428   : > { %v5082_v40 = vadd.f32 %v5030_v5, %v4684_v52  ;;  %v5388_v26 = vmax.f32 %v5356_v50, 0.0  ;;  %v5149_v5 = vmax.f32 %v5117_v18, 0.0  ;;  %v2695_v52 = vadd.f32 %v8983_v57, %v8982_v54  ;;  %v8990_v54 = vld [vmem:[#allocation22_spill] sm:$0xff] }
 0x42a   : > { %v5118_v60 = vadd.f32 %v8302_v59, %v5082_v40  ;;  %5420 = vst.msk [vmem:[%s8531_s18] sm:$0xff] %vm424_vm0, %v5388_v26 }
 0x42b   : > { %v3981_v51 = vpop.f32.mrf.mxu3  ;;  %v5246_v32 = vpop.f32.mrf.mxu2 }
 0x42c   : > { %v5150_v53 = vmax.f32 %v5118_v60, 0.0  ;;  %v4031_v29 = vadd.f32 %v3981_v51, %v3744_v10  ;;  %v5247_v33 = vadd.f32 %v8519_v39, %v5246_v32  ;;  %v3349_v60 = vadd.f32 %v8984_v62, %v2695_v52  ;;  %v304_v10 = vld [vmem:[%s6436_s16 + $0x10] sm:$0xff]   ;;  %v306_v52 = vld [vmem:[%s6436_s16 + $0x18] sm:$0xff]  }
 0x42e   : > { %v5357_v58 = vadd.f32 %v5325_v11, %v5247_v33  ;;  %v5172_v28 = vpack.c.bf16 %v5150_v53, %v5149_v5  ;;  %v4685_v23 = vadd.f32 %v4635_v34, %v4031_v29  ;;  %v4645_v11 = vpop.f32.mrf.mxu0  ;;  %v8986_v5 = vld [vmem:[#allocation71_spill] sm:$0xff]  ;;  %v5043_v29 = vpop.f32.mrf.mxu1  ;;  %v3747_v33 = vadd.f32 %v8395_v16, %v3349_v60 }
 0x430   : > { %v5389_v2 = vmax.f32 %v5357_v58, 0.0  ;;  %6035 = vmatmul.msk.bf16.gmra.mxu2 %vm1671_vm8, %v5172_v28  ;;  %v5083_v38 = vadd.f32 %v5033_v44, %v4685_v23  ;;  %v3746_v44 = vadd.f32 %v8376_v1, %v3348_v6  ;;  %v8985_v1 = vld [vmem:[#allocation40_spill] sm:$0xff]  ;;  %v5328_v58 = vunpack.c.l.bf16 %v304_v10 }
 0x431   : > { %v2696_v53 = vadd.f32 %v8986_v5, %v8985_v1 }
 0x432   : > { %5421 = vst.msk [vmem:[%s8531_s18 + $0x8] sm:$0xff] %vm424_vm0, %v5389_v2  ;;  %v5119_v48 = vadd.f32 %v8302_v59, %v5083_v38  ;;  %v8989_v38 = vld [vmem:[#allocation74_spill] sm:$0xff] }
 0x433   : > { %v3983_v31 = vpop.f32.mrf.mxu3  ;;  %v5249_v61 = vpop.f32.mrf.mxu2  ;;  %v3350_v25 = vadd.f32 %v8987_v0, %v2696_v53 }
 0x434   : > { %v4032_v49 = vadd.f32 %v3983_v31, %v3745_v45  ;;  %v5250_v56 = vadd.f32 %v8519_v39, %v5249_v61  ;;  %v5151_v18 = vmax.f32 %v5119_v48, 0.0  ;;  %v8988_v61 = vld [vmem:[#allocation42_spill] sm:$0xff] }
 0x435   : > { %v2697_v16 = vadd.f32 %v8989_v38, %v8988_v61  ;;  %v8998_v38 = vld [vmem:[#allocation24_spill] sm:$0xff] }
 0x436   : > { %v4686_v34 = vadd.f32 %v4637_v46, %v4032_v49  ;;  %v5358_v37 = vadd.f32 %v5326_v55, %v5250_v56  ;;  %v4647_v31 = vpop.f32.mrf.mxu0  ;;  %v5329_v56 = vunpack.c.h.bf16 %v304_v10 }
 0x437   : > { %v3351_v57 = vadd.f32 %v8990_v54, %v2697_v16 }
 0x438   : > { %v5084_v35 = vadd.f32 %v5035_v12, %v4686_v34  ;;  %v5390_v7 = vmax.f32 %v5358_v37, 0.0  ;;  %v5045_v37 = vpop.f32.mrf.mxu1 }
 0x43a   : > { %v5120_v50 = vadd.f32 %v8302_v59, %v5084_v35  ;;  %5422 = vst.msk [vmem:[%s8531_s18 + $0x10] sm:$0xff] %vm424_vm0, %v5390_v7 }
 0x43b   : > { %v3986_v46 = vpop.f32.mrf.mxu3  ;;  %v5251_v42 = vpop.f32.mrf.mxu2 }
 0x43c   : > { %v5152_v40 = vmax.f32 %v5120_v50, 0.0  ;;  %v4033_v26 = vadd.f32 %v3986_v46, %v3746_v44  ;;  %v5252_v12 = vadd.f32 %v8519_v39, %v5251_v42  ;;  %v3749_v42 = vadd.f32 %v8428_v8, %v3351_v57  ;;  %v8995_v8 = vld [vmem:[#allocation81_spill] sm:$0xff] }
 0x43e   : > { %v5359_v9 = vadd.f32 %v5327_v15, %v5252_v12  ;;  %v5173_v30 = vpack.c.bf16 %v5152_v40, %v5151_v18  ;;  %v4687_v51 = vadd.f32 %v4640_v13, %v4033_v26  ;;  %v8992_v15 = vld [vmem:[#allocation77_spill] sm:$0xff]  ;;  %v5330_v18 = vunpack.c.l.bf16 %v306_v52  ;;  %v4650_v12 = vpop.f32.mrf.mxu0 }
 0x440   : > { %v5391_v32 = vmax.f32 %v5359_v9, 0.0  ;;  %6036 = vmatmul.msk.bf16.gmra.mxu2 %vm1671_vm8, %v5173_v30  ;;  %v5085_v19 = vadd.f32 %v5038_v22, %v4687_v51  ;;  %v3748_v22 = vadd.f32 %v8408_v41, %v3350_v25  ;;  %v8991_v41 = vld [vmem:[#allocation44_spill] sm:$0xff]  ;;  %v5048_v60 = vpop.f32.mrf.mxu1  ;;  %v8993_v51 = vld [vmem:[#allocation50_spill] sm:$0xff] }
 0x441   : > { %v2698_v46 = vadd.f32 %v8992_v15, %v8991_v41  ;;  %v9002_v15 = vld [vmem:[#allocation26_spill] sm:$0xff] }
 0x442   : > { %5423 = vst.msk [vmem:[%s8531_s18 + $0x18] sm:$0xff] %vm424_vm0, %v5391_v32  ;;  %v5121_v27 = vadd.f32 %v8302_v59, %v5085_v19  ;;  %v8996_v19 = vld [vmem:[#allocation14_spill] sm:$0xff] }
 0x443   : > { %v3988_v28 = vpop.f32.mrf.mxu3  ;;  %v5254_v17 = vpop.f32.mrf.mxu2  ;;  %v3352_v32 = vadd.f32 %v8993_v51, %v2698_v46 }
 0x444   : > { %v4034_v21 = vadd.f32 %v3988_v28, %v3747_v33  ;;  %v5255_v23 = vadd.f32 %v8519_v39, %v5254_v17  ;;  %v5153_v63 = vmax.f32 %v5121_v27, 0.0  ;;  %v8994_v33 = vld [vmem:[#allocation69_spill] sm:$0xff]  ;;  %v5331_v17 = vunpack.c.h.bf16 %v306_v52 }
 0x446   : > { %v4688_v13 = vadd.f32 %v4642_v4, %v4034_v21  ;;  %v5360_v2 = vadd.f32 %v5328_v58, %v5255_v23  ;;  %v2699_v58 = vadd.f32 %v8995_v8, %v8994_v33  ;;  %v8997_v21 = vld [vmem:[#allocation85_spill] sm:$0xff] }
 0x447   : > { %v2703_v23 = vadd.f32 %v8997_v21, %v8996_v19  ;;  %v9005_v8 = vld [vmem:[#allocation57_spill] sm:$0xff]  ;;  %v9007_v21 = vld [vmem:[#allocation84_spill] sm:$0xff] }
 0x448   : > { %v5086_v45 = vadd.f32 %v5040_v14, %v4688_v13  ;;  %v5392_v55 = vmax.f32 %v5360_v2, 0.0  ;;  %v3353_v16 = vadd.f32 %v8998_v38, %v2699_v58 }
 0x44a   : > { %v5122_v49 = vadd.f32 %v8302_v59, %v5086_v45  ;;  %5424 = vst.msk [vmem:[%s8531_s18 + $0x20] sm:$0xff] %vm424_vm0, %v5392_v55  ;;  %v4652_v55 = vpop.f32.mrf.mxu0 }
 0x44b   : > { %v3991_v4 = vpop.f32.mrf.mxu3  ;;  %v5256_v34 = vpop.f32.mrf.mxu2 }
 0x44c   : > { %v5154_v6 = vmax.f32 %v5122_v49, 0.0  ;;  %v4035_v14 = vadd.f32 %v3991_v4, %v3748_v22  ;;  %v5257_v48 = vadd.f32 %v8519_v39, %v5256_v34  ;;  %v308_v49 = vld [vmem:[%s6436_s16 + $0x20] sm:$0xff]   ;;  %v5050_v22 = vpop.f32.mrf.mxu1  ;;  %v8999_v4 = vld [vmem:[#allocation33_spill] sm:$0xff] }
 0x44d   : > { %v3357_v34 = vadd.f32 %v8999_v4, %v2703_v23 }
 0x44e   : > { %v5361_v35 = vadd.f32 %v5329_v56, %v5257_v48  ;;  %v5174_v7 = vpack.c.bf16 %v5154_v6, %v5153_v63  ;;  %v4689_v50 = vadd.f32 %v4645_v11, %v4035_v14  ;;  %v9001_v63 = vld [vmem:[#allocation82_spill] sm:$0xff]  ;;  %v3751_v14 = vadd.f32 %v8466_v24, %v3353_v16  ;;  %v9008_v16 = vld [vmem:[#allocation29_spill] sm:$0xff] }
 0x44f   : > { %v5332_v48 = vunpack.c.l.bf16 %v308_v49 }
 0x450   : > { %v5393_v44 = vmax.f32 %v5361_v35, 0.0  ;;  %6037 = vmatmul.msk.bf16.gmra.mxu2 %vm1671_vm8, %v5174_v7  ;;  %v5087_v9 = vadd.f32 %v5043_v29, %v4689_v50  ;;  %v3750_v29 = vadd.f32 %v8447_v36, %v3352_v32  ;;  %v8603_v35 = vadd.f32 %v8511_v20, %v3357_v34 }
 0x452   : > { %5425 = vst.msk [vmem:[%s8531_s18 + $0x28] sm:$0xff] %vm424_vm0, %v5393_v44  ;;  %v5123_v1 = vadd.f32 %v8302_v59, %v5087_v9 }
 0x453   : > { %v3993_v40 = vpop.f32.mrf.mxu3  ;;  %v5259_v26 = vpop.f32.mrf.mxu2 }
 0x454   : > { %v4036_v30 = vadd.f32 %v3993_v40, %v3749_v42  ;;  %v5260_v62 = vadd.f32 %v8519_v39, %v5259_v26  ;;  %v5155_v0 = vmax.f32 %v5123_v1, 0.0  ;;  %v4655_v42 = vpop.f32.mrf.mxu0  ;;  %v9003_v26 = vld [vmem:[#allocation92_spill] sm:$0xff]  ;;  %v5053_v9 = vpop.f32.mrf.mxu1 }
 0x456   : > { %v4690_v10 = vadd.f32 %v4647_v31, %v4036_v30  ;;  %v5362_v11 = vadd.f32 %v5330_v18, %v5260_v62 }
 0x458   : > { %v5088_v5 = vadd.f32 %v5045_v37, %v4690_v10  ;;  %v5394_v53 = vmax.f32 %v5362_v11, 0.0  ;;  %v9000_v37 = vld [vmem:[#allocation78_spill] sm:$0xff] }
 0x459   : > { %v2700_v6 = vadd.f32 %v9001_v63, %v9000_v37 }
 0x45a   : > { %v5124_v28 = vadd.f32 %v8302_v59, %v5088_v5  ;;  %5426 = vst.msk [vmem:[%s8531_s18 + $0x30] sm:$0xff] %vm424_vm0, %v5394_v53 }
 0x45b   : > { %v3996_v13 = vpop.f32.mrf.mxu3  ;;  %v5261_v2 = vpop.f32.mrf.mxu2  ;;  %v3354_v46 = vadd.f32 %v9002_v15, %v2700_v6 }
 0x45c   : > { %v5156_v25 = vmax.f32 %v5124_v28, 0.0  ;;  %v4037_v27 = vadd.f32 %v3996_v13, %v3750_v29  ;;  %v5262_v45 = vadd.f32 %v8519_v39, %v5261_v2  ;;  %v310_v28 = vld [vmem:[%s6436_s16 + $0x28] sm:$0xff]   ;;  %v4657_v19 = vpop.f32.mrf.mxu0 }
 0x45d   : > { %v3752_v62 = vadd.f32 %v8479_v47, %v3354_v46  ;;  %v9006_v47 = vld [vmem:[#allocation93_spill] sm:$0xff]  ;;  %v5334_v2 = vunpack.c.l.bf16 %v310_v28  ;;  %v5335_v37 = vunpack.c.h.bf16 %v310_v28 }
 0x45e   : > { %v5363_v31 = vadd.f32 %v5331_v17, %v5262_v45  ;;  %v5175_v61 = vpack.c.bf16 %v5156_v25, %v5155_v0  ;;  %v4691_v36 = vadd.f32 %v4650_v12, %v4037_v27  ;;  %v9004_v12 = vld [vmem:[#allocation83_spill] sm:$0xff]  ;;  %v2702_v23 = vadd.f32 %v9007_v21, %v9006_v47 }
 0x45f   : > { %v2701_v20 = vadd.f32 %v9004_v12, %v9003_v26 }
 0x460   : > { %v5395_v56 = vmax.f32 %v5363_v31, 0.0  ;;  %6038 = vmatmul.msk.bf16.gmra.mxu2 %vm1671_vm8, %v5175_v61  ;;  %v5089_v57 = vadd.f32 %v5048_v60, %v4691_v36  ;;  %v5333_v60 = vunpack.c.h.bf16 %v308_v49  ;;  %v5055_v31 = vpop.f32.mrf.mxu1  ;;  %v3356_v49 = vadd.f32 %v9008_v16, %v2702_v23 }
 0x461   : > { %v3355_v58 = vadd.f32 %v9005_v8, %v2701_v20 }
 0x462   : > { %5427 = vst.msk [vmem:[%s8531_s18 + $0x38] sm:$0xff] %vm424_vm0, %v5395_v56  ;;  %v5125_v18 = vadd.f32 %v8302_v59, %v5089_v57  ;;  %v3754_v34 = vadd.f32 %v8500_v43, %v3356_v49  ;;  %v318_v49 = vld [vmem:[%s6436_s16 + $0x48] sm:$0xff]  }
 0x463   : > { %v3998_v7 = vpop.f32.mrf.mxu3  ;;  %v5264_v54 = vpop.f32.mrf.mxu2  ;;  %v3753_v13 = vadd.f32 %v8490_v3, %v3355_v58 }
 0x464   : > { %v4038_v52 = vadd.f32 %v3998_v7, %v3751_v14  ;;  %v5265_v50 = vadd.f32 %v8519_v39, %v5264_v54  ;;  %v5157_v51 = vmax.f32 %v5125_v18, 0.0 }
 0x466   : > { %v4692_v44 = vadd.f32 %v4652_v55, %v4038_v52  ;;  %v5364_v41 = vadd.f32 %v5332_v48, %v5265_v50 }
 0x468   : > { %v5090_v40 = vadd.f32 %v5050_v22, %v4692_v44  ;;  %v5396_v24 = vmax.f32 %v5364_v41, 0.0  ;;  %v312_v44 = vld [vmem:[%s6436_s16 + $0x30] sm:$0xff]  }
 0x469   : > { %v5058_v57 = vpop.f32.mrf.mxu1  ;;  %v5336_v43 = vunpack.c.l.bf16 %v312_v44 }
 0x46a   : > { %v5126_v30 = vadd.f32 %v8302_v59, %v5090_v40  ;;  %5428 = vst.msk [vmem:[%s8531_s18 + $0x40] sm:$0xff] %vm424_vm0, %v5396_v24 }
 0x46b   : > { %v4001_v10 = vpop.f32.mrf.mxu3  ;;  %v5266_v11 = vpop.f32.mrf.mxu2 }
 0x46c   : > { %v5158_v32 = vmax.f32 %v5126_v30, 0.0  ;;  %v4039_v1 = vadd.f32 %v4001_v10, %v3752_v62  ;;  %v5267_v5 = vadd.f32 %v8519_v39, %v5266_v11  ;;  %v5337_v11 = vunpack.c.h.bf16 %v312_v44 }
 0x46e   : > { %v5365_v53 = vadd.f32 %v5333_v60, %v5267_v5  ;;  %v5176_v33 = vpack.c.bf16 %v5158_v32, %v5157_v51  ;;  %v4693_v29 = vadd.f32 %v4655_v42, %v4039_v1  ;;  %v4660_v3 = vpop.f32.mrf.mxu0 }
 0x470   : > { %v5397_v17 = vmax.f32 %v5365_v53, 0.0  ;;  %6039 = vmatmul.msk.bf16.gmra.mxu2 %vm1671_vm8, %v5176_v33  ;;  %v5091_v27 = vadd.f32 %v5053_v9, %v4693_v29  ;;  %v314_v33 = vld [vmem:[%s6436_s16 + $0x38] sm:$0xff]  }
 0x471   : > { %v5060_v9 = vpop.f32.mrf.mxu1 }
 0x472   : > { %5429 = vst.msk [vmem:[%s8531_s18 + $0x48] sm:$0xff] %vm424_vm0, %v5397_v17  ;;  %v5127_v22 = vadd.f32 %v8302_v59, %v5091_v27 }
 0x473   : > { %v4003_v0 = vpop.f32.mrf.mxu3  ;;  %v5269_v25 = vpop.f32.mrf.mxu2 }
 0x474   : > { %v4040_v45 = vadd.f32 %v4003_v0, %v3753_v13  ;;  %v5270_v55 = vadd.f32 %v8519_v39, %v5269_v25  ;;  %v5159_v14 = vmax.f32 %v5127_v22, 0.0  ;;  %v316_v13 = vld [vmem:[%s6436_s16 + $0x40] sm:$0xff]  }
 0x475   : > { %v5340_v0 = vunpack.c.l.bf16 %v316_v13 }
 0x476   : > { %v4694_v61 = vadd.f32 %v4657_v19, %v4040_v45  ;;  %v5366_v38 = vadd.f32 %v5334_v2, %v5270_v55  ;;  %v4662_v26 = vpop.f32.mrf.mxu0  ;;  %v5339_v19 = vunpack.c.h.bf16 %v314_v33 }
 0x478   : > { %v5092_v36 = vadd.f32 %v5055_v31, %v4694_v61  ;;  %v5398_v56 = vmax.f32 %v5366_v38, 0.0  ;;  %v5341_v31 = vunpack.c.h.bf16 %v316_v13 }
 0x47a   : > { %v5128_v4 = vadd.f32 %v8302_v59, %v5092_v36  ;;  %5430 = vst.msk [vmem:[%s8531_s18 + $0x50] sm:$0xff] %vm424_vm0, %v5398_v56  ;;  %v5342_v36 = vunpack.c.l.bf16 %v318_v49 }
 0x47b   : > { %v4006_v63 = vpop.f32.mrf.mxu3  ;;  %v5271_v6 = vpop.f32.mrf.mxu2 }
 0x47c   : > { %v5160_v48 = vmax.f32 %v5128_v4, 0.0  ;;  %v4041_v7 = vadd.f32 %v4006_v63, %v3754_v34  ;;  %v5272_v54 = vadd.f32 %v8519_v39, %v5271_v6 }
 0x47e   : > { %v5367_v52 = vadd.f32 %v5335_v37, %v5272_v54  ;;  %v5177_v50 = vpack.c.bf16 %v5160_v48, %v5159_v14  ;;  %v4695_v41 = vadd.f32 %v4660_v3, %v4041_v7  ;;  %v5343_v37 = vunpack.c.h.bf16 %v318_v49  ;;  %v320_v48 = vld [vmem:[%s6436_s16 + $0x50] sm:$0xff]  }
 0x47f   : > { %v5344_v54 = vunpack.c.l.bf16 %v320_v48 }
 0x480   : > { %v5399_v15 = vmax.f32 %v5367_v52, 0.0  ;;  %6040 = vmatmul.msk.bf16.gmra.mxu2 %vm1671_vm8, %v5177_v50  ;;  %v5093_v18 = vadd.f32 %v5058_v57, %v4695_v41  ;;  %v5345_v41 = vunpack.c.h.bf16 %v320_v48 }
 0x482   : > { %5431 = vst.msk [vmem:[%s8531_s18 + $0x58] sm:$0xff] %vm424_vm0, %v5399_v15  ;;  %v5129_v30 = vadd.f32 %v8302_v59, %v5093_v18 }
 0x483   : > { %v4008_v46 = vpop.f32.mrf.mxu3  ;;  %v5274_v42 = vpop.f32.mrf.mxu2 }
 0x484   : > { %v4042_v40 = vadd.f32 %v4008_v46, %v8603_v35  ;;  %v5275_v24 = vadd.f32 %v8519_v39, %v5274_v42  ;;  %v5161_v35 = vmax.f32 %v5129_v30, 0.0  ;;  %v322_v42 = vld [vmem:[%s6436_s16 + $0x58] sm:$0xff]  }
 0x486   : > { %v4696_v12 = vadd.f32 %v4662_v26, %v4042_v40  ;;  %v5368_v20 = vadd.f32 %v5336_v43, %v5275_v24  ;;  %v5346_v40 = vunpack.c.l.bf16 %v322_v42 }
 0x488   : > { %v5094_v62 = vadd.f32 %v5060_v9, %v4696_v12  ;;  %v5400_v60 = vmax.f32 %v5368_v20, 0.0  ;;  %v5347_v9 = vunpack.c.h.bf16 %v322_v42 }
 0x48a   : > { %v5130_v10 = vadd.f32 %v8302_v59, %v5094_v62  ;;  %5432 = vst.msk [vmem:[%s8531_s18 + $0x60] sm:$0xff] %vm424_vm0, %v5400_v60  ;;  %v5338_v59 = vunpack.c.l.bf16 %v314_v33 }
 0x48b   : > { %v5276_v51 = vpop.f32.mrf.mxu2 }
 0x48c   : > { %v5162_v32 = vmax.f32 %v5130_v10, 0.0  ;;  %v5277_v1 = vadd.f32 %v8519_v39, %v5276_v51  ;;  %v324_v10 = vld [vmem:[%s6436_s16 + $0x60] sm:$0xff]  }
 0x48d   : > { %v5348_v51 = vunpack.c.l.bf16 %v324_v10 }
 0x48e   : > { %v5369_v5 = vadd.f32 %v5337_v11, %v5277_v1  ;;  %v5178_v53 = vpack.c.bf16 %v5162_v32, %v5161_v35 }
 0x490   : > { %v5401_v8 = vmax.f32 %v5369_v5, 0.0  ;;  %6041 = vmatmul.msk.bf16.gmra.mxu2 %vm1671_vm8, %v5178_v53  ;;  %v5349_v53 = vunpack.c.h.bf16 %v324_v10 }
 0x492   : > { %5433 = vst.msk [vmem:[%s8531_s18 + $0x68] sm:$0xff] %vm424_vm0, %v5401_v8 }
 0x493   : > { %v5279_v58 = vpop.f32.mrf.mxu2 }
 0x494   : > { %v5280_v28 = vadd.f32 %v8519_v39, %v5279_v58  ;;  %v326_v58 = vld [vmem:[%s6436_s16 + $0x68] sm:$0xff]  }
 0x496   : > { %v5370_v29 = vadd.f32 %v5338_v59, %v5280_v28 }
 0x498   : > { %v5402_v17 = vmax.f32 %v5370_v29, 0.0  ;;  %v5350_v29 = vunpack.c.l.bf16 %v326_v58 }
 0x49a   : > { %5434 = vst.msk [vmem:[%s8531_s18 + $0x70] sm:$0xff] %vm424_vm0, %v5402_v17 }
 0x49b   : > { %v5281_v47 = vpop.f32.mrf.mxu2 }
 0x49c   : > { %v5282_v21 = vadd.f32 %v8519_v39, %v5281_v47 }
 0x49e   : > { %v5371_v23 = vadd.f32 %v5339_v19, %v5282_v21 }
 0x4a0   : > { %v5403_v2 = vmax.f32 %v5371_v23, 0.0  ;;  %v5351_v23 = vunpack.c.h.bf16 %v326_v58 }
 0x4a2   : > { %5435 = vst.msk [vmem:[%s8531_s18 + $0x78] sm:$0xff] %vm424_vm0, %v5403_v2 }
 0x4a3   : > { %v5284_v25 = vpop.f32.mrf.mxu2 }
 0x4a4   : > { %v5285_v27 = vadd.f32 %v8519_v39, %v5284_v25  ;;  %v328_v25 = vld [vmem:[%s6436_s16 + $0x70] sm:$0xff]  }
 0x4a6   : > { %v5372_v45 = vadd.f32 %v5340_v0, %v5285_v27 }
 0x4a8   : > { %v5404_v55 = vmax.f32 %v5372_v45, 0.0  ;;  %v5352_v45 = vunpack.c.l.bf16 %v328_v25 }
 0x4aa   : > { %5436 = vst.msk [vmem:[%s8531_s18 + $0x80] sm:$0xff] %vm424_vm0, %v5404_v55 }
 0x4ab   : > { %v5286_v61 = vpop.f32.mrf.mxu2 }
 0x4ac   : > { %v5287_v38 = vadd.f32 %v8519_v39, %v5286_v61 }
 0x4ae   : > { %v5373_v16 = vadd.f32 %v5341_v31, %v5287_v38 }
 0x4b0   : > { %v5405_v22 = vmax.f32 %v5373_v16, 0.0  ;;  %v5353_v16 = vunpack.c.h.bf16 %v328_v25 }
 0x4b2   : > { %5437 = vst.msk [vmem:[%s8531_s18 + $0x88] sm:$0xff] %vm424_vm0, %v5405_v22 }
 0x4b3   : > { %v5289_v56 = vpop.f32.mrf.mxu2 }
 0x4b4   : > { %v5290_v4 = vadd.f32 %v8519_v39, %v5289_v56  ;;  %v330_v56 = vld [vmem:[%s6436_s16 + $0x78] sm:$0xff]   ;;  %s5465_s16 = sshll.u32 %s8531_s18, 4  ;;  %s5466_s16 = int_to_ptr.vmem [resolvable:$true] %s5465_s16 }
 0x4b6   : > { %v5374_v3 = vadd.f32 %v5342_v36, %v5290_v4 }
 0x4b8   : > { %v5406_v34 = vmax.f32 %v5374_v3, 0.0  ;;  %v5354_v3 = vunpack.c.l.bf16 %v330_v56 }
 0x4ba   : > { %5438 = vst.msk [vmem:[%s8531_s18 + $0x90] sm:$0xff] %vm424_vm0, %v5406_v34 }
 0x4bb   : > { %v5291_v63 = vpop.f32.mrf.mxu2 }
 0x4bc   : > { %v5292_v6 = vadd.f32 %v8519_v39, %v5291_v63 }
 0x4be   : > { %v5375_v14 = vadd.f32 %v5343_v37, %v5292_v6 }
 0x4c0   : > { %v5407_v7 = vmax.f32 %v5375_v14, 0.0  ;;  %v5355_v14 = vunpack.c.h.bf16 %v330_v56 }
 0x4c2   : > { %5439 = vst.msk [vmem:[%s8531_s18 + $0x98] sm:$0xff] %vm424_vm0, %v5407_v7 }
 0x4c3   : > { %v5294_v57 = vpop.f32.mrf.mxu2 }
 0x4c4   : > { %v5295_v52 = vadd.f32 %v8519_v39, %v5294_v57 }
 0x4c6   : > { %v5376_v50 = vadd.f32 %v5344_v54, %v5295_v52 }
 0x4c8   : > { %v5408_v44 = vmax.f32 %v5376_v50, 0.0 }
 0x4ca   : > { %5440 = vst.msk [vmem:[%s8531_s18 + $0xa0] sm:$0xff] %vm424_vm0, %v5408_v44 }
 0x4cb   : > { %v5296_v15 = vpop.f32.mrf.mxu2 }
 0x4cc   : > { %v5297_v43 = vadd.f32 %v8519_v39, %v5296_v15 }
 0x4ce   : > { %v5377_v46 = vadd.f32 %v5345_v41, %v5297_v43 }
 0x4d0   : > { %v5409_v18 = vmax.f32 %v5377_v46, 0.0 }
 0x4d2   : > { %5441 = vst.msk [vmem:[%s8531_s18 + $0xa8] sm:$0xff] %vm424_vm0, %v5409_v18 }
 0x4d3   : > { %v5299_v24 = vpop.f32.mrf.mxu2 }
 0x4d4   : > { %v5300_v26 = vadd.f32 %v8519_v39, %v5299_v24 }
 0x4d6   : > { %v5378_v12 = vadd.f32 %v5346_v40, %v5300_v26 }
 0x4d8   : > { %v5410_v20 = vmax.f32 %v5378_v12, 0.0 }
 0x4da   : > { %5442 = vst.msk [vmem:[%s8531_s18 + $0xb0] sm:$0xff] %vm424_vm0, %v5410_v20 }
 0x4db   : > { %v5301_v30 = vpop.f32.mrf.mxu2 }
 0x4dc   : > { %v5302_v62 = vadd.f32 %v8519_v39, %v5301_v30 }
 0x4de   : > { %v5379_v60 = vadd.f32 %v5347_v9, %v5302_v62 }
 0x4e0   : > { %v5411_v11 = vmax.f32 %v5379_v60, 0.0 }
 0x4e2   : > { %5443 = vst.msk [vmem:[%s8531_s18 + $0xb8] sm:$0xff] %vm424_vm0, %v5411_v11 }
 0x4e3   : > { %v5304_v35 = vpop.f32.mrf.mxu2 }
 0x4e4   : > { %v5305_v32 = vadd.f32 %v8519_v39, %v5304_v35 }
 0x4e6   : > { %v5380_v1 = vadd.f32 %v5348_v51, %v5305_v32 }
 0x4e8   : > { %v5412_v5 = vmax.f32 %v5380_v1, 0.0 }
 0x4ea   : > { %5444 = vst.msk [vmem:[%s8531_s18 + $0xc0] sm:$0xff] %vm424_vm0, %v5412_v5 }
 0x4eb   : > { %v5306_v33 = vpop.f32.mrf.mxu2 }
 0x4ec   : > { %v5307_v8 = vadd.f32 %v8519_v39, %v5306_v33 }
 0x4ee   : > { %v5381_v59 = vadd.f32 %v5349_v53, %v5307_v8 }
 0x4f0   : > { %v5413_v28 = vmax.f32 %v5381_v59, 0.0 }
 0x4f2   : > { %5445 = vst.msk [vmem:[%s8531_s18 + $0xc8] sm:$0xff] %vm424_vm0, %v5413_v28 }
 0x4f3   : > { %v5309_v17 = vpop.f32.mrf.mxu2 }
 0x4f4   : > { %v5310_v19 = vadd.f32 %v8519_v39, %v5309_v17 }
 0x4f6   : > { %v5382_v47 = vadd.f32 %v5350_v29, %v5310_v19 }
 0x4f8   : > { %v5414_v21 = vmax.f32 %v5382_v47, 0.0 }
 0x4fa   : > { %5446 = vst.msk [vmem:[%s8531_s18 + $0xd0] sm:$0xff] %vm424_vm0, %v5414_v21 }
 0x4fb   : > { %v5311_v13 = vpop.f32.mrf.mxu2 }
 0x4fc   : > { %v5312_v2 = vadd.f32 %v8519_v39, %v5311_v13 }
 0x4fe   : > { %v5383_v0 = vadd.f32 %v5351_v23, %v5312_v2 }
 0x500   : > { %v5415_v27 = vmax.f32 %v5383_v0, 0.0 }
 0x502   : > { %5447 = vst.msk [vmem:[%s8531_s18 + $0xd8] sm:$0xff] %vm424_vm0, %v5415_v27 }
 0x503   : > { %v5314_v55 = vpop.f32.mrf.mxu2 }
 0x504   : > { %v5315_v31 = vadd.f32 %v8519_v39, %v5314_v55 }
 0x506   : > { %v5384_v61 = vadd.f32 %v5352_v45, %v5315_v31 }
 0x508   : > { %v5416_v38 = vmax.f32 %v5384_v61, 0.0 }
 0x50a   : > { %5448 = vst.msk [vmem:[%s8531_s18 + $0xe0] sm:$0xff] %vm424_vm0, %v5416_v38 }
 0x50b   : > { %v5316_v49 = vpop.f32.mrf.mxu2 }
 0x50c   : > { %v5317_v22 = vadd.f32 %v8519_v39, %v5316_v49 }
 0x50e   : > { %v5385_v36 = vadd.f32 %v5353_v16, %v5317_v22 }
 0x510   : > { %v5417_v4 = vmax.f32 %v5385_v36, 0.0 }
 0x512   : > { %5449 = vst.msk [vmem:[%s8531_s18 + $0xe8] sm:$0xff] %vm424_vm0, %v5417_v4 }
 0x513   : > { %v5319_v34 = vpop.f32.mrf.mxu2 }
 0x514   : > { %v5320_v37 = vadd.f32 %v8519_v39, %v5319_v34 }
 0x516   : > { %v5386_v63 = vadd.f32 %v5354_v3, %v5320_v37 }
 0x518   : > { %v5418_v6 = vmax.f32 %v5386_v63, 0.0 }
 0x51a   : > { %5450 = vst.msk [vmem:[%s8531_s18 + $0xf0] sm:$0xff] %vm424_vm0, %v5418_v6 }
 0x51b   : > { %v5321_v48 = vpop.f32.mrf.mxu2 }
 0x51c   : > { %v5322_v7 = vadd.f32 %v8519_v39, %v5321_v48 }
 0x51e   : > { %v5387_v54 = vadd.f32 %v5355_v14, %v5322_v7 }
 0x520   : > { %v5419_v57 = vmax.f32 %v5387_v54, 0.0 }
 0x522   : > { %5451 = vst.msk [vmem:[%s8531_s18 + $0xf8] sm:$0xff] %vm424_vm0, %v5419_v57 }
 0x523   : > { %6260 = shalt.err (!%p6257_p4)
}
 0x524   : > { %s6304_s22 = smov 128   ;;  %s6305_s18 = smov 8  }
 0x525   : > { %6119 = dma.vmem_to_hbm [thread:$0]  (%p6396_p11), %s5466_s16, 4096, %s5468_s9, %s5453_s28, %s6304_s22, %s6304_s22, %s6305_s18  }
 0x526 PF: > { %s5482_s19 = sand.u32 1, %s6287_s24   ;;  %p9009_p7 = scmp.ge.s32.totalorder %s6299_s27, 2 }
 0x527   : > { %s5483_s15 = scalar_lea.sflag [#allocation5], %s5482_s19 }
 0x528   : > { %p6126_p5 = pnand %p9009_p7, %p6400_p12 }
 0x52a   : > { %p6127_p8 = pneg %p6126_p5 }
 0x52c   : > { %6282 = dma.done.wait (%p6127_p8), %s5483_s15, 4096  }
 0x52d   : > { %6284 = vsyncadd (%p6127_p8), %s5483_s15, 4294963200  ;;  %s9010_s20 = sld [smem:[#allocation9_spill]]  ;;  %p20_p10 = scmp.ge.s32.totalorder %s6371_s30, 4  }
 0x52e   : > { %s9011_s24 = smov %s6291_s25  ;;  %s9012_s25 = smov %s6295_s26 }
 0x52f   : > { %s9014_s27 = smov %s6371_s30  ;;  %22 = sbr.rel (!%p20_p10) target bundleno = 5 (0x5), region = 104 }
 0x533   : > { %s9013_s26 = smov %s9010_s20 }
 0x534   :  { %5489 = vsyncpa [#allocation4], 1 }
 0x535   :  { %5491 = vsyncpa [#allocation4 + $0x1], 1 }
 0x536   :  { %5492 = vsyncpa [#allocation5], 1 }
 0x537   :  { %5494 = vsyncpa [#allocation5 + $0x1], 1 }

</bundles_post_ra>
